<compile_context>
chip_gen: v5e
topology: v5e:2x2
jax: 0.10.0
libtpu: 0.0.40
codegen_flags: <defaults>
</compile_context>

<pallas_src>
import functools

import jax
import jax.numpy as jnp
import numpy as np
from jax.experimental import pallas as pl
from jax.experimental.pallas import tpu as pltpu

SPATIAL_K = 7
PAD = (SPATIAL_K - 1) // 2


def cbam_kernel(x_ref, w1t_ref, w2t_ref, mask_ref, wsp_ref, o_ref, *, width):
    """One grid step: a (bt, C, HW) lane-dense block of the batch."""
    x = x_ref[...].astype(jnp.float32)               # (bt, C, HW); math in f32
    bt, _, hw = x.shape
    k = SPATIAL_K

    # ---------------- channel attention ----------------
    avg_c = jnp.mean(x, axis=2)                      # (bt, C)  == AdaptiveAvgPool2d(1)
    max_c = jnp.max(x, axis=2)                       # (bt, C)  == AdaptiveMaxPool2d(1)
    # One MXU push for both paths: stack avg/max on the leading axis, one dot with W1.T.
    stats = jnp.concatenate([avg_c, max_c], axis=0)  # (2*bt, C)
    h = jnp.maximum(
        jnp.dot(stats, w1t_ref[...], preferred_element_type=jnp.float32), 0.0)
    # Layer 2 has no bias, so sigmoid(mlp(avg)+mlp(max)) = sigmoid((h_avg+h_max) @ W2.T).
    h = h[:bt] + h[bt:]                              # (bt, hidden)
    logits = jnp.dot(h, w2t_ref[...], preferred_element_type=jnp.float32)   # (bt, C)
    ch_att = jax.nn.sigmoid(logits)
    x_ch = x * ch_att[:, :, None]                    # (bt, C, HW) lane-dense multiply

    # ---------------- spatial attention ----------------
    avg_sp = jnp.mean(x_ch, axis=1)                  # (bt, HW) mean over channels
    max_sp = jnp.max(x_ch, axis=1)                   # (bt, HW) max over channels

    # Direct 7x7 conv (2 -> 1 channels, pad=3, no bias) in the flat layout.  Each tap
    # (ky, kx) shares one flat shift off = (ky-3)*W + (kx-3) across both input channels:
    # combine with scalar weights first, rotate once on the XLU, then zero the lanes whose
    # source fell outside the image (vertical or horizontal) via the precomputed mask.
    acc = jnp.zeros((bt, hw), jnp.float32)
    for ky in range(k):
        for kx in range(k):
            idx = ky * k + kx
            w_avg = wsp_ref[idx]                     # SMEM scalar
            w_max = wsp_ref[k * k + idx]             # SMEM scalar
            tap = w_avg * avg_sp + w_max * max_sp    # value at the *source* position
            off = (ky - PAD) * width + (kx - PAD)
            shift = (-off) % hw
            if shift:
                tap = pltpu.roll(tap, shift, axis=1)   # tap[p] = combined[p + off]
            if off:
                tap = tap * mask_ref[idx:idx + 1, :]   # zero out-of-image lanes
            acc = acc + tap

    sp_att = jax.nn.sigmoid(acc)                     # (bt, HW)
    o_ref[...] = (x_ch * sp_att[:, None, :]).astype(o_ref.dtype)


def _pick_batch_tile(batch, per_image_bytes, budget=4 << 20):
    """Largest divisor-of-batch tile within the VMEM budget, keeping >= 2 grid steps."""
    cap = max(1, budget // max(per_image_bytes, 1))
    if batch >= 2:
        cap = min(cap, batch // 2)   # >= 2 grid steps: megacore sharding + DMA/compute overlap
    bt = max(1, min(batch, cap))
    while bt > 1 and batch % bt:
        bt -= 1
    return bt


def cbam_pallas(x, w1, w2, w_spatial):
    """x: (B, C, H, W); w1: (hidden, C); w2: (C, hidden); w_spatial: (1, 2, 7, 7)."""
    B, C, H, W = x.shape
    hidden = w1.shape[0]
    HW = H * W
    K = SPATIAL_K

    x_flat = x.reshape(B, C, HW)                                 # keep input dtype; cast in-kernel
    w1_t = jnp.asarray(w1, jnp.float32).T                        # (C, hidden)
    w2_t = jnp.asarray(w2, jnp.float32).T                        # (hidden, C)
    wsp_flat = jnp.asarray(w_spatial, jnp.float32).reshape(-1)   # (2*K*K,) ci-major, then ky, kx

    # (K*K, HW) tap-validity mask: 1.0 where the shifted source stays inside the image
    # both vertically and horizontally (also covers the circular-roll wraparound lanes).
    ys, xs = np.divmod(np.arange(HW), W)
    rows = []
    for ky in range(K):
        dy = ky - PAD
        row_ok = (ys + dy >= 0) & (ys + dy < H)
        for kx in range(K):
            dx = kx - PAD
            col_ok = (xs + dx >= 0) & (xs + dx < W)
            rows.append((row_ok & col_ok).astype(np.float32))
    tap_mask = jnp.asarray(np.stack(rows, axis=0))               # (K*K, HW)

    per_image_f32 = C * HW * 4                                   # in-kernel temporaries are f32
    bt = _pick_batch_tile(B, per_image_f32)
    block_bytes = bt * per_image_f32
    # in/out double buffers + f32 temporaries ~ 6-8x block bytes; cap for v7x (32 MiB scoped).
    vmem_limit = int(min(max(8 * block_bytes + (1 << 20), 16 << 20), 28 << 20))

    kernel = functools.partial(cbam_kernel, width=W)
    out_flat = pl.pallas_call(
        kernel,
        out_shape=jax.ShapeDtypeStruct((B, C, HW), x.dtype),
        grid=(B // bt,),
        in_specs=[
            pl.BlockSpec((bt, C, HW), lambda b: (b, 0, 0)),
            pl.BlockSpec((C, hidden), lambda b: (0, 0)),
            pl.BlockSpec((hidden, C), lambda b: (0, 0)),
            pl.BlockSpec((K * K, HW), lambda b: (0, 0)),
            pl.BlockSpec(memory_space=pltpu.MemorySpace.SMEM),
        ],
        out_specs=pl.BlockSpec((bt, C, HW), lambda b: (b, 0, 0)),
        compiler_params=pltpu.CompilerParams(
            # Batch tiles are fully independent: shard across TensorCores on v7x.
            dimension_semantics=("parallel",),
            vmem_limit_bytes=vmem_limit),
    )(x_flat, w1_t, w2_t, tap_mask, wsp_flat)

    return out_flat.reshape(B, C, H, W)


def cbam_reference(x, w1, w2, w_spatial):
    """Pure-JAX reference matching the PyTorch forward."""
    avg = jnp.mean(x, axis=(2, 3), keepdims=True)
    mx = jnp.max(x, axis=(2, 3), keepdims=True)

    def mlp(v):                                   # v: (B, C, 1, 1)
        v2 = v[:, :, 0, 0]                        # (B, C)
        h = jnp.maximum(v2 @ w1.T, 0.0)
        return (h @ w2.T)[:, :, None, None]

    channel_att = jax.nn.sigmoid(mlp(avg) + mlp(mx))
    x_ch = x * channel_att
    avg_sp = jnp.mean(x_ch, axis=1, keepdims=True)
    max_sp = jnp.max(x_ch, axis=1, keepdims=True)
    feats = jnp.concatenate([avg_sp, max_sp], axis=1)
    conv = jax.lax.conv_general_dilated(
        feats, w_spatial, window_strides=(1, 1),
        padding=((PAD, PAD), (PAD, PAD)),
        dimension_numbers=("NCHW", "OIHW", "NCHW"))
    return x_ch * jax.nn.sigmoid(conv)


if __name__ == "__main__":
    B, C, H, W = 2, 32, 16, 16
    reduction = 16
    hidden = C // reduction

    key = jax.random.PRNGKey(0)
    kx, k1, k2, k3 = jax.random.split(key, 4)

    x = jax.random.normal(kx, (B, C, H, W), dtype=jnp.float32)

    # kaiming_normal_(mode='fan_out', nonlinearity='relu') -> std = sqrt(2 / fan_out)
    w1 = jax.random.normal(k1, (hidden, C), jnp.float32) * np.sqrt(2.0 / hidden)
    w2 = jax.random.normal(k2, (C, hidden), jnp.float32) * np.sqrt(2.0 / C)
    w_spatial = (jax.random.normal(k3, (1, 2, SPATIAL_K, SPATIAL_K), jnp.float32)
                 * np.sqrt(2.0 / (1 * SPATIAL_K * SPATIAL_K)))

    out = cbam_pallas(x, w1, w2, w_spatial)
    out = jax.block_until_ready(out)

    ref = cbam_reference(x, w1, w2, w_spatial)
    assert out.shape == (B, C, H, W)
    np.testing.assert_allclose(np.asarray(out), np.asarray(ref), rtol=1e-4, atol=1e-4)
    print("KERNEL_OK")
</pallas_src>

<mosaic_0001>
module attributes {stable_mosaic.version = 11 : i64} {
  func.func @cbam_kernel(%arg0: i32, %arg1: memref<1x32x256xf32, #tpu.memory_space<vmem>>, %arg2: memref<32x2xf32, #tpu.memory_space<vmem>>, %arg3: memref<2x32xf32, #tpu.memory_space<vmem>>, %arg4: memref<49x256xf32, #tpu.memory_space<vmem>>, %arg5: memref<98xf32, #tpu.memory_space<smem>>, %arg6: memref<1x32x256xf32, #tpu.memory_space<vmem>>) attributes {dimension_semantics = [#tpu.dimension_semantics<parallel>], iteration_bounds = array<i64: 2>, scalar_prefetch = 0 : i64, scratch_operands = 0 : i64, tpu.core_type = #tpu.core_type<tc>, window_params = [{transform_indices = @transform_0, window_bounds = array<i64: 1, 32, 256>}, {pipeline_mode = #tpu.pipeline_mode<synchronous>, transform_indices = @transform_1, window_bounds = array<i64: 32, 2>}, {pipeline_mode = #tpu.pipeline_mode<synchronous>, transform_indices = @transform_2, window_bounds = array<i64: 2, 32>}, {pipeline_mode = #tpu.pipeline_mode<synchronous>, transform_indices = @transform_3, window_bounds = array<i64: 49, 256>}, {transform_indices = @transform_4, window_bounds = array<i64: 98>}, {transform_indices = @transform_5, window_bounds = array<i64: 1, 32, 256>}]} {
    %c0 = arith.constant 0 : index
    %c0_0 = arith.constant 0 : index
    %c0_1 = arith.constant 0 : index
    %0 = vector.load %arg1[%c0, %c0_0, %c0_1] : memref<1x32x256xf32, #tpu.memory_space<vmem>>, vector<1x32x256xf32>
    %cst = arith.constant dense<0.000000e+00> : vector<1x32xf32>
    %1 = vector.multi_reduction <add>, %0, %cst [2] : vector<1x32x256xf32> to vector<1x32xf32>
    %cst_2 = arith.constant 2.560000e+02 : f32
    %2 = vector.broadcast %cst_2 : f32 to vector<1x32xf32>
    %3 = arith.divf %1, %2 : vector<1x32xf32>
    %cst_3 = arith.constant dense<0xFF800000> : vector<1x32xf32>
    %4 = vector.multi_reduction <maximumf>, %0, %cst_3 [2] : vector<1x32x256xf32> to vector<1x32xf32>
    %5 = tpu.concatenate %3, %4 in 0 : vector<1x32xf32>, vector<1x32xf32> -> vector<2x32xf32>
    %c0_4 = arith.constant 0 : index
    %c0_5 = arith.constant 0 : index
    %6 = vector.load %arg2[%c0_4, %c0_5] : memref<32x2xf32, #tpu.memory_space<vmem>>, vector<32x2xf32>
    %cst_6 = arith.constant dense<0.000000e+00> : vector<2x2xf32>
    %7 = tpu.matmul %5, %6, %cst_6 {dimension_numbers = #tpu.dot_dimension_numbers<[1], [0], [0], [1], [0, 0, 1, 1], [], []>} : vector<2x32xf32>, vector<32x2xf32>, vector<2x2xf32> -> vector<2x2xf32>
    %cst_7 = arith.constant 0.000000e+00 : f32
    %8 = vector.broadcast %cst_7 : f32 to vector<2x2xf32>
    %9 = arith.maximumf %7, %8 : vector<2x2xf32>
    %10 = vector.extract_strided_slice %9 {offsets = [0, 0], sizes = [1, 2], strides = [1, 1]} : vector<2x2xf32> to vector<1x2xf32>
    %11 = vector.extract_strided_slice %9 {offsets = [1, 0], sizes = [1, 2], strides = [1, 1]} : vector<2x2xf32> to vector<1x2xf32>
    %12 = arith.addf %10, %11 : vector<1x2xf32>
    %c0_8 = arith.constant 0 : index
    %c0_9 = arith.constant 0 : index
    %13 = vector.load %arg3[%c0_8, %c0_9] : memref<2x32xf32, #tpu.memory_space<vmem>>, vector<2x32xf32>
    %cst_10 = arith.constant dense<0.000000e+00> : vector<1x32xf32>
    %14 = tpu.matmul %12, %13, %cst_10 {dimension_numbers = #tpu.dot_dimension_numbers<[1], [0], [0], [1], [0, 0, 1, 1], [], []>} : vector<1x2xf32>, vector<2x32xf32>, vector<1x32xf32> -> vector<1x32xf32>
    %15 = arith.negf %14 : vector<1x32xf32>
    %16 = math.exp %15 : vector<1x32xf32>
    %cst_11 = arith.constant 1.000000e+00 : f32
    %17 = vector.broadcast %cst_11 : f32 to vector<1x32xf32>
    %18 = arith.addf %17, %16 : vector<1x32xf32>
    %19 = arith.divf %17, %18 : vector<1x32xf32>
    %20 = vector.shape_cast %19 : vector<1x32xf32> to vector<1x32x1xf32>
    %21 = vector.broadcast %20 : vector<1x32x1xf32> to vector<1x32x256xf32>
    %22 = arith.mulf %0, %21 : vector<1x32x256xf32>
    %cst_12 = arith.constant dense<0.000000e+00> : vector<1x256xf32>
    %23 = vector.multi_reduction <add>, %22, %cst_12 [1] : vector<1x32x256xf32> to vector<1x256xf32>
    %cst_13 = arith.constant 3.200000e+01 : f32
    %24 = vector.broadcast %cst_13 : f32 to vector<1x256xf32>
    %25 = arith.divf %23, %24 : vector<1x256xf32>
    %cst_14 = arith.constant dense<0xFF800000> : vector<1x256xf32>
    %26 = vector.multi_reduction <maximumf>, %22, %cst_14 [1] : vector<1x32x256xf32> to vector<1x256xf32>
    %cst_15 = arith.constant 0.000000e+00 : f32
    %27 = vector.broadcast %cst_15 : f32 to vector<1x256xf32>
    %c0_16 = arith.constant 0 : index
    %28 = memref.load %arg5[%c0_16] : memref<98xf32, #tpu.memory_space<smem>>
    %c49 = arith.constant 49 : index
    %29 = memref.load %arg5[%c49] : memref<98xf32, #tpu.memory_space<smem>>
    %30 = vector.broadcast %28 : f32 to vector<1x256xf32>
    %31 = arith.mulf %30, %25 : vector<1x256xf32>
    %32 = vector.broadcast %29 : f32 to vector<1x256xf32>
    %33 = arith.mulf %32, %26 : vector<1x256xf32>
    %34 = arith.addf %31, %33 : vector<1x256xf32>
    %c51_i32 = arith.constant 51 : i32
    %35 = tpu.dynamic_rotate %34 by %c51_i32 dim 1 : vector<1x256xf32>, i32 -> vector<1x256xf32>
    %c0_17 = arith.constant 0 : index
    %c0_18 = arith.constant 0 : index
    %36 = vector.load %arg4[%c0_17, %c0_18] : memref<49x256xf32, #tpu.memory_space<vmem>>, vector<1x256xf32>
    %37 = arith.mulf %35, %36 : vector<1x256xf32>
    %38 = arith.addf %27, %37 : vector<1x256xf32>
    %c1 = arith.constant 1 : index
    %39 = memref.load %arg5[%c1] : memref<98xf32, #tpu.memory_space<smem>>
    %c50 = arith.constant 50 : index
    %40 = memref.load %arg5[%c50] : memref<98xf32, #tpu.memory_space<smem>>
    %41 = vector.broadcast %39 : f32 to vector<1x256xf32>
    %42 = arith.mulf %41, %25 : vector<1x256xf32>
    %43 = vector.broadcast %40 : f32 to vector<1x256xf32>
    %44 = arith.mulf %43, %26 : vector<1x256xf32>
    %45 = arith.addf %42, %44 : vector<1x256xf32>
    %c50_i32 = arith.constant 50 : i32
    %46 = tpu.dynamic_rotate %45 by %c50_i32 dim 1 : vector<1x256xf32>, i32 -> vector<1x256xf32>
    %c1_19 = arith.constant 1 : index
    %c0_20 = arith.constant 0 : index
    %47 = vector.load %arg4[%c1_19, %c0_20] : memref<49x256xf32, #tpu.memory_space<vmem>>, vector<1x256xf32>
    %48 = arith.mulf %46, %47 : vector<1x256xf32>
    %49 = arith.addf %38, %48 : vector<1x256xf32>
    %c2 = arith.constant 2 : index
    %50 = memref.load %arg5[%c2] : memref<98xf32, #tpu.memory_space<smem>>
    %c51 = arith.constant 51 : index
    %51 = memref.load %arg5[%c51] : memref<98xf32, #tpu.memory_space<smem>>
    %52 = vector.broadcast %50 : f32 to vector<1x256xf32>
    %53 = arith.mulf %52, %25 : vector<1x256xf32>
    %54 = vector.broadcast %51 : f32 to vector<1x256xf32>
    %55 = arith.mulf %54, %26 : vector<1x256xf32>
    %56 = arith.addf %53, %55 : vector<1x256xf32>
    %c49_i32 = arith.constant 49 : i32
    %57 = tpu.dynamic_rotate %56 by %c49_i32 dim 1 : vector<1x256xf32>, i32 -> vector<1x256xf32>
    %c2_21 = arith.constant 2 : index
    %c0_22 = arith.constant 0 : index
    %58 = vector.load %arg4[%c2_21, %c0_22] : memref<49x256xf32, #tpu.memory_space<vmem>>, vector<1x256xf32>
    %59 = arith.mulf %57, %58 : vector<1x256xf32>
    %60 = arith.addf %49, %59 : vector<1x256xf32>
    %c3 = arith.constant 3 : index
    %61 = memref.load %arg5[%c3] : memref<98xf32, #tpu.memory_space<smem>>
    %c52 = arith.constant 52 : index
    %62 = memref.load %arg5[%c52] : memref<98xf32, #tpu.memory_space<smem>>
    %63 = vector.broadcast %61 : f32 to vector<1x256xf32>
    %64 = arith.mulf %63, %25 : vector<1x256xf32>
    %65 = vector.broadcast %62 : f32 to vector<1x256xf32>
    %66 = arith.mulf %65, %26 : vector<1x256xf32>
    %67 = arith.addf %64, %66 : vector<1x256xf32>
    %c48_i32 = arith.constant 48 : i32
    %68 = tpu.dynamic_rotate %67 by %c48_i32 dim 1 : vector<1x256xf32>, i32 -> vector<1x256xf32>
    %c3_23 = arith.constant 3 : index
    %c0_24 = arith.constant 0 : index
    %69 = vector.load %arg4[%c3_23, %c0_24] : memref<49x256xf32, #tpu.memory_space<vmem>>, vector<1x256xf32>
    %70 = arith.mulf %68, %69 : vector<1x256xf32>
    %71 = arith.addf %60, %70 : vector<1x256xf32>
    %c4 = arith.constant 4 : index
    %72 = memref.load %arg5[%c4] : memref<98xf32, #tpu.memory_space<smem>>
    %c53 = arith.constant 53 : index
    %73 = memref.load %arg5[%c53] : memref<98xf32, #tpu.memory_space<smem>>
    %74 = vector.broadcast %72 : f32 to vector<1x256xf32>
    %75 = arith.mulf %74, %25 : vector<1x256xf32>
    %76 = vector.broadcast %73 : f32 to vector<1x256xf32>
    %77 = arith.mulf %76, %26 : vector<1x256xf32>
    %78 = arith.addf %75, %77 : vector<1x256xf32>
    %c47_i32 = arith.constant 47 : i32
    %79 = tpu.dynamic_rotate %78 by %c47_i32 dim 1 : vector<1x256xf32>, i32 -> vector<1x256xf32>
    %c4_25 = arith.constant 4 : index
    %c0_26 = arith.constant 0 : index
    %80 = vector.load %arg4[%c4_25, %c0_26] : memref<49x256xf32, #tpu.memory_space<vmem>>, vector<1x256xf32>
    %81 = arith.mulf %79, %80 : vector<1x256xf32>
    %82 = arith.addf %71, %81 : vector<1x256xf32>
    %c5 = arith.constant 5 : index
    %83 = memref.load %arg5[%c5] : memref<98xf32, #tpu.memory_space<smem>>
    %c54 = arith.constant 54 : index
    %84 = memref.load %arg5[%c54] : memref<98xf32, #tpu.memory_space<smem>>
    %85 = vector.broadcast %83 : f32 to vector<1x256xf32>
    %86 = arith.mulf %85, %25 : vector<1x256xf32>
    %87 = vector.broadcast %84 : f32 to vector<1x256xf32>
    %88 = arith.mulf %87, %26 : vector<1x256xf32>
    %89 = arith.addf %86, %88 : vector<1x256xf32>
    %c46_i32 = arith.constant 46 : i32
    %90 = tpu.dynamic_rotate %89 by %c46_i32 dim 1 : vector<1x256xf32>, i32 -> vector<1x256xf32>
    %c5_27 = arith.constant 5 : index
    %c0_28 = arith.constant 0 : index
    %91 = vector.load %arg4[%c5_27, %c0_28] : memref<49x256xf32, #tpu.memory_space<vmem>>, vector<1x256xf32>
    %92 = arith.mulf %90, %91 : vector<1x256xf32>
    %93 = arith.addf %82, %92 : vector<1x256xf32>
    %c6 = arith.constant 6 : index
    %94 = memref.load %arg5[%c6] : memref<98xf32, #tpu.memory_space<smem>>
    %c55 = arith.constant 55 : index
    %95 = memref.load %arg5[%c55] : memref<98xf32, #tpu.memory_space<smem>>
    %96 = vector.broadcast %94 : f32 to vector<1x256xf32>
    %97 = arith.mulf %96, %25 : vector<1x256xf32>
    %98 = vector.broadcast %95 : f32 to vector<1x256xf32>
    %99 = arith.mulf %98, %26 : vector<1x256xf32>
    %100 = arith.addf %97, %99 : vector<1x256xf32>
    %c45_i32 = arith.constant 45 : i32
    %101 = tpu.dynamic_rotate %100 by %c45_i32 dim 1 : vector<1x256xf32>, i32 -> vector<1x256xf32>
    %c6_29 = arith.constant 6 : index
    %c0_30 = arith.constant 0 : index
    %102 = vector.load %arg4[%c6_29, %c0_30] : memref<49x256xf32, #tpu.memory_space<vmem>>, vector<1x256xf32>
    %103 = arith.mulf %101, %102 : vector<1x256xf32>
    %104 = arith.addf %93, %103 : vector<1x256xf32>
    %c7 = arith.constant 7 : index
    %105 = memref.load %arg5[%c7] : memref<98xf32, #tpu.memory_space<smem>>
    %c56 = arith.constant 56 : index
    %106 = memref.load %arg5[%c56] : memref<98xf32, #tpu.memory_space<smem>>
    %107 = vector.broadcast %105 : f32 to vector<1x256xf32>
    %108 = arith.mulf %107, %25 : vector<1x256xf32>
    %109 = vector.broadcast %106 : f32 to vector<1x256xf32>
    %110 = arith.mulf %109, %26 : vector<1x256xf32>
    %111 = arith.addf %108, %110 : vector<1x256xf32>
    %c35_i32 = arith.constant 35 : i32
    %112 = tpu.dynamic_rotate %111 by %c35_i32 dim 1 : vector<1x256xf32>, i32 -> vector<1x256xf32>
    %c7_31 = arith.constant 7 : index
    %c0_32 = arith.constant 0 : index
    %113 = vector.load %arg4[%c7_31, %c0_32] : memref<49x256xf32, #tpu.memory_space<vmem>>, vector<1x256xf32>
    %114 = arith.mulf %112, %113 : vector<1x256xf32>
    %115 = arith.addf %104, %114 : vector<1x256xf32>
    %c8 = arith.constant 8 : index
    %116 = memref.load %arg5[%c8] : memref<98xf32, #tpu.memory_space<smem>>
    %c57 = arith.constant 57 : index
    %117 = memref.load %arg5[%c57] : memref<98xf32, #tpu.memory_space<smem>>
    %118 = vector.broadcast %116 : f32 to vector<1x256xf32>
    %119 = arith.mulf %118, %25 : vector<1x256xf32>
    %120 = vector.broadcast %117 : f32 to vector<1x256xf32>
    %121 = arith.mulf %120, %26 : vector<1x256xf32>
    %122 = arith.addf %119, %121 : vector<1x256xf32>
    %c34_i32 = arith.constant 34 : i32
    %123 = tpu.dynamic_rotate %122 by %c34_i32 dim 1 : vector<1x256xf32>, i32 -> vector<1x256xf32>
    %c8_33 = arith.constant 8 : index
    %c0_34 = arith.constant 0 : index
    %124 = vector.load %arg4[%c8_33, %c0_34] : memref<49x256xf32, #tpu.memory_space<vmem>>, vector<1x256xf32>
    %125 = arith.mulf %123, %124 : vector<1x256xf32>
    %126 = arith.addf %115, %125 : vector<1x256xf32>
    %c9 = arith.constant 9 : index
    %127 = memref.load %arg5[%c9] : memref<98xf32, #tpu.memory_space<smem>>
    %c58 = arith.constant 58 : index
    %128 = memref.load %arg5[%c58] : memref<98xf32, #tpu.memory_space<smem>>
    %129 = vector.broadcast %127 : f32 to vector<1x256xf32>
    %130 = arith.mulf %129, %25 : vector<1x256xf32>
    %131 = vector.broadcast %128 : f32 to vector<1x256xf32>
    %132 = arith.mulf %131, %26 : vector<1x256xf32>
    %133 = arith.addf %130, %132 : vector<1x256xf32>
    %c33_i32 = arith.constant 33 : i32
    %134 = tpu.dynamic_rotate %133 by %c33_i32 dim 1 : vector<1x256xf32>, i32 -> vector<1x256xf32>
    %c9_35 = arith.constant 9 : index
    %c0_36 = arith.constant 0 : index
    %135 = vector.load %arg4[%c9_35, %c0_36] : memref<49x256xf32, #tpu.memory_space<vmem>>, vector<1x256xf32>
    %136 = arith.mulf %134, %135 : vector<1x256xf32>
    %137 = arith.addf %126, %136 : vector<1x256xf32>
    %c10 = arith.constant 10 : index
    %138 = memref.load %arg5[%c10] : memref<98xf32, #tpu.memory_space<smem>>
    %c59 = arith.constant 59 : index
    %139 = memref.load %arg5[%c59] : memref<98xf32, #tpu.memory_space<smem>>
    %140 = vector.broadcast %138 : f32 to vector<1x256xf32>
    %141 = arith.mulf %140, %25 : vector<1x256xf32>
    %142 = vector.broadcast %139 : f32 to vector<1x256xf32>
    %143 = arith.mulf %142, %26 : vector<1x256xf32>
    %144 = arith.addf %141, %143 : vector<1x256xf32>
    %c32_i32 = arith.constant 32 : i32
    %145 = tpu.dynamic_rotate %144 by %c32_i32 dim 1 : vector<1x256xf32>, i32 -> vector<1x256xf32>
    %c10_37 = arith.constant 10 : index
    %c0_38 = arith.constant 0 : index
    %146 = vector.load %arg4[%c10_37, %c0_38] : memref<49x256xf32, #tpu.memory_space<vmem>>, vector<1x256xf32>
    %147 = arith.mulf %145, %146 : vector<1x256xf32>
    %148 = arith.addf %137, %147 : vector<1x256xf32>
    %c11 = arith.constant 11 : index
    %149 = memref.load %arg5[%c11] : memref<98xf32, #tpu.memory_space<smem>>
    %c60 = arith.constant 60 : index
    %150 = memref.load %arg5[%c60] : memref<98xf32, #tpu.memory_space<smem>>
    %151 = vector.broadcast %149 : f32 to vector<1x256xf32>
    %152 = arith.mulf %151, %25 : vector<1x256xf32>
    %153 = vector.broadcast %150 : f32 to vector<1x256xf32>
    %154 = arith.mulf %153, %26 : vector<1x256xf32>
    %155 = arith.addf %152, %154 : vector<1x256xf32>
    %c31_i32 = arith.constant 31 : i32
    %156 = tpu.dynamic_rotate %155 by %c31_i32 dim 1 : vector<1x256xf32>, i32 -> vector<1x256xf32>
    %c11_39 = arith.constant 11 : index
    %c0_40 = arith.constant 0 : index
    %157 = vector.load %arg4[%c11_39, %c0_40] : memref<49x256xf32, #tpu.memory_space<vmem>>, vector<1x256xf32>
    %158 = arith.mulf %156, %157 : vector<1x256xf32>
    %159 = arith.addf %148, %158 : vector<1x256xf32>
    %c12 = arith.constant 12 : index
    %160 = memref.load %arg5[%c12] : memref<98xf32, #tpu.memory_space<smem>>
    %c61 = arith.constant 61 : index
    %161 = memref.load %arg5[%c61] : memref<98xf32, #tpu.memory_space<smem>>
    %162 = vector.broadcast %160 : f32 to vector<1x256xf32>
    %163 = arith.mulf %162, %25 : vector<1x256xf32>
    %164 = vector.broadcast %161 : f32 to vector<1x256xf32>
    %165 = arith.mulf %164, %26 : vector<1x256xf32>
    %166 = arith.addf %163, %165 : vector<1x256xf32>
    %c30_i32 = arith.constant 30 : i32
    %167 = tpu.dynamic_rotate %166 by %c30_i32 dim 1 : vector<1x256xf32>, i32 -> vector<1x256xf32>
    %c12_41 = arith.constant 12 : index
    %c0_42 = arith.constant 0 : index
    %168 = vector.load %arg4[%c12_41, %c0_42] : memref<49x256xf32, #tpu.memory_space<vmem>>, vector<1x256xf32>
    %169 = arith.mulf %167, %168 : vector<1x256xf32>
    %170 = arith.addf %159, %169 : vector<1x256xf32>
    %c13 = arith.constant 13 : index
    %171 = memref.load %arg5[%c13] : memref<98xf32, #tpu.memory_space<smem>>
    %c62 = arith.constant 62 : index
    %172 = memref.load %arg5[%c62] : memref<98xf32, #tpu.memory_space<smem>>
    %173 = vector.broadcast %171 : f32 to vector<1x256xf32>
    %174 = arith.mulf %173, %25 : vector<1x256xf32>
    %175 = vector.broadcast %172 : f32 to vector<1x256xf32>
    %176 = arith.mulf %175, %26 : vector<1x256xf32>
    %177 = arith.addf %174, %176 : vector<1x256xf32>
    %c29_i32 = arith.constant 29 : i32
    %178 = tpu.dynamic_rotate %177 by %c29_i32 dim 1 : vector<1x256xf32>, i32 -> vector<1x256xf32>
    %c13_43 = arith.constant 13 : index
    %c0_44 = arith.constant 0 : index
    %179 = vector.load %arg4[%c13_43, %c0_44] : memref<49x256xf32, #tpu.memory_space<vmem>>, vector<1x256xf32>
    %180 = arith.mulf %178, %179 : vector<1x256xf32>
    %181 = arith.addf %170, %180 : vector<1x256xf32>
    %c14 = arith.constant 14 : index
    %182 = memref.load %arg5[%c14] : memref<98xf32, #tpu.memory_space<smem>>
    %c63 = arith.constant 63 : index
    %183 = memref.load %arg5[%c63] : memref<98xf32, #tpu.memory_space<smem>>
    %184 = vector.broadcast %182 : f32 to vector<1x256xf32>
    %185 = arith.mulf %184, %25 : vector<1x256xf32>
    %186 = vector.broadcast %183 : f32 to vector<1x256xf32>
    %187 = arith.mulf %186, %26 : vector<1x256xf32>
    %188 = arith.addf %185, %187 : vector<1x256xf32>
    %c19_i32 = arith.constant 19 : i32
    %189 = tpu.dynamic_rotate %188 by %c19_i32 dim 1 : vector<1x256xf32>, i32 -> vector<1x256xf32>
    %c14_45 = arith.constant 14 : index
    %c0_46 = arith.constant 0 : index
    %190 = vector.load %arg4[%c14_45, %c0_46] : memref<49x256xf32, #tpu.memory_space<vmem>>, vector<1x256xf32>
    %191 = arith.mulf %189, %190 : vector<1x256xf32>
    %192 = arith.addf %181, %191 : vector<1x256xf32>
    %c15 = arith.constant 15 : index
    %193 = memref.load %arg5[%c15] : memref<98xf32, #tpu.memory_space<smem>>
    %c64 = arith.constant 64 : index
    %194 = memref.load %arg5[%c64] : memref<98xf32, #tpu.memory_space<smem>>
    %195 = vector.broadcast %193 : f32 to vector<1x256xf32>
    %196 = arith.mulf %195, %25 : vector<1x256xf32>
    %197 = vector.broadcast %194 : f32 to vector<1x256xf32>
    %198 = arith.mulf %197, %26 : vector<1x256xf32>
    %199 = arith.addf %196, %198 : vector<1x256xf32>
    %c18_i32 = arith.constant 18 : i32
    %200 = tpu.dynamic_rotate %199 by %c18_i32 dim 1 : vector<1x256xf32>, i32 -> vector<1x256xf32>
    %c15_47 = arith.constant 15 : index
    %c0_48 = arith.constant 0 : index
    %201 = vector.load %arg4[%c15_47, %c0_48] : memref<49x256xf32, #tpu.memory_space<vmem>>, vector<1x256xf32>
    %202 = arith.mulf %200, %201 : vector<1x256xf32>
    %203 = arith.addf %192, %202 : vector<1x256xf32>
    %c16 = arith.constant 16 : index
    %204 = memref.load %arg5[%c16] : memref<98xf32, #tpu.memory_space<smem>>
    %c65 = arith.constant 65 : index
    %205 = memref.load %arg5[%c65] : memref<98xf32, #tpu.memory_space<smem>>
    %206 = vector.broadcast %204 : f32 to vector<1x256xf32>
    %207 = arith.mulf %206, %25 : vector<1x256xf32>
    %208 = vector.broadcast %205 : f32 to vector<1x256xf32>
    %209 = arith.mulf %208, %26 : vector<1x256xf32>
    %210 = arith.addf %207, %209 : vector<1x256xf32>
    %c17_i32 = arith.constant 17 : i32
    %211 = tpu.dynamic_rotate %210 by %c17_i32 dim 1 : vector<1x256xf32>, i32 -> vector<1x256xf32>
    %c16_49 = arith.constant 16 : index
    %c0_50 = arith.constant 0 : index
    %212 = vector.load %arg4[%c16_49, %c0_50] : memref<49x256xf32, #tpu.memory_space<vmem>>, vector<1x256xf32>
    %213 = arith.mulf %211, %212 : vector<1x256xf32>
    %214 = arith.addf %203, %213 : vector<1x256xf32>
    %c17 = arith.constant 17 : index
    %215 = memref.load %arg5[%c17] : memref<98xf32, #tpu.memory_space<smem>>
    %c66 = arith.constant 66 : index
    %216 = memref.load %arg5[%c66] : memref<98xf32, #tpu.memory_space<smem>>
    %217 = vector.broadcast %215 : f32 to vector<1x256xf32>
    %218 = arith.mulf %217, %25 : vector<1x256xf32>
    %219 = vector.broadcast %216 : f32 to vector<1x256xf32>
    %220 = arith.mulf %219, %26 : vector<1x256xf32>
    %221 = arith.addf %218, %220 : vector<1x256xf32>
    %c16_i32 = arith.constant 16 : i32
    %222 = tpu.dynamic_rotate %221 by %c16_i32 dim 1 : vector<1x256xf32>, i32 -> vector<1x256xf32>
    %c17_51 = arith.constant 17 : index
    %c0_52 = arith.constant 0 : index
    %223 = vector.load %arg4[%c17_51, %c0_52] : memref<49x256xf32, #tpu.memory_space<vmem>>, vector<1x256xf32>
    %224 = arith.mulf %222, %223 : vector<1x256xf32>
    %225 = arith.addf %214, %224 : vector<1x256xf32>
    %c18 = arith.constant 18 : index
    %226 = memref.load %arg5[%c18] : memref<98xf32, #tpu.memory_space<smem>>
    %c67 = arith.constant 67 : index
    %227 = memref.load %arg5[%c67] : memref<98xf32, #tpu.memory_space<smem>>
    %228 = vector.broadcast %226 : f32 to vector<1x256xf32>
    %229 = arith.mulf %228, %25 : vector<1x256xf32>
    %230 = vector.broadcast %227 : f32 to vector<1x256xf32>
    %231 = arith.mulf %230, %26 : vector<1x256xf32>
    %232 = arith.addf %229, %231 : vector<1x256xf32>
    %c15_i32 = arith.constant 15 : i32
    %233 = tpu.dynamic_rotate %232 by %c15_i32 dim 1 : vector<1x256xf32>, i32 -> vector<1x256xf32>
    %c18_53 = arith.constant 18 : index
    %c0_54 = arith.constant 0 : index
    %234 = vector.load %arg4[%c18_53, %c0_54] : memref<49x256xf32, #tpu.memory_space<vmem>>, vector<1x256xf32>
    %235 = arith.mulf %233, %234 : vector<1x256xf32>
    %236 = arith.addf %225, %235 : vector<1x256xf32>
    %c19 = arith.constant 19 : index
    %237 = memref.load %arg5[%c19] : memref<98xf32, #tpu.memory_space<smem>>
    %c68 = arith.constant 68 : index
    %238 = memref.load %arg5[%c68] : memref<98xf32, #tpu.memory_space<smem>>
    %239 = vector.broadcast %237 : f32 to vector<1x256xf32>
    %240 = arith.mulf %239, %25 : vector<1x256xf32>
    %241 = vector.broadcast %238 : f32 to vector<1x256xf32>
    %242 = arith.mulf %241, %26 : vector<1x256xf32>
    %243 = arith.addf %240, %242 : vector<1x256xf32>
    %c14_i32 = arith.constant 14 : i32
    %244 = tpu.dynamic_rotate %243 by %c14_i32 dim 1 : vector<1x256xf32>, i32 -> vector<1x256xf32>
    %c19_55 = arith.constant 19 : index
    %c0_56 = arith.constant 0 : index
    %245 = vector.load %arg4[%c19_55, %c0_56] : memref<49x256xf32, #tpu.memory_space<vmem>>, vector<1x256xf32>
    %246 = arith.mulf %244, %245 : vector<1x256xf32>
    %247 = arith.addf %236, %246 : vector<1x256xf32>
    %c20 = arith.constant 20 : index
    %248 = memref.load %arg5[%c20] : memref<98xf32, #tpu.memory_space<smem>>
    %c69 = arith.constant 69 : index
    %249 = memref.load %arg5[%c69] : memref<98xf32, #tpu.memory_space<smem>>
    %250 = vector.broadcast %248 : f32 to vector<1x256xf32>
    %251 = arith.mulf %250, %25 : vector<1x256xf32>
    %252 = vector.broadcast %249 : f32 to vector<1x256xf32>
    %253 = arith.mulf %252, %26 : vector<1x256xf32>
    %254 = arith.addf %251, %253 : vector<1x256xf32>
    %c13_i32 = arith.constant 13 : i32
    %255 = tpu.dynamic_rotate %254 by %c13_i32 dim 1 : vector<1x256xf32>, i32 -> vector<1x256xf32>
    %c20_57 = arith.constant 20 : index
    %c0_58 = arith.constant 0 : index
    %256 = vector.load %arg4[%c20_57, %c0_58] : memref<49x256xf32, #tpu.memory_space<vmem>>, vector<1x256xf32>
    %257 = arith.mulf %255, %256 : vector<1x256xf32>
    %258 = arith.addf %247, %257 : vector<1x256xf32>
    %c21 = arith.constant 21 : index
    %259 = memref.load %arg5[%c21] : memref<98xf32, #tpu.memory_space<smem>>
    %c70 = arith.constant 70 : index
    %260 = memref.load %arg5[%c70] : memref<98xf32, #tpu.memory_space<smem>>
    %261 = vector.broadcast %259 : f32 to vector<1x256xf32>
    %262 = arith.mulf %261, %25 : vector<1x256xf32>
    %263 = vector.broadcast %260 : f32 to vector<1x256xf32>
    %264 = arith.mulf %263, %26 : vector<1x256xf32>
    %265 = arith.addf %262, %264 : vector<1x256xf32>
    %c3_i32 = arith.constant 3 : i32
    %266 = tpu.dynamic_rotate %265 by %c3_i32 dim 1 : vector<1x256xf32>, i32 -> vector<1x256xf32>
    %c21_59 = arith.constant 21 : index
    %c0_60 = arith.constant 0 : index
    %267 = vector.load %arg4[%c21_59, %c0_60] : memref<49x256xf32, #tpu.memory_space<vmem>>, vector<1x256xf32>
    %268 = arith.mulf %266, %267 : vector<1x256xf32>
    %269 = arith.addf %258, %268 : vector<1x256xf32>
    %c22 = arith.constant 22 : index
    %270 = memref.load %arg5[%c22] : memref<98xf32, #tpu.memory_space<smem>>
    %c71 = arith.constant 71 : index
    %271 = memref.load %arg5[%c71] : memref<98xf32, #tpu.memory_space<smem>>
    %272 = vector.broadcast %270 : f32 to vector<1x256xf32>
    %273 = arith.mulf %272, %25 : vector<1x256xf32>
    %274 = vector.broadcast %271 : f32 to vector<1x256xf32>
    %275 = arith.mulf %274, %26 : vector<1x256xf32>
    %276 = arith.addf %273, %275 : vector<1x256xf32>
    %c2_i32 = arith.constant 2 : i32
    %277 = tpu.dynamic_rotate %276 by %c2_i32 dim 1 : vector<1x256xf32>, i32 -> vector<1x256xf32>
    %c22_61 = arith.constant 22 : index
    %c0_62 = arith.constant 0 : index
    %278 = vector.load %arg4[%c22_61, %c0_62] : memref<49x256xf32, #tpu.memory_space<vmem>>, vector<1x256xf32>
    %279 = arith.mulf %277, %278 : vector<1x256xf32>
    %280 = arith.addf %269, %279 : vector<1x256xf32>
    %c23 = arith.constant 23 : index
    %281 = memref.load %arg5[%c23] : memref<98xf32, #tpu.memory_space<smem>>
    %c72 = arith.constant 72 : index
    %282 = memref.load %arg5[%c72] : memref<98xf32, #tpu.memory_space<smem>>
    %283 = vector.broadcast %281 : f32 to vector<1x256xf32>
    %284 = arith.mulf %283, %25 : vector<1x256xf32>
    %285 = vector.broadcast %282 : f32 to vector<1x256xf32>
    %286 = arith.mulf %285, %26 : vector<1x256xf32>
    %287 = arith.addf %284, %286 : vector<1x256xf32>
    %c1_i32 = arith.constant 1 : i32
    %288 = tpu.dynamic_rotate %287 by %c1_i32 dim 1 : vector<1x256xf32>, i32 -> vector<1x256xf32>
    %c23_63 = arith.constant 23 : index
    %c0_64 = arith.constant 0 : index
    %289 = vector.load %arg4[%c23_63, %c0_64] : memref<49x256xf32, #tpu.memory_space<vmem>>, vector<1x256xf32>
    %290 = arith.mulf %288, %289 : vector<1x256xf32>
    %291 = arith.addf %280, %290 : vector<1x256xf32>
    %c24 = arith.constant 24 : index
    %292 = memref.load %arg5[%c24] : memref<98xf32, #tpu.memory_space<smem>>
    %c73 = arith.constant 73 : index
    %293 = memref.load %arg5[%c73] : memref<98xf32, #tpu.memory_space<smem>>
    %294 = vector.broadcast %292 : f32 to vector<1x256xf32>
    %295 = arith.mulf %294, %25 : vector<1x256xf32>
    %296 = vector.broadcast %293 : f32 to vector<1x256xf32>
    %297 = arith.mulf %296, %26 : vector<1x256xf32>
    %298 = arith.addf %295, %297 : vector<1x256xf32>
    %299 = arith.addf %291, %298 : vector<1x256xf32>
    %c25 = arith.constant 25 : index
    %300 = memref.load %arg5[%c25] : memref<98xf32, #tpu.memory_space<smem>>
    %c74 = arith.constant 74 : index
    %301 = memref.load %arg5[%c74] : memref<98xf32, #tpu.memory_space<smem>>
    %302 = vector.broadcast %300 : f32 to vector<1x256xf32>
    %303 = arith.mulf %302, %25 : vector<1x256xf32>
    %304 = vector.broadcast %301 : f32 to vector<1x256xf32>
    %305 = arith.mulf %304, %26 : vector<1x256xf32>
    %306 = arith.addf %303, %305 : vector<1x256xf32>
    %c255_i32 = arith.constant 255 : i32
    %307 = tpu.dynamic_rotate %306 by %c255_i32 dim 1 : vector<1x256xf32>, i32 -> vector<1x256xf32>
    %c25_65 = arith.constant 25 : index
    %c0_66 = arith.constant 0 : index
    %308 = vector.load %arg4[%c25_65, %c0_66] : memref<49x256xf32, #tpu.memory_space<vmem>>, vector<1x256xf32>
    %309 = arith.mulf %307, %308 : vector<1x256xf32>
    %310 = arith.addf %299, %309 : vector<1x256xf32>
    %c26 = arith.constant 26 : index
    %311 = memref.load %arg5[%c26] : memref<98xf32, #tpu.memory_space<smem>>
    %c75 = arith.constant 75 : index
    %312 = memref.load %arg5[%c75] : memref<98xf32, #tpu.memory_space<smem>>
    %313 = vector.broadcast %311 : f32 to vector<1x256xf32>
    %314 = arith.mulf %313, %25 : vector<1x256xf32>
    %315 = vector.broadcast %312 : f32 to vector<1x256xf32>
    %316 = arith.mulf %315, %26 : vector<1x256xf32>
    %317 = arith.addf %314, %316 : vector<1x256xf32>
    %c254_i32 = arith.constant 254 : i32
    %318 = tpu.dynamic_rotate %317 by %c254_i32 dim 1 : vector<1x256xf32>, i32 -> vector<1x256xf32>
    %c26_67 = arith.constant 26 : index
    %c0_68 = arith.constant 0 : index
    %319 = vector.load %arg4[%c26_67, %c0_68] : memref<49x256xf32, #tpu.memory_space<vmem>>, vector<1x256xf32>
    %320 = arith.mulf %318, %319 : vector<1x256xf32>
    %321 = arith.addf %310, %320 : vector<1x256xf32>
    %c27 = arith.constant 27 : index
    %322 = memref.load %arg5[%c27] : memref<98xf32, #tpu.memory_space<smem>>
    %c76 = arith.constant 76 : index
    %323 = memref.load %arg5[%c76] : memref<98xf32, #tpu.memory_space<smem>>
    %324 = vector.broadcast %322 : f32 to vector<1x256xf32>
    %325 = arith.mulf %324, %25 : vector<1x256xf32>
    %326 = vector.broadcast %323 : f32 to vector<1x256xf32>
    %327 = arith.mulf %326, %26 : vector<1x256xf32>
    %328 = arith.addf %325, %327 : vector<1x256xf32>
    %c253_i32 = arith.constant 253 : i32
    %329 = tpu.dynamic_rotate %328 by %c253_i32 dim 1 : vector<1x256xf32>, i32 -> vector<1x256xf32>
    %c27_69 = arith.constant 27 : index
    %c0_70 = arith.constant 0 : index
    %330 = vector.load %arg4[%c27_69, %c0_70] : memref<49x256xf32, #tpu.memory_space<vmem>>, vector<1x256xf32>
    %331 = arith.mulf %329, %330 : vector<1x256xf32>
    %332 = arith.addf %321, %331 : vector<1x256xf32>
    %c28 = arith.constant 28 : index
    %333 = memref.load %arg5[%c28] : memref<98xf32, #tpu.memory_space<smem>>
    %c77 = arith.constant 77 : index
    %334 = memref.load %arg5[%c77] : memref<98xf32, #tpu.memory_space<smem>>
    %335 = vector.broadcast %333 : f32 to vector<1x256xf32>
    %336 = arith.mulf %335, %25 : vector<1x256xf32>
    %337 = vector.broadcast %334 : f32 to vector<1x256xf32>
    %338 = arith.mulf %337, %26 : vector<1x256xf32>
    %339 = arith.addf %336, %338 : vector<1x256xf32>
    %c243_i32 = arith.constant 243 : i32
    %340 = tpu.dynamic_rotate %339 by %c243_i32 dim 1 : vector<1x256xf32>, i32 -> vector<1x256xf32>
    %c28_71 = arith.constant 28 : index
    %c0_72 = arith.constant 0 : index
    %341 = vector.load %arg4[%c28_71, %c0_72] : memref<49x256xf32, #tpu.memory_space<vmem>>, vector<1x256xf32>
    %342 = arith.mulf %340, %341 : vector<1x256xf32>
    %343 = arith.addf %332, %342 : vector<1x256xf32>
    %c29 = arith.constant 29 : index
    %344 = memref.load %arg5[%c29] : memref<98xf32, #tpu.memory_space<smem>>
    %c78 = arith.constant 78 : index
    %345 = memref.load %arg5[%c78] : memref<98xf32, #tpu.memory_space<smem>>
    %346 = vector.broadcast %344 : f32 to vector<1x256xf32>
    %347 = arith.mulf %346, %25 : vector<1x256xf32>
    %348 = vector.broadcast %345 : f32 to vector<1x256xf32>
    %349 = arith.mulf %348, %26 : vector<1x256xf32>
    %350 = arith.addf %347, %349 : vector<1x256xf32>
    %c242_i32 = arith.constant 242 : i32
    %351 = tpu.dynamic_rotate %350 by %c242_i32 dim 1 : vector<1x256xf32>, i32 -> vector<1x256xf32>
    %c29_73 = arith.constant 29 : index
    %c0_74 = arith.constant 0 : index
    %352 = vector.load %arg4[%c29_73, %c0_74] : memref<49x256xf32, #tpu.memory_space<vmem>>, vector<1x256xf32>
    %353 = arith.mulf %351, %352 : vector<1x256xf32>
    %354 = arith.addf %343, %353 : vector<1x256xf32>
    %c30 = arith.constant 30 : index
    %355 = memref.load %arg5[%c30] : memref<98xf32, #tpu.memory_space<smem>>
    %c79 = arith.constant 79 : index
    %356 = memref.load %arg5[%c79] : memref<98xf32, #tpu.memory_space<smem>>
    %357 = vector.broadcast %355 : f32 to vector<1x256xf32>
    %358 = arith.mulf %357, %25 : vector<1x256xf32>
    %359 = vector.broadcast %356 : f32 to vector<1x256xf32>
    %360 = arith.mulf %359, %26 : vector<1x256xf32>
    %361 = arith.addf %358, %360 : vector<1x256xf32>
    %c241_i32 = arith.constant 241 : i32
    %362 = tpu.dynamic_rotate %361 by %c241_i32 dim 1 : vector<1x256xf32>, i32 -> vector<1x256xf32>
    %c30_75 = arith.constant 30 : index
    %c0_76 = arith.constant 0 : index
    %363 = vector.load %arg4[%c30_75, %c0_76] : memref<49x256xf32, #tpu.memory_space<vmem>>, vector<1x256xf32>
    %364 = arith.mulf %362, %363 : vector<1x256xf32>
    %365 = arith.addf %354, %364 : vector<1x256xf32>
    %c31 = arith.constant 31 : index
    %366 = memref.load %arg5[%c31] : memref<98xf32, #tpu.memory_space<smem>>
    %c80 = arith.constant 80 : index
    %367 = memref.load %arg5[%c80] : memref<98xf32, #tpu.memory_space<smem>>
    %368 = vector.broadcast %366 : f32 to vector<1x256xf32>
    %369 = arith.mulf %368, %25 : vector<1x256xf32>
    %370 = vector.broadcast %367 : f32 to vector<1x256xf32>
    %371 = arith.mulf %370, %26 : vector<1x256xf32>
    %372 = arith.addf %369, %371 : vector<1x256xf32>
    %c240_i32 = arith.constant 240 : i32
    %373 = tpu.dynamic_rotate %372 by %c240_i32 dim 1 : vector<1x256xf32>, i32 -> vector<1x256xf32>
    %c31_77 = arith.constant 31 : index
    %c0_78 = arith.constant 0 : index
    %374 = vector.load %arg4[%c31_77, %c0_78] : memref<49x256xf32, #tpu.memory_space<vmem>>, vector<1x256xf32>
    %375 = arith.mulf %373, %374 : vector<1x256xf32>
    %376 = arith.addf %365, %375 : vector<1x256xf32>
    %c32 = arith.constant 32 : index
    %377 = memref.load %arg5[%c32] : memref<98xf32, #tpu.memory_space<smem>>
    %c81 = arith.constant 81 : index
    %378 = memref.load %arg5[%c81] : memref<98xf32, #tpu.memory_space<smem>>
    %379 = vector.broadcast %377 : f32 to vector<1x256xf32>
    %380 = arith.mulf %379, %25 : vector<1x256xf32>
    %381 = vector.broadcast %378 : f32 to vector<1x256xf32>
    %382 = arith.mulf %381, %26 : vector<1x256xf32>
    %383 = arith.addf %380, %382 : vector<1x256xf32>
    %c239_i32 = arith.constant 239 : i32
    %384 = tpu.dynamic_rotate %383 by %c239_i32 dim 1 : vector<1x256xf32>, i32 -> vector<1x256xf32>
    %c32_79 = arith.constant 32 : index
    %c0_80 = arith.constant 0 : index
    %385 = vector.load %arg4[%c32_79, %c0_80] : memref<49x256xf32, #tpu.memory_space<vmem>>, vector<1x256xf32>
    %386 = arith.mulf %384, %385 : vector<1x256xf32>
    %387 = arith.addf %376, %386 : vector<1x256xf32>
    %c33 = arith.constant 33 : index
    %388 = memref.load %arg5[%c33] : memref<98xf32, #tpu.memory_space<smem>>
    %c82 = arith.constant 82 : index
    %389 = memref.load %arg5[%c82] : memref<98xf32, #tpu.memory_space<smem>>
    %390 = vector.broadcast %388 : f32 to vector<1x256xf32>
    %391 = arith.mulf %390, %25 : vector<1x256xf32>
    %392 = vector.broadcast %389 : f32 to vector<1x256xf32>
    %393 = arith.mulf %392, %26 : vector<1x256xf32>
    %394 = arith.addf %391, %393 : vector<1x256xf32>
    %c238_i32 = arith.constant 238 : i32
    %395 = tpu.dynamic_rotate %394 by %c238_i32 dim 1 : vector<1x256xf32>, i32 -> vector<1x256xf32>
    %c33_81 = arith.constant 33 : index
    %c0_82 = arith.constant 0 : index
    %396 = vector.load %arg4[%c33_81, %c0_82] : memref<49x256xf32, #tpu.memory_space<vmem>>, vector<1x256xf32>
    %397 = arith.mulf %395, %396 : vector<1x256xf32>
    %398 = arith.addf %387, %397 : vector<1x256xf32>
    %c34 = arith.constant 34 : index
    %399 = memref.load %arg5[%c34] : memref<98xf32, #tpu.memory_space<smem>>
    %c83 = arith.constant 83 : index
    %400 = memref.load %arg5[%c83] : memref<98xf32, #tpu.memory_space<smem>>
    %401 = vector.broadcast %399 : f32 to vector<1x256xf32>
    %402 = arith.mulf %401, %25 : vector<1x256xf32>
    %403 = vector.broadcast %400 : f32 to vector<1x256xf32>
    %404 = arith.mulf %403, %26 : vector<1x256xf32>
    %405 = arith.addf %402, %404 : vector<1x256xf32>
    %c237_i32 = arith.constant 237 : i32
    %406 = tpu.dynamic_rotate %405 by %c237_i32 dim 1 : vector<1x256xf32>, i32 -> vector<1x256xf32>
    %c34_83 = arith.constant 34 : index
    %c0_84 = arith.constant 0 : index
    %407 = vector.load %arg4[%c34_83, %c0_84] : memref<49x256xf32, #tpu.memory_space<vmem>>, vector<1x256xf32>
    %408 = arith.mulf %406, %407 : vector<1x256xf32>
    %409 = arith.addf %398, %408 : vector<1x256xf32>
    %c35 = arith.constant 35 : index
    %410 = memref.load %arg5[%c35] : memref<98xf32, #tpu.memory_space<smem>>
    %c84 = arith.constant 84 : index
    %411 = memref.load %arg5[%c84] : memref<98xf32, #tpu.memory_space<smem>>
    %412 = vector.broadcast %410 : f32 to vector<1x256xf32>
    %413 = arith.mulf %412, %25 : vector<1x256xf32>
    %414 = vector.broadcast %411 : f32 to vector<1x256xf32>
    %415 = arith.mulf %414, %26 : vector<1x256xf32>
    %416 = arith.addf %413, %415 : vector<1x256xf32>
    %c227_i32 = arith.constant 227 : i32
    %417 = tpu.dynamic_rotate %416 by %c227_i32 dim 1 : vector<1x256xf32>, i32 -> vector<1x256xf32>
    %c35_85 = arith.constant 35 : index
    %c0_86 = arith.constant 0 : index
    %418 = vector.load %arg4[%c35_85, %c0_86] : memref<49x256xf32, #tpu.memory_space<vmem>>, vector<1x256xf32>
    %419 = arith.mulf %417, %418 : vector<1x256xf32>
    %420 = arith.addf %409, %419 : vector<1x256xf32>
    %c36 = arith.constant 36 : index
    %421 = memref.load %arg5[%c36] : memref<98xf32, #tpu.memory_space<smem>>
    %c85 = arith.constant 85 : index
    %422 = memref.load %arg5[%c85] : memref<98xf32, #tpu.memory_space<smem>>
    %423 = vector.broadcast %421 : f32 to vector<1x256xf32>
    %424 = arith.mulf %423, %25 : vector<1x256xf32>
    %425 = vector.broadcast %422 : f32 to vector<1x256xf32>
    %426 = arith.mulf %425, %26 : vector<1x256xf32>
    %427 = arith.addf %424, %426 : vector<1x256xf32>
    %c226_i32 = arith.constant 226 : i32
    %428 = tpu.dynamic_rotate %427 by %c226_i32 dim 1 : vector<1x256xf32>, i32 -> vector<1x256xf32>
    %c36_87 = arith.constant 36 : index
    %c0_88 = arith.constant 0 : index
    %429 = vector.load %arg4[%c36_87, %c0_88] : memref<49x256xf32, #tpu.memory_space<vmem>>, vector<1x256xf32>
    %430 = arith.mulf %428, %429 : vector<1x256xf32>
    %431 = arith.addf %420, %430 : vector<1x256xf32>
    %c37 = arith.constant 37 : index
    %432 = memref.load %arg5[%c37] : memref<98xf32, #tpu.memory_space<smem>>
    %c86 = arith.constant 86 : index
    %433 = memref.load %arg5[%c86] : memref<98xf32, #tpu.memory_space<smem>>
    %434 = vector.broadcast %432 : f32 to vector<1x256xf32>
    %435 = arith.mulf %434, %25 : vector<1x256xf32>
    %436 = vector.broadcast %433 : f32 to vector<1x256xf32>
    %437 = arith.mulf %436, %26 : vector<1x256xf32>
    %438 = arith.addf %435, %437 : vector<1x256xf32>
    %c225_i32 = arith.constant 225 : i32
    %439 = tpu.dynamic_rotate %438 by %c225_i32 dim 1 : vector<1x256xf32>, i32 -> vector<1x256xf32>
    %c37_89 = arith.constant 37 : index
    %c0_90 = arith.constant 0 : index
    %440 = vector.load %arg4[%c37_89, %c0_90] : memref<49x256xf32, #tpu.memory_space<vmem>>, vector<1x256xf32>
    %441 = arith.mulf %439, %440 : vector<1x256xf32>
    %442 = arith.addf %431, %441 : vector<1x256xf32>
    %c38 = arith.constant 38 : index
    %443 = memref.load %arg5[%c38] : memref<98xf32, #tpu.memory_space<smem>>
    %c87 = arith.constant 87 : index
    %444 = memref.load %arg5[%c87] : memref<98xf32, #tpu.memory_space<smem>>
    %445 = vector.broadcast %443 : f32 to vector<1x256xf32>
    %446 = arith.mulf %445, %25 : vector<1x256xf32>
    %447 = vector.broadcast %444 : f32 to vector<1x256xf32>
    %448 = arith.mulf %447, %26 : vector<1x256xf32>
    %449 = arith.addf %446, %448 : vector<1x256xf32>
    %c224_i32 = arith.constant 224 : i32
    %450 = tpu.dynamic_rotate %449 by %c224_i32 dim 1 : vector<1x256xf32>, i32 -> vector<1x256xf32>
    %c38_91 = arith.constant 38 : index
    %c0_92 = arith.constant 0 : index
    %451 = vector.load %arg4[%c38_91, %c0_92] : memref<49x256xf32, #tpu.memory_space<vmem>>, vector<1x256xf32>
    %452 = arith.mulf %450, %451 : vector<1x256xf32>
    %453 = arith.addf %442, %452 : vector<1x256xf32>
    %c39 = arith.constant 39 : index
    %454 = memref.load %arg5[%c39] : memref<98xf32, #tpu.memory_space<smem>>
    %c88 = arith.constant 88 : index
    %455 = memref.load %arg5[%c88] : memref<98xf32, #tpu.memory_space<smem>>
    %456 = vector.broadcast %454 : f32 to vector<1x256xf32>
    %457 = arith.mulf %456, %25 : vector<1x256xf32>
    %458 = vector.broadcast %455 : f32 to vector<1x256xf32>
    %459 = arith.mulf %458, %26 : vector<1x256xf32>
    %460 = arith.addf %457, %459 : vector<1x256xf32>
    %c223_i32 = arith.constant 223 : i32
    %461 = tpu.dynamic_rotate %460 by %c223_i32 dim 1 : vector<1x256xf32>, i32 -> vector<1x256xf32>
    %c39_93 = arith.constant 39 : index
    %c0_94 = arith.constant 0 : index
    %462 = vector.load %arg4[%c39_93, %c0_94] : memref<49x256xf32, #tpu.memory_space<vmem>>, vector<1x256xf32>
    %463 = arith.mulf %461, %462 : vector<1x256xf32>
    %464 = arith.addf %453, %463 : vector<1x256xf32>
    %c40 = arith.constant 40 : index
    %465 = memref.load %arg5[%c40] : memref<98xf32, #tpu.memory_space<smem>>
    %c89 = arith.constant 89 : index
    %466 = memref.load %arg5[%c89] : memref<98xf32, #tpu.memory_space<smem>>
    %467 = vector.broadcast %465 : f32 to vector<1x256xf32>
    %468 = arith.mulf %467, %25 : vector<1x256xf32>
    %469 = vector.broadcast %466 : f32 to vector<1x256xf32>
    %470 = arith.mulf %469, %26 : vector<1x256xf32>
    %471 = arith.addf %468, %470 : vector<1x256xf32>
    %c222_i32 = arith.constant 222 : i32
    %472 = tpu.dynamic_rotate %471 by %c222_i32 dim 1 : vector<1x256xf32>, i32 -> vector<1x256xf32>
    %c40_95 = arith.constant 40 : index
    %c0_96 = arith.constant 0 : index
    %473 = vector.load %arg4[%c40_95, %c0_96] : memref<49x256xf32, #tpu.memory_space<vmem>>, vector<1x256xf32>
    %474 = arith.mulf %472, %473 : vector<1x256xf32>
    %475 = arith.addf %464, %474 : vector<1x256xf32>
    %c41 = arith.constant 41 : index
    %476 = memref.load %arg5[%c41] : memref<98xf32, #tpu.memory_space<smem>>
    %c90 = arith.constant 90 : index
    %477 = memref.load %arg5[%c90] : memref<98xf32, #tpu.memory_space<smem>>
    %478 = vector.broadcast %476 : f32 to vector<1x256xf32>
    %479 = arith.mulf %478, %25 : vector<1x256xf32>
    %480 = vector.broadcast %477 : f32 to vector<1x256xf32>
    %481 = arith.mulf %480, %26 : vector<1x256xf32>
    %482 = arith.addf %479, %481 : vector<1x256xf32>
    %c221_i32 = arith.constant 221 : i32
    %483 = tpu.dynamic_rotate %482 by %c221_i32 dim 1 : vector<1x256xf32>, i32 -> vector<1x256xf32>
    %c41_97 = arith.constant 41 : index
    %c0_98 = arith.constant 0 : index
    %484 = vector.load %arg4[%c41_97, %c0_98] : memref<49x256xf32, #tpu.memory_space<vmem>>, vector<1x256xf32>
    %485 = arith.mulf %483, %484 : vector<1x256xf32>
    %486 = arith.addf %475, %485 : vector<1x256xf32>
    %c42 = arith.constant 42 : index
    %487 = memref.load %arg5[%c42] : memref<98xf32, #tpu.memory_space<smem>>
    %c91 = arith.constant 91 : index
    %488 = memref.load %arg5[%c91] : memref<98xf32, #tpu.memory_space<smem>>
    %489 = vector.broadcast %487 : f32 to vector<1x256xf32>
    %490 = arith.mulf %489, %25 : vector<1x256xf32>
    %491 = vector.broadcast %488 : f32 to vector<1x256xf32>
    %492 = arith.mulf %491, %26 : vector<1x256xf32>
    %493 = arith.addf %490, %492 : vector<1x256xf32>
    %c211_i32 = arith.constant 211 : i32
    %494 = tpu.dynamic_rotate %493 by %c211_i32 dim 1 : vector<1x256xf32>, i32 -> vector<1x256xf32>
    %c42_99 = arith.constant 42 : index
    %c0_100 = arith.constant 0 : index
    %495 = vector.load %arg4[%c42_99, %c0_100] : memref<49x256xf32, #tpu.memory_space<vmem>>, vector<1x256xf32>
    %496 = arith.mulf %494, %495 : vector<1x256xf32>
    %497 = arith.addf %486, %496 : vector<1x256xf32>
    %c43 = arith.constant 43 : index
    %498 = memref.load %arg5[%c43] : memref<98xf32, #tpu.memory_space<smem>>
    %c92 = arith.constant 92 : index
    %499 = memref.load %arg5[%c92] : memref<98xf32, #tpu.memory_space<smem>>
    %500 = vector.broadcast %498 : f32 to vector<1x256xf32>
    %501 = arith.mulf %500, %25 : vector<1x256xf32>
    %502 = vector.broadcast %499 : f32 to vector<1x256xf32>
    %503 = arith.mulf %502, %26 : vector<1x256xf32>
    %504 = arith.addf %501, %503 : vector<1x256xf32>
    %c210_i32 = arith.constant 210 : i32
    %505 = tpu.dynamic_rotate %504 by %c210_i32 dim 1 : vector<1x256xf32>, i32 -> vector<1x256xf32>
    %c43_101 = arith.constant 43 : index
    %c0_102 = arith.constant 0 : index
    %506 = vector.load %arg4[%c43_101, %c0_102] : memref<49x256xf32, #tpu.memory_space<vmem>>, vector<1x256xf32>
    %507 = arith.mulf %505, %506 : vector<1x256xf32>
    %508 = arith.addf %497, %507 : vector<1x256xf32>
    %c44 = arith.constant 44 : index
    %509 = memref.load %arg5[%c44] : memref<98xf32, #tpu.memory_space<smem>>
    %c93 = arith.constant 93 : index
    %510 = memref.load %arg5[%c93] : memref<98xf32, #tpu.memory_space<smem>>
    %511 = vector.broadcast %509 : f32 to vector<1x256xf32>
    %512 = arith.mulf %511, %25 : vector<1x256xf32>
    %513 = vector.broadcast %510 : f32 to vector<1x256xf32>
    %514 = arith.mulf %513, %26 : vector<1x256xf32>
    %515 = arith.addf %512, %514 : vector<1x256xf32>
    %c209_i32 = arith.constant 209 : i32
    %516 = tpu.dynamic_rotate %515 by %c209_i32 dim 1 : vector<1x256xf32>, i32 -> vector<1x256xf32>
    %c44_103 = arith.constant 44 : index
    %c0_104 = arith.constant 0 : index
    %517 = vector.load %arg4[%c44_103, %c0_104] : memref<49x256xf32, #tpu.memory_space<vmem>>, vector<1x256xf32>
    %518 = arith.mulf %516, %517 : vector<1x256xf32>
    %519 = arith.addf %508, %518 : vector<1x256xf32>
    %c45 = arith.constant 45 : index
    %520 = memref.load %arg5[%c45] : memref<98xf32, #tpu.memory_space<smem>>
    %c94 = arith.constant 94 : index
    %521 = memref.load %arg5[%c94] : memref<98xf32, #tpu.memory_space<smem>>
    %522 = vector.broadcast %520 : f32 to vector<1x256xf32>
    %523 = arith.mulf %522, %25 : vector<1x256xf32>
    %524 = vector.broadcast %521 : f32 to vector<1x256xf32>
    %525 = arith.mulf %524, %26 : vector<1x256xf32>
    %526 = arith.addf %523, %525 : vector<1x256xf32>
    %c208_i32 = arith.constant 208 : i32
    %527 = tpu.dynamic_rotate %526 by %c208_i32 dim 1 : vector<1x256xf32>, i32 -> vector<1x256xf32>
    %c45_105 = arith.constant 45 : index
    %c0_106 = arith.constant 0 : index
    %528 = vector.load %arg4[%c45_105, %c0_106] : memref<49x256xf32, #tpu.memory_space<vmem>>, vector<1x256xf32>
    %529 = arith.mulf %527, %528 : vector<1x256xf32>
    %530 = arith.addf %519, %529 : vector<1x256xf32>
    %c46 = arith.constant 46 : index
    %531 = memref.load %arg5[%c46] : memref<98xf32, #tpu.memory_space<smem>>
    %c95 = arith.constant 95 : index
    %532 = memref.load %arg5[%c95] : memref<98xf32, #tpu.memory_space<smem>>
    %533 = vector.broadcast %531 : f32 to vector<1x256xf32>
    %534 = arith.mulf %533, %25 : vector<1x256xf32>
    %535 = vector.broadcast %532 : f32 to vector<1x256xf32>
    %536 = arith.mulf %535, %26 : vector<1x256xf32>
    %537 = arith.addf %534, %536 : vector<1x256xf32>
    %c207_i32 = arith.constant 207 : i32
    %538 = tpu.dynamic_rotate %537 by %c207_i32 dim 1 : vector<1x256xf32>, i32 -> vector<1x256xf32>
    %c46_107 = arith.constant 46 : index
    %c0_108 = arith.constant 0 : index
    %539 = vector.load %arg4[%c46_107, %c0_108] : memref<49x256xf32, #tpu.memory_space<vmem>>, vector<1x256xf32>
    %540 = arith.mulf %538, %539 : vector<1x256xf32>
    %541 = arith.addf %530, %540 : vector<1x256xf32>
    %c47 = arith.constant 47 : index
    %542 = memref.load %arg5[%c47] : memref<98xf32, #tpu.memory_space<smem>>
    %c96 = arith.constant 96 : index
    %543 = memref.load %arg5[%c96] : memref<98xf32, #tpu.memory_space<smem>>
    %544 = vector.broadcast %542 : f32 to vector<1x256xf32>
    %545 = arith.mulf %544, %25 : vector<1x256xf32>
    %546 = vector.broadcast %543 : f32 to vector<1x256xf32>
    %547 = arith.mulf %546, %26 : vector<1x256xf32>
    %548 = arith.addf %545, %547 : vector<1x256xf32>
    %c206_i32 = arith.constant 206 : i32
    %549 = tpu.dynamic_rotate %548 by %c206_i32 dim 1 : vector<1x256xf32>, i32 -> vector<1x256xf32>
    %c47_109 = arith.constant 47 : index
    %c0_110 = arith.constant 0 : index
    %550 = vector.load %arg4[%c47_109, %c0_110] : memref<49x256xf32, #tpu.memory_space<vmem>>, vector<1x256xf32>
    %551 = arith.mulf %549, %550 : vector<1x256xf32>
    %552 = arith.addf %541, %551 : vector<1x256xf32>
    %c48 = arith.constant 48 : index
    %553 = memref.load %arg5[%c48] : memref<98xf32, #tpu.memory_space<smem>>
    %c97 = arith.constant 97 : index
    %554 = memref.load %arg5[%c97] : memref<98xf32, #tpu.memory_space<smem>>
    %555 = vector.broadcast %553 : f32 to vector<1x256xf32>
    %556 = arith.mulf %555, %25 : vector<1x256xf32>
    %557 = vector.broadcast %554 : f32 to vector<1x256xf32>
    %558 = arith.mulf %557, %26 : vector<1x256xf32>
    %559 = arith.addf %556, %558 : vector<1x256xf32>
    %c205_i32 = arith.constant 205 : i32
    %560 = tpu.dynamic_rotate %559 by %c205_i32 dim 1 : vector<1x256xf32>, i32 -> vector<1x256xf32>
    %c48_111 = arith.constant 48 : index
    %c0_112 = arith.constant 0 : index
    %561 = vector.load %arg4[%c48_111, %c0_112] : memref<49x256xf32, #tpu.memory_space<vmem>>, vector<1x256xf32>
    %562 = arith.mulf %560, %561 : vector<1x256xf32>
    %563 = arith.addf %552, %562 : vector<1x256xf32>
    %564 = arith.negf %563 : vector<1x256xf32>
    %565 = math.exp %564 : vector<1x256xf32>
    %cst_113 = arith.constant 1.000000e+00 : f32
    %566 = vector.broadcast %cst_113 : f32 to vector<1x256xf32>
    %567 = arith.addf %566, %565 : vector<1x256xf32>
    %568 = arith.divf %566, %567 : vector<1x256xf32>
    %569 = vector.shape_cast %568 : vector<1x256xf32> to vector<1x1x256xf32>
    %570 = vector.broadcast %569 : vector<1x1x256xf32> to vector<1x32x256xf32>
    %571 = arith.mulf %22, %570 : vector<1x32x256xf32>
    %c0_114 = arith.constant 0 : index
    %c0_115 = arith.constant 0 : index
    %c0_116 = arith.constant 0 : index
    %572 = vector.load %arg6[%c0_114, %c0_115, %c0_116] : memref<1x32x256xf32, #tpu.memory_space<vmem>>, vector<1x32x256xf32>
    tpu.vector_store %arg6[%c0_114, %c0_115, %c0_116], %571 {strides = array<i32>} : memref<1x32x256xf32, #tpu.memory_space<vmem>>, vector<1x32x256xf32>,
    return
  }
  func.func @transform_0(%arg0: i32) -> (i32, i32, i32) {
    %c0_i32 = arith.constant 0 : i32
    %c0_i32_0 = arith.constant 0 : i32
    %c0_i32_1 = arith.constant 0 : i32
    return %arg0, %c0_i32, %c0_i32_0 : i32, i32, i32
  }
  func.func @transform_1(%arg0: i32) -> (i32, i32) {
    %c0_i32 = arith.constant 0 : i32
    %c0_i32_0 = arith.constant 0 : i32
    %c0_i32_1 = arith.constant 0 : i32
    return %c0_i32, %c0_i32_0 : i32, i32
  }
  func.func @transform_2(%arg0: i32) -> (i32, i32) {
    %c0_i32 = arith.constant 0 : i32
    %c0_i32_0 = arith.constant 0 : i32
    %c0_i32_1 = arith.constant 0 : i32
    return %c0_i32, %c0_i32_0 : i32, i32
  }
  func.func @transform_3(%arg0: i32) -> (i32, i32) {
    %c0_i32 = arith.constant 0 : i32
    %c0_i32_0 = arith.constant 0 : i32
    %c0_i32_1 = arith.constant 0 : i32
    return %c0_i32, %c0_i32_0 : i32, i32
  }
  func.func @transform_4(%arg0: i32) -> i32 {
    %c0_i32 = arith.constant 0 : i32
    %c0_i32_0 = arith.constant 0 : i32
    return %c0_i32 : i32
  }
  func.func @transform_5(%arg0: i32) -> (i32, i32, i32) {
    %c0_i32 = arith.constant 0 : i32
    %c0_i32_0 = arith.constant 0 : i32
    %c0_i32_1 = arith.constant 0 : i32
    return %arg0, %c0_i32, %c0_i32_0 : i32, i32, i32
  }
}

</mosaic_0001>

<bundles_post_ra>
// kernel: tpu_custom_call.1
= control target key start
LH: loop header
LB: loop body
LE: loop exit
PB: predicated region body
PF: predicated region fallthrough
CT: control target
= control target key end

     0   :  { %10 = vsyncpa [#allocation3], 0  ;;  %s3636_s0 = inlined_call_operand.hbm [shape: f32[2,32,256], index: 0, kind: input, shape index: {}]   ;;  %s3637_s1 = inlined_call_operand.vmem [shape: f32[32,2], index: 1, kind: input, shape index: {}]   ;;  %s3638_s2 = inlined_call_operand.vmem [shape: f32[2,32], index: 2, kind: input, shape index: {}]   ;;  %s3639_s3 = inlined_call_operand.hbm [shape: f32[49,256], index: 3, kind: input, shape index: {}]   ;;  %s3640_s4 = inlined_call_operand.vmem [shape: f32[98], index: 4, kind: input, shape index: {}]   ;;  %s3641_s5 = inlined_call_operand.hbm [shape: f32[2,32,256], index: 5, kind: output, shape index: {}]  }
   0x1   :  { %12 = vsyncpa [#allocation3 + $0x1], 0 }
   0x2   :  { %13 = vsyncpa [#allocation7], 0 }
   0x3   :  { %14 = vsyncpa [#allocation5], 0 }
   0x4   :  { %15 = vsyncpa [#allocation4], 0 }
   0x5   :  { %17 = vsyncpa [#allocation4 + $0x1], 0  ;;  %s2534_s18 = smov 0   ;;  %s2536_s19 = smov 0  }
   0x6   :  { %s2538_s20 = smov 0   ;;  %s2540_s21 = smov 0  }
   0x7 LB: > { %s2555_s22 = sadd.s32 4294967295, %s2447_s21   ;;  %s2034_s23 = sadd.s32 4294967294, %s2447_s21   ;;  %s2447_s21 = sphi %s2540_s21, %s3653_s21   ;;  %s2443_s20 = sphi %s2538_s20, %s3652_s20   ;;  %s2439_s19 = sphi %s2536_s19, %s3651_s19   ;;  %s2435_s18 = sphi %s2534_s18, %s3650_s18  }
   0x8   : > { %p43_p0 = scmp.ne.s32.totalorder %s2439_s19, %s2435_s18  ;;  %p44_p1 = scmp.eq.s32.totalorder %s2555_s22, 0 }
   0x9   : > { %p151_p2 = scmp.eq.s32.totalorder %s2555_s22, 1  ;;  %p157_p3 = scmp.eq.s32.totalorder %s2034_s23, 1 }
   0xa   : > { %p2564_p4 = por %p44_p1, %p43_p0  ;;  %p2035_p5 = scmp.ge.s32.totalorder %s2447_s21, 1 }
   0xb   : > { %p2569_p6 = por %p157_p3, %p43_p0  ;;  %p164_p7 = scmp.lt.s32.totalorder %s2447_s21, 3 }
   0xc   : > { %s181_s28 = sshll.u32 %s3639_s3, 4  ;;  %s2449_s30 = smov [#allocation6]   ;;  %s182_s28 = int_to_ptr.hbm [resolvable:$true] %s181_s28 }
   0xd   : > { %p2577_p8 = pnand %p2035_p5, %p164_p7  ;;  %s183_s6 = sshll.u32 %s2449_s30, 4  ;;  %s184_s6 = int_to_ptr.vmem [resolvable:$true] %s183_s6 }
   0xe   : > { %s196_s9 = sshll.u32 %s3640_s4, 4  ;;  %s3642_s10 = smov 256   ;;  %s197_s9 = int_to_ptr.vmem [resolvable:$true] %s196_s9 }
   0xf   : > { %p2169_p9 = pneg %p2577_p8  ;;  %s2451_s11 = smov 16  }
  0x10   : > { %s2452_s12 = smov [#allocation8]   ;;  %s2593_s13 = sadd.s32 1, %s2447_s21  }
  0x11   : > { %p2170_p10 = pnand %p2169_p9, %p44_p1  ;;  %s27_s14 = ssub.s32 %s2447_s21, %s2593_s13 }
  0x12   : > { %p28_p12 = scmp.eq.s32.totalorder %s27_s14, 0  ;;  %s30_s15 = sadd.s32 1, %s2443_s20 }
  0x13   : > { %2172 = dma.hbm_to_vmem [thread:$0]  (!%p2170_p10), %s182_s28, 1792, %s184_s6, [#allocation7], %s3642_s10, %s3642_s10, %s2451_s11  }
  0x14   : > { %2175 = dma.vmem_to_smem (!%p2170_p10), %s197_s9, 16, %s2452_s12, [#allocation5]  }
  0x15   : > { %p37_p13 = scmp.ne.s32.totalorder %s2443_s20, %s2439_s19  ;;  %p38_p0 = scmp.eq.s32.totalorder %s2447_s21, 0 }
  0x16   : > { %s2602_s16 = scalar_select %p28_p12, %s2443_s20, %s30_s15  }
  0x17   : > { %p39_p3 = por %p38_p0, %p37_p13  ;;  %p2606_p5 = por %p151_p2, %p37_p13 }
  0x18   : > { %p2186_p7 = scmp.lt.s32.totalorder %s2447_s21, 2  ;;  %s207_s23 = sand.u32 1, %s2443_s20  }
  0x19   : > { %s2039_s26 = sshll.u32 %s207_s23, 6  ;;  %s2155_s27 = sshll.u32 %s2447_s21, 6 }
  0x1a   : > { %s216_s6 = scalar_lea.hbm %s3636_s0, %s2155_s27  ;;  %s211_s7 = scalar_lea.vmem [#allocation2], %s2039_s26 }
  0x1b   : > { %s219_s8 = sshll.u32 %s211_s7, 4  ;;  %s217_s9 = sshll.u32 %s216_s6, 4  ;;  %s220_s8 = int_to_ptr.vmem [resolvable:$true] %s219_s8  ;;  %s218_s9 = int_to_ptr.hbm [resolvable:$true] %s217_s9 }
  0x1c   : > { %p2616_p9 = pnand %p2186_p7, %p39_p3  ;;  %s208_s14 = scalar_lea.sflag [#allocation3], %s207_s23 }
  0x1d   : > { %s2343_s15 = sshra.s32 %s218_s9, 4  ;;  %s2350_s28 = scalar_lea.hbm %s3636_s0, 128  ;;  %s2344_s15 = int_to_ptr.hbm [resolvable:$true] %s2343_s15 }
  0x1e   : > { %s2345_s10 = scalar_lea.hbm %s2344_s15, 64  ;;  %p2347_p10 = pneg %p2616_p9 }
  0x1f   : > { %p2346_p2 = scmp.ne.s32.totalorder %s2344_s15, %s2345_s10  ;;  %p2351_p0 = scmp.lt.s32.totalorder %s2344_s15, %s3636_s0 }
  0x20   : > { %p2352_p3 = scmp.lt.s32.totalorder %s2350_s28, %s2345_s10 }
  0x21   : > { %p2348_p12 = pnand %p2347_p10, %p2346_p2 }
  0x22   : > { %p2353_p7 = por %p2352_p3, %p2351_p0 }
  0x23   : > { %p2349_p13 = pneg %p2348_p12 }
  0x25   : > { %p2354_p11 = pnand %p2353_p7, %p2349_p13 }
  0x27   : > { %2357 = shalt.err (!%p2354_p11)
}
  0x28   : > { %s3648_s23 = smov 256   ;;  %231 = sbr.rel (%p2577_p8) target bundleno = 1034 (0x40a), region = 40 }
  0x29   : > { %2179 = dma.hbm_to_vmem [thread:$0]  (!%p2616_p9), %s218_s9, 1024, %s220_s8, %s208_s14, %s3648_s23, %s3648_s23, %s2451_s11  }
  0x2a   : > { %s2636_s7 = sand.u32 (!%p2577_p8), 1, %s2439_s19  }
  0x2b   : > { %s2043_s10 = sshll.u32 (!%p2577_p8), %s2636_s7, 6  ;;  %s234_s15 = scalar_lea.sflag (!%p2577_p8), [#allocation3], %s2636_s7 }
  0x2c   : > { %s237_s27 = scalar_lea.vmem (!%p2577_p8), [#allocation2], %s2043_s10 }
  0x2d   : > { %2418 = dma.done.wait (%p2564_p4), %s234_s15, 1024  }
  0x2e   : > { %2420 = vsyncadd (%p2564_p4), %s234_s15, 4294966272 }
  0x2f   : > { %2422 = dma.done.wait (%p44_p1), [#allocation7], 1792  }
  0x30   : > { %2424 = vsyncadd (%p44_p1), [#allocation7], 4294965504 }
  0x31   : > { %2426 = dma.done.wait (%p44_p1), [#allocation5], 16  }
  0x32   : > { %2428 = vsyncadd (%p44_p1), [#allocation5], 4294967280 }
  0x33   : > { %253 = sfence }
  0x34   : > { %v2654_v0 = vld [vmem:[%s237_s27] sm:$0xff]  ;;  %v2656_v1 = vld [vmem:[%s237_s27 + $0x8] sm:$0xff]  ;;  %v2668_v7 = vld [vmem:[%s237_s27 + $0x10] sm:$0xff]  ;;  %v2453_v16 = vmov 256.0   ;;  %v323_v29 = vlaneseq  ;;  %vm328_vm1 = vcmask 130112   ;;  %vm332_vm2 = vcmask 195712  }
  0x35   : > { %v2658_v2 = vld [vmem:[%s237_s27 + $0x20] sm:$0xff]  ;;  %v307_v3 = vmax.f32 %v2654_v0, %v2656_v1  ;;  %v284_v4 = vadd.f32 %v2656_v1, %v2654_v0  ;;  %v2664_v5 = vld [vmem:[%s237_s27 + $0x28] sm:$0xff]  ;;  %v2670_v8 = vld [vmem:[%s237_s27 + $0x18] sm:$0xff]  ;;  %2282 = vrcp.f32 %v2453_v16  ;;  %vm336_vm3 = vcmask 261312   ;;  %s2748_s6 = sld [smem:[#allocation8 + $0x31]]  ;;  %s2455_s12 = smov 51  }
  0x36   : > { %v290_v6 = vadd.f32 %v2664_v5, %v2658_v2  ;;  %v2672_v9 = vld [vmem:[%s237_s27 + $0x30] sm:$0xff]  ;;  %v2674_v10 = vld [vmem:[%s237_s27 + $0x38] sm:$0xff]  ;;  %v310_v11 = vmax.f32 %v2668_v7, %v2670_v8  ;;  %v287_v12 = vadd.f32 %v2670_v8, %v2668_v7  ;;  %v313_v14 = vmax.f32 %v2658_v2, %v2664_v5  ;;  %v354_v20 = vld [vmem:[%s3637_s1 + $0x8] sm:$0xff]  ;;  %s2750_s23 = sld [smem:[#allocation8 + $0x33]]  ;;  %s2456_s14 = smov 49  }
  0x37   : > { %308 = vmax.xlane.f32.xlu2 %v307_v3  ;;  %285 = vadd.xlane.f32.xlu0 %v284_v4  ;;  %v293_v13 = vadd.f32 %v2674_v10, %v2672_v9  ;;  %v316_v15 = vmax.f32 %v2672_v9, %v2674_v10  ;;  %v356_v17 = vld [vmem:[%s3637_s1 + $0x18] sm:$0xff]  ;;  %v355_v18 = vld [vmem:[%s3637_s1 + $0x10] sm:$0xff]  ;;  %v353_v21 = vld [vmem:[%s3637_s1] sm:$0xff]  ;;  %v2698_v31 = vand.u32 127, %v323_v29  ;;  %vm351_vm4 = vcmask 1040384   ;;  %s2752_s15 = sld [smem:[#allocation8]] }
  0x38   : > { %291 = vadd.xlane.f32.xlu1 %v290_v6  ;;  %373 = vmatpush.msra.mxu0 %v356_v17  ;;  %vm357_vm5 = vcmask 261120   ;;  %v386_v59 = vld [vmem:[%s3638_s2] sm:$0x3]  ;;  %vm391_vm6 = vcmask 1041408   ;;  %vm387_vm7 = vcmask 15360   ;;  %v436_v3 = vshrl.u32 %v323_v29, 7 }
  0x39   : > { %v326_v34 = vadd.s32 4294967288, %v2698_v31  ;;  %v330_v37 = vadd.s32 4294967280, %v2698_v31  ;;  %v334_v42 = vadd.s32 4294967272, %v2698_v31  ;;  %2048 = vmatpush.msk.msra.mxu1 %vm391_vm6, %v386_v59  ;;  %s2754_s27 = sld [smem:[#allocation8 + $0x2]]  ;;  %vm526_vm13 = vcmp.lt.s32.totalorder %v2698_v31, 51 }
  0x3a   : > { %374 = vmatpush.msra.mxu0 %v355_v18  ;;  %2277 = vset.pattern.permute.xlu2 %v436_v3  ;;  %v449_v4 = vadd.s32 16, %v436_v3  ;;  %v443_v6 = vadd.s32 8, %v436_v3  ;;  %s2756_s24 = sld [smem:[#allocation8 + $0x1]]  ;;  %vm581_vm14 = vcmp.lt.s32.totalorder %v2698_v31, 49  ;;  %vm553_vm15 = vcmp.lt.s32.totalorder %v2698_v31, 50 }
  0x3b   : > { %v2283_v19 = vpop.eup %2282  ;;  %s2762_s29 = sld [smem:[#allocation8 + $0x3]]  ;;  %vm777_vm6 = vcmp.lt.s32.totalorder %v2698_v31, 33 }
  0x3c   : > { %375 = vmatpush.msra.mxu0 %v354_v20  ;;  %v297_v22 = vmul.f32 256.0, %v2283_v19  ;;  %vm301_vm0 = vweird.f32 %v2283_v19  ;;  %2279 = vset.pattern.permute.xlu1 %v449_v4  ;;  %s2766_s11 = sld [smem:[#allocation8 + $0x32]] }
  0x3d   : > { %2278 = vset.pattern.permute.xlu0 %v443_v6  ;;  %s2770_s8 = sld [smem:[#allocation8 + $0x34]] }
  0x3e   : > { %376 = vmatpush.msra.mxu0 %v353_v21  ;;  %v298_v23 = vsub.f32 1.0, %v297_v22  ;;  %s2784_s9 = sld [smem:[#allocation8 + $0x5]] }
  0x3f   : > { %311 = vmax.xlane.f32.xlu2 %v310_v11  ;;  %288 = vadd.xlane.f32.xlu0 %v287_v12  ;;  %s2789_s26 = sld [smem:[#allocation8 + $0x36]] }
  0x40   : > { %294 = vadd.xlane.f32.xlu1 %v293_v13  ;;  %v299_v24 = vmul.f32 %v2283_v19, %v298_v23  ;;  %s2797_s28 = sld [smem:[#allocation8 + $0x4]] }
  0x41   : > { %s2800_s30 = sld [smem:[#allocation8 + $0x6]] }
  0x42   : > { %v300_v27 = vadd.f32 %v2283_v19, %v299_v24 }
  0x44   : > { %v302_v30 = vsel %vm301_vm0, %v2283_v19, %v300_v27  ;;  %vm609_vm0 = vcmp.lt.s32.totalorder %v2698_v31, 48 }
  0x47   : > { %314 = vmax.xlane.f32.xlu0 %v313_v14 }
  0x48   : > { %317 = vmax.xlane.f32.xlu1 %v316_v15 }
  0xaa   : > { %v286_v25 = vpop.xlane.xlu0 %285  ;;  %v309_v26 = vpop.xlane.xlu2 %308 }
  0xab   : > { %v292_v28 = vpop.xlane.xlu1 %291  ;;  %v303_v32 = vmul.f32 %v302_v30, %v286_v25  ;;  %v343_v44 = vperm.slane %v309_v26, %v2698_v31  ;;  %v455_v26 = vadd.s32 24, %v436_v3 }
  0xac   : > { %v305_v38 = vmul.f32 %v302_v30, %v292_v28  ;;  %v2454_v28 = vmov 32.0  }
  0xad   : > { %v325_v41 = vperm.slane %v303_v32, %v2698_v31 }
  0xae   : > { %v331_v47 = vperm.slane %v305_v38, %v330_v37 }
  0xb2   : > { %v289_v33 = vpop.xlane.xlu0 %288  ;;  %v312_v39 = vpop.xlane.xlu2 %311 }
  0xb3   : > { %v304_v35 = vmul.f32 %v302_v30, %v289_v33  ;;  %v295_v36 = vpop.xlane.xlu1 %294  ;;  %v344_v45 = vperm.slane %v312_v39, %v326_v34 }
  0xb4   : > { %v306_v43 = vmul.f32 %v302_v30, %v295_v36 }
  0xb5   : > { %v327_v40 = vperm.slane %v304_v35, %v326_v34  ;;  %v345_v53 = vsel %vm328_vm1, %v344_v45, %v343_v44 }
  0xb6   : > { %v335_v48 = vperm.slane %v306_v43, %v334_v42 }
  0xb7   : > { %v329_v46 = vsel %vm328_vm1, %v327_v40, %v325_v41  ;;  %vm665_vm1 = vcmp.lt.s32.totalorder %v2698_v31, 46 }
  0xb8   : > { %v333_v52 = vsel %vm332_vm2, %v331_v47, %v329_v46 }
  0xb9   : > { %v337_v56 = vsel %vm336_vm3, %v335_v48, %v333_v52 }
  0xba   : > { %v315_v49 = vpop.xlane.xlu0 %314 }
  0xbb   : > { %v346_v50 = vperm.slane %v315_v49, %v330_v37  ;;  %v318_v51 = vpop.xlane.xlu1 %317 }
  0xbc   : > { %v348_v54 = vperm.slane %v318_v51, %v334_v42 }
  0xbd   : > { %v347_v55 = vsel %vm332_vm2, %v346_v50, %v345_v53  ;;  %vm637_vm2 = vcmp.lt.s32.totalorder %v2698_v31, 47 }
  0xbe   : > { %v349_v57 = vsel %vm336_vm3, %v348_v54, %v347_v55  ;;  %vm693_vm3 = vcmp.lt.s32.totalorder %v2698_v31, 45 }
  0xbf   : > { %v352_v58 = vsel %vm351_vm4, %v337_v56, %v349_v57  ;;  %vm749_vm4 = vcmp.lt.s32.totalorder %v2698_v31, 34 }
  0xc0   : > { %2047 = vmatmul.msk.f32.vlgmr.msra.gmra.mxu0 %vm357_vm5, %v352_v58  ;;  %vm721_vm5 = vcmp.lt.s32.totalorder %v2698_v31, 35 }
 0x13d   : > { %v378_v60 = vpop.f32.mrf.mxu0 }
 0x13e   : > { %v381_v61 = vmax.f32 %v378_v60, 0.0 }
 0x140   : > { %v383_v62 = vrot.slane %v381_v61, 1 }
 0x142   : > { %v385_v63 = vadd.f32 %v383_v62, %v381_v61 }
 0x144   : > { %2049 = vmatmul.msk.f32.vlgmr.msra.gmra.mxu1 %vm387_vm7, %v385_v63  ;;  %vm833_vm7 = vcmp.lt.s32.totalorder %v2698_v31, 31 }
 0x1c1   : > { %v412_v11 = vpop.f32.mrf.mxu1 }
 0x1c2   : > { %v2050_v12 = vmul.f32 -1.442695, %v412_v11 }
 0x1c4   : > { %2284 = vpow2.f32 %v2050_v12 }
 0x1ca   : > { %v2285_v13 = vpop.eup %2284 }
 0x1cb   : > { %v418_v14 = vadd.f32 1.0, %v2285_v13 }
 0x1cd   : > { %2286 = vrcp.f32 %v418_v14  ;;  %v430_v18 = vand.u32 2147483648, %v418_v14  ;;  %v428_v20 = vand.u32 2147483647, %v418_v14  ;;  %vm424_vm9 = vweird.f32 %v418_v14 }
 0x1ce   : > { %2288 = vrcp.f32 %v2454_v28 }
 0x1cf   : > { %v431_v22 = vor.u32 1.1754944e-38, %v430_v18  ;;  %vm429_vm11 = vcmp.eq.f32.partialorder %v428_v20, 8.507059e+37  ;;  %v572_v20 = vstv %s2750_s23  ;;  %s2458_s23 = smov 48  }
 0x1d3   : > { %v2287_v15 = vpop.eup %2286 }
 0x1d4   : > { %v420_v16 = vmul.f32 %v2287_v15, %v418_v14  ;;  %vm425_vm8 = vweird.f32 %v2287_v15  ;;  %v2289_v29 = vpop.eup %2288 }
 0x1d5   : > { %vm426_vm10 = vmor %vm424_vm9, %vm425_vm8  ;;  %v486_v40 = vmul.f32 32.0, %v2289_v29  ;;  %vm490_vm12 = vweird.f32 %v2289_v29  ;;  %vm805_vm8 = vcmp.lt.s32.totalorder %v2698_v31, 32  ;;  %vm861_vm9 = vcmp.lt.s32.totalorder %v2698_v31, 30 }
 0x1d6   : > { %v421_v17 = vsub.f32 1.0, %v420_v16 }
 0x1d7   : > { %v487_v43 = vsub.f32 1.0, %v486_v40 }
 0x1d8   : > { %v422_v19 = vmul.f32 %v2287_v15, %v421_v17 }
 0x1d9   : > { %v488_v52 = vmul.f32 %v2289_v29, %v487_v43 }
 0x1da   : > { %v423_v21 = vadd.f32 %v2287_v15, %v422_v19  ;;  %v517_v19 = vstv %s2748_s6  ;;  %s2457_s6 = smov 50  }
 0x1db   : > { %v489_v61 = vadd.f32 %v2289_v29, %v488_v52 }
 0x1dc   : > { %v427_v23 = vsel %vm426_vm10, %v2287_v15, %v423_v21  ;;  %v514_v21 = vstv %s2752_s15  ;;  %s2059_s15 = sld [smem:[#allocation8 + $0x35]]  ;;  %vm917_vm10 = vcmp.lt.s32.totalorder %v2698_v31, 19 }
 0x1dd   : > { %v432_v24 = vsel %vm429_vm11, %v431_v22, %v427_v23  ;;  %v491_v14 = vsel %vm490_vm12, %v2289_v29, %v489_v61  ;;  %v569_v22 = vstv %s2754_s27  ;;  %s2803_s27 = sld [smem:[#allocation8 + $0x37]]  ;;  %vm889_vm11 = vcmp.lt.s32.totalorder %v2698_v31, 29 }
 0x1de   : > { %v434_v25 = vperm.slane %v432_v24, 0  ;;  %vm945_vm12 = vcmp.lt.s32.totalorder %v2698_v31, 18 }
 0x1e0   : > { %451 = vperm.xlu1 %2279, %v434_v25   ;;  %445 = vperm.xlu0 %2278, %v434_v25  }
 0x1e1   : > { %439 = vperm.xlu2 %2277, %v434_v25  }
 0x1e2   : > { %v628_v61 = vstv %s2059_s15  ;;  %s2855_s15 = sld [smem:[#allocation8 + $0xa]] }
 0x1e8   : > { %2281 = vset.pattern.permute.xlu0 %v455_v26 }
 0x1e9   : > { %2280 = vset.pattern.permute.xlu2 %v455_v26 }
 0x1f1   : > { %457 = vperm.xlu2 %2280, %v434_v25  }
 0x23b   : > { %v440_v27 = vpop.permute.xlu2 %439 }
 0x23c   : > { %v2709_v32 = vmul.f32 %v440_v27, %v2654_v0  ;;  %v2712_v33 = vmul.f32 %v440_v27, %v2656_v1 }
 0x24b   : > { %v458_v30 = vpop.permute.xlu2 %457 }
 0x24c   : > { %v2727_v0 = vmul.f32 %v458_v30, %v2672_v9  ;;  %v2730_v1 = vmul.f32 %v458_v30, %v2674_v10 }
 0x252   : > { %v452_v34 = vpop.permute.xlu1 %451  ;;  %v446_v35 = vpop.permute.xlu0 %445 }
 0x253   : > { %v2715_v36 = vmul.f32 %v452_v34, %v2658_v2  ;;  %v2718_v37 = vmul.f32 %v452_v34, %v2664_v5  ;;  %v2721_v38 = vmul.f32 %v446_v35, %v2668_v7  ;;  %v2724_v39 = vmul.f32 %v446_v35, %v2670_v8 }
 0x255   : > { %v494_v2 = vmax.f32 %v2709_v32, %v2715_v36  ;;  %v503_v5 = vmax.f32 %v2712_v33, %v2718_v37  ;;  %v467_v7 = vadd.f32 %v2721_v38, %v2709_v32  ;;  %v476_v8 = vadd.f32 %v2724_v39, %v2712_v33 }
 0x256   : > { %v495_v9 = vmax.f32 %v2721_v38, %v2727_v0  ;;  %v504_v10 = vmax.f32 %v2724_v39, %v2730_v1 }
 0x257   : > { %v468_v41 = vadd.f32 %v467_v7, %v2715_v36  ;;  %v477_v42 = vadd.f32 %v476_v8, %v2718_v37  ;;  %v544_v7 = vstv %s2766_s11  ;;  %v600_v8 = vstv %s2770_s8  ;;  %s2818_s11 = sld [smem:[#allocation8 + $0x39]] }
 0x258   : > { %v496_v44 = vmax.f32 %v494_v2, %v495_v9  ;;  %v505_v45 = vmax.f32 %v503_v5, %v504_v10  ;;  %v541_v2 = vstv %s2756_s24  ;;  %v597_v5 = vstv %s2762_s29  ;;  %s2813_s24 = sld [smem:[#allocation8 + $0x8]]  ;;  %s2459_s29 = smov 46  }
 0x259   : > { %v469_v46 = vadd.f32 %v468_v41, %v2727_v0  ;;  %v478_v47 = vadd.f32 %v477_v42, %v2730_v1  ;;  %s2826_s8 = sld [smem:[#allocation8 + $0x7]] }
 0x25a   : > { %v497_v48 = vrot.slane %v496_v44, 4  ;;  %v506_v49 = vrot.slane %v505_v45, 4 }
 0x25b   : > { %v470_v50 = vrot.slane %v469_v46, 4  ;;  %v479_v51 = vrot.slane %v478_v47, 4 }
 0x25c   : > { %v498_v53 = vmax.f32 %v496_v44, %v497_v48  ;;  %v507_v54 = vmax.f32 %v505_v45, %v506_v49  ;;  %v653_v48 = vstv %s2784_s9  ;;  %v656_v49 = vstv %s2789_s26  ;;  %s2829_s9 = sld [smem:[#allocation8 + $0x9]] }
 0x25d   : > { %v471_v55 = vadd.f32 %v470_v50, %v469_v46  ;;  %v480_v56 = vadd.f32 %v479_v51, %v478_v47  ;;  %s2065_s26 = sld [smem:[#allocation8 + $0x38]] }
 0x25e   : > { %v499_v57 = vrot.slane %v498_v53, 2  ;;  %v508_v58 = vrot.slane %v507_v54, 2 }
 0x25f   : > { %v472_v59 = vrot.slane %v471_v55, 2  ;;  %v481_v60 = vrot.slane %v480_v56, 2 }
 0x260   : > { %v500_v62 = vmax.f32 %v498_v53, %v499_v57  ;;  %v509_v63 = vmax.f32 %v507_v54, %v508_v58 }
 0x261   : > { %v473_v3 = vadd.f32 %v472_v59, %v471_v55  ;;  %v482_v4 = vadd.f32 %v481_v60, %v480_v56  ;;  %v625_v59 = vstv %s2797_s28  ;;  %v681_v60 = vstv %s2800_s30  ;;  %s2832_s28 = sld [smem:[#allocation8 + $0x3a]] }
 0x262   : > { %v501_v6 = vrot.slane %v500_v62, 1  ;;  %v510_v11 = vrot.slane %v509_v63, 1  ;;  %s2842_s30 = sld [smem:[#allocation8 + $0xb]] }
 0x263   : > { %v474_v12 = vrot.slane %v473_v3, 1  ;;  %v483_v13 = vrot.slane %v482_v4, 1 }
 0x264   : > { %v2758_v15 = vmax.f32 %v500_v62, %v501_v6  ;;  %v2760_v16 = vmax.f32 %v509_v63, %v510_v11  ;;  %v684_v62 = vstv %s2803_s27  ;;  %s2858_s27 = sld [smem:[#allocation8 + $0xc]] }
 0x265   : > { %v475_v17 = vadd.f32 %v474_v12, %v473_v3  ;;  %v484_v18 = vadd.f32 %v483_v13, %v482_v4 }
 0x266   : > { %v519_v25 = vmul.f32 %v517_v19, %v2760_v16  ;;  %v573_v26 = vmul.f32 %v572_v20, %v2758_v15  ;;  %v518_v30 = vmul.f32 %v517_v19, %v2758_v15  ;;  %v546_v42 = vmul.f32 %v544_v7, %v2760_v16 }
 0x267   : > { %v2772_v23 = vmul.f32 %v491_v14, %v475_v17  ;;  %v2774_v24 = vmul.f32 %v491_v14, %v484_v18  ;;  %v602_v43 = vmul.f32 %v600_v8, %v2760_v16  ;;  %v545_v44 = vmul.f32 %v544_v7, %v2758_v15 }
 0x268   : > { %v601_v53 = vmul.f32 %v600_v8, %v2758_v15  ;;  %v657_v54 = vmul.f32 %v656_v49, %v2758_v15  ;;  %v574_v55 = vmul.f32 %v572_v20, %v2760_v16  ;;  %v630_v6 = vmul.f32 %v628_v61, %v2760_v16 }
 0x269   : > { %v516_v27 = vmul.f32 %v514_v21, %v2774_v24  ;;  %v570_v28 = vmul.f32 %v569_v22, %v2772_v23  ;;  %v515_v29 = vmul.f32 %v514_v21, %v2772_v23  ;;  %v543_v9 = vmul.f32 %v541_v2, %v2774_v24 }
 0x26a   : > { %v599_v10 = vmul.f32 %v597_v5, %v2774_v24  ;;  %v542_v41 = vmul.f32 %v541_v2, %v2772_v23  ;;  %v598_v50 = vmul.f32 %v597_v5, %v2772_v23  ;;  %v654_v51 = vmul.f32 %v653_v48, %v2772_v23 }
 0x26b   : > { %v521_v34 = vadd.f32 %v519_v25, %v516_v27  ;;  %v575_v35 = vadd.f32 %v573_v26, %v570_v28  ;;  %v520_v40 = vadd.f32 %v518_v30, %v515_v29  ;;  %v548_v45 = vadd.f32 %v546_v42, %v543_v9 }
 0x26c   : > { %v604_v46 = vadd.f32 %v602_v43, %v599_v10  ;;  %v547_v47 = vadd.f32 %v545_v44, %v542_v41  ;;  %v571_v52 = vmul.f32 %v569_v22, %v2774_v24  ;;  %v603_v56 = vadd.f32 %v601_v53, %v598_v50 }
 0x26d   : > { %524 = vrot.lane.b32.xlu1 %v521_v34, %s2455_s12  ;;  %577 = vrot.lane.b32.xlu0 %v575_v35, %s2456_s14  ;;  %v659_v57 = vadd.f32 %v657_v54, %v654_v51  ;;  %v627_v63 = vmul.f32 %v625_v59, %v2774_v24  ;;  %v683_v3 = vmul.f32 %v681_v60, %v2774_v24  ;;  %v737_v18 = vstv %s2813_s24  ;;  %s2463_s24 = smov 35  }
 0x26e   : > { %522 = vrot.lane.b32.xlu2 %v520_v40, %s2455_s12  ;;  %v576_v58 = vadd.f32 %v574_v55, %v571_v52  ;;  %v626_v4 = vmul.f32 %v625_v59, %v2772_v23  ;;  %v686_v11 = vmul.f32 %v684_v62, %v2760_v16  ;;  %v629_v12 = vmul.f32 %v628_v61, %v2758_v15  ;;  %s2460_s12 = smov 47  }
 0x26f   : > { %v632_v13 = vadd.f32 %v630_v6, %v627_v63  ;;  %v740_v19 = vstv %s2818_s11  ;;  %v682_v20 = vmul.f32 %v681_v60, %v2772_v23  ;;  %v738_v21 = vmul.f32 %v737_v18, %v2772_v23  ;;  %s2071_s11 = sld [smem:[#allocation8 + $0x3b]] }
 0x270   : > { %v688_v14 = vadd.f32 %v686_v11, %v683_v3  ;;  %v631_v17 = vadd.f32 %v629_v12, %v626_v4  ;;  %v655_v22 = vmul.f32 %v653_v48, %v2774_v24  ;;  %v685_v25 = vmul.f32 %v684_v62, %v2758_v15 }
 0x271   : > { %v741_v26 = vmul.f32 %v740_v19, %v2758_v15  ;;  %v658_v27 = vmul.f32 %v656_v49, %v2760_v16  ;;  %v709_v34 = vstv %s2826_s8  ;;  %v765_v35 = vstv %s2829_s9  ;;  %s2861_s8 = sld [smem:[#allocation8 + $0x3d]] }
 0x272   : > { %v687_v28 = vadd.f32 %v685_v25, %v682_v20  ;;  %v712_v40 = vstv %s2065_s26  ;;  %v768_v2 = vstv %s2832_s28  ;;  %v711_v5 = vmul.f32 %v709_v34, %v2774_v24  ;;  %s2871_s9 = sld [smem:[#allocation8 + $0xe]] }
 0x273   : > { %v743_v29 = vadd.f32 %v741_v26, %v738_v21  ;;  %v660_v30 = vadd.f32 %v658_v27, %v655_v22  ;;  %v767_v7 = vmul.f32 %v765_v35, %v2774_v24  ;;  %v710_v8 = vmul.f32 %v709_v34, %v2772_v23  ;;  %s2884_s26 = sld [smem:[#allocation8 + $0xd]] }
 0x274   : > { %v714_v9 = vmul.f32 %v712_v40, %v2760_v16  ;;  %v770_v10 = vmul.f32 %v768_v2, %v2760_v16  ;;  %v713_v41 = vmul.f32 %v712_v40, %v2758_v15  ;;  %v739_v49 = vmul.f32 %v737_v18, %v2774_v24  ;;  %s2887_s28 = sld [smem:[#allocation8 + $0xf]] }
 0x275   : > { %551 = vrot.lane.b32.xlu1 %v548_v45, %s2457_s6  ;;  %607 = vrot.lane.b32.xlu0 %v604_v46, %s2458_s23  ;;  %v821_v45 = vstv %s2842_s30  ;;  %v769_v50 = vmul.f32 %v768_v2, %v2758_v15  ;;  %v742_v52 = vmul.f32 %v740_v19, %v2760_v16  ;;  %s2466_s30 = smov 32  }
 0x276   : > { %549 = vrot.lane.b32.xlu2 %v547_v47, %s2457_s6  ;;  %s2462_s6 = smov 34   ;;  %v716_v42 = vadd.f32 %v714_v9, %v711_v5  ;;  %v772_v43 = vadd.f32 %v770_v10, %v767_v7  ;;  %v715_v44 = vadd.f32 %v713_v41, %v710_v8  ;;  %v766_v47 = vmul.f32 %v765_v35, %v2772_v23 }
 0x277   : > { %v822_v48 = vmul.f32 %v821_v45, %v2772_v23  ;;  %v744_v55 = vadd.f32 %v742_v52, %v739_v49  ;;  %v852_v59 = vstv %s2861_s8  ;;  %v823_v19 = vmul.f32 %v821_v45, %v2774_v24  ;;  %s2916_s8 = sld [smem:[#allocation8 + $0x12]] }
 0x278   : > { %v771_v53 = vadd.f32 %v769_v50, %v766_v47  ;;  %v854_v3 = vmul.f32 %v852_v59, %v2760_v16  ;;  %v853_v20 = vmul.f32 %v852_v59, %v2758_v15 }
 0x27d   : > { %605 = vrot.lane.b32.xlu1 %v603_v56, %s2458_s23  ;;  %661 = vrot.lane.b32.xlu0 %v659_v57, %s2459_s29  ;;  %s2847_s23 = sld [smem:[#allocation8 + $0x3c]]  ;;  %v793_v56 = vstv %s2855_s15  ;;  %v849_v57 = vstv %s2858_s27 }
 0x27e   : > { %579 = vrot.lane.b32.xlu2 %v576_v58, %s2456_s14  ;;  %s2461_s14 = smov 45   ;;  %v796_v58 = vstv %s2071_s11  ;;  %v795_v60 = vmul.f32 %v793_v56, %v2774_v24  ;;  %v851_v61 = vmul.f32 %v849_v57, %v2774_v24  ;;  %v794_v62 = vmul.f32 %v793_v56, %v2772_v23  ;;  %s2890_s15 = sld [smem:[#allocation8 + $0x40]] }
 0x27f   : > { %v798_v63 = vmul.f32 %v796_v58, %v2760_v16  ;;  %v797_v4 = vmul.f32 %v796_v58, %v2758_v15  ;;  %s2900_s27 = sld [smem:[#allocation8 + $0x11]] }
 0x280   : > { %v856_v11 = vadd.f32 %v854_v3, %v851_v61  ;;  %s2913_s11 = sld [smem:[#allocation8 + $0x10]] }
 0x281   : > { %v800_v6 = vadd.f32 %v798_v63, %v795_v60  ;;  %v799_v12 = vadd.f32 %v797_v4, %v794_v62 }
 0x283   : > { %v824_v46 = vstv %s2847_s23  ;;  %s2077_s23 = sld [smem:[#allocation8 + $0x3e]] }
 0x284   : > { %v825_v51 = vmul.f32 %v824_v46, %v2758_v15  ;;  %v826_v22 = vmul.f32 %v824_v46, %v2760_v16  ;;  %v936_v34 = vstv %s2890_s15  ;;  %s2945_s15 = sld [smem:[#allocation8 + $0x15]] }
 0x285   : > { %635 = vrot.lane.b32.xlu1 %v632_v13, %s2460_s12  ;;  %691 = vrot.lane.b32.xlu0 %v688_v14, %s2461_s14  ;;  %v905_v13 = vstv %s2871_s9  ;;  %v938_v7 = vmul.f32 %v936_v34, %v2760_v16  ;;  %s2469_s9 = smov 29   ;;  %v937_v47 = vmul.f32 %v936_v34, %v2758_v15 }
 0x286   : > { %633 = vrot.lane.b32.xlu2 %v631_v17, %s2460_s12  ;;  %v827_v54 = vadd.f32 %v825_v51, %v822_v48  ;;  %s2465_s12 = smov 31   ;;  %v850_v17 = vmul.f32 %v849_v57, %v2772_v23  ;;  %v906_v18 = vmul.f32 %v905_v13, %v2772_v23  ;;  %v828_v27 = vadd.f32 %v826_v22, %v823_v19 }
 0x287   : > { %v907_v46 = vmul.f32 %v905_v13, %v2774_v24 }
 0x288   : > { %v855_v25 = vadd.f32 %v853_v20, %v850_v17 }
 0x28d   : > { %689 = vrot.lane.b32.xlu1 %v687_v28, %s2461_s14  ;;  %745 = vrot.lane.b32.xlu0 %v743_v29, %s2462_s6  ;;  %s2876_s14 = sld [smem:[#allocation8 + $0x3f]]  ;;  %v877_v28 = vstv %s2884_s26  ;;  %v933_v29 = vstv %s2887_s28 }
 0x28e   : > { %663 = vrot.lane.b32.xlu2 %v660_v30, %s2459_s29  ;;  %s2464_s29 = smov 33   ;;  %v880_v30 = vstv %s2077_s23  ;;  %v879_v35 = vmul.f32 %v877_v28, %v2774_v24  ;;  %v935_v40 = vmul.f32 %v933_v29, %v2774_v24  ;;  %v878_v2 = vmul.f32 %v877_v28, %v2772_v23  ;;  %s2919_s26 = sld [smem:[#allocation8 + $0x43]] }
 0x28f   : > { %v882_v5 = vmul.f32 %v880_v30, %v2760_v16  ;;  %v881_v8 = vmul.f32 %v880_v30, %v2758_v15  ;;  %s2929_s28 = sld [smem:[#allocation8 + $0x14]] }
 0x290   : > { %v940_v10 = vadd.f32 %v938_v7, %v935_v40  ;;  %s2942_s23 = sld [smem:[#allocation8 + $0x13]] }
 0x291   : > { %v884_v9 = vadd.f32 %v882_v5, %v879_v35  ;;  %v883_v41 = vadd.f32 %v881_v8, %v878_v2 }
 0x293   : > { %v908_v14 = vstv %s2876_s14  ;;  %s2083_s14 = sld [smem:[#allocation8 + $0x41]] }
 0x294   : > { %v909_v21 = vmul.f32 %v908_v14, %v2758_v15  ;;  %v910_v49 = vmul.f32 %v908_v14, %v2760_v16  ;;  %v1020_v56 = vstv %s2919_s26  ;;  %s2978_s26 = sld [smem:[#allocation8 + $0x19]] }
 0x295   : > { %719 = vrot.lane.b32.xlu1 %v716_v42, %s2463_s24  ;;  %775 = vrot.lane.b32.xlu0 %v772_v43, %s2464_s29  ;;  %v989_v42 = vstv %s2900_s27  ;;  %v1022_v61 = vmul.f32 %v1020_v56, %v2760_v16  ;;  %s2472_s27 = smov 17  }
 0x296   : > { %717 = vrot.lane.b32.xlu2 %v715_v44, %s2463_s24  ;;  %v911_v26 = vadd.f32 %v909_v21, %v906_v18  ;;  %s2468_s24 = smov 19   ;;  %v934_v44 = vmul.f32 %v933_v29, %v2772_v23  ;;  %v990_v45 = vmul.f32 %v989_v42, %v2772_v23  ;;  %v912_v52 = vadd.f32 %v910_v49, %v907_v46 }
 0x297   : > { %v991_v17 = vmul.f32 %v989_v42, %v2774_v24  ;;  %v1021_v18 = vmul.f32 %v1020_v56, %v2758_v15 }
 0x298   : > { %v939_v50 = vadd.f32 %v937_v47, %v934_v44 }
 0x29d   : > { %773 = vrot.lane.b32.xlu1 %v771_v53, %s2464_s29  ;;  %829 = vrot.lane.b32.xlu0 %v827_v54, %s2465_s12  ;;  %s2905_s29 = sld [smem:[#allocation8 + $0x42]]  ;;  %v961_v53 = vstv %s2913_s11  ;;  %v1017_v54 = vstv %s2916_s8 }
 0x29e   : > { %747 = vrot.lane.b32.xlu2 %v744_v55, %s2462_s6  ;;  %s2467_s6 = smov 30   ;;  %v964_v55 = vstv %s2083_s14  ;;  %v963_v57 = vmul.f32 %v961_v53, %v2774_v24  ;;  %v1019_v58 = vmul.f32 %v1017_v54, %v2774_v24  ;;  %v962_v59 = vmul.f32 %v961_v53, %v2772_v23  ;;  %s2948_s11 = sld [smem:[#allocation8 + $0x46]] }
 0x29f   : > { %v966_v60 = vmul.f32 %v964_v55, %v2760_v16  ;;  %v965_v62 = vmul.f32 %v964_v55, %v2758_v15  ;;  %s2960_s8 = sld [smem:[#allocation8 + $0x17]] }
 0x2a0   : > { %v1024_v3 = vadd.f32 %v1022_v61, %v1019_v58  ;;  %s2975_s14 = sld [smem:[#allocation8 + $0x16]] }
 0x2a1   : > { %v968_v63 = vadd.f32 %v966_v60, %v963_v57  ;;  %v967_v4 = vadd.f32 %v965_v62, %v962_v59 }
 0x2a3   : > { %v992_v43 = vstv %s2905_s29  ;;  %s2089_s29 = sld [smem:[#allocation8 + $0x44]] }
 0x2a4   : > { %v993_v48 = vmul.f32 %v992_v43, %v2758_v15  ;;  %v994_v20 = vmul.f32 %v992_v43, %v2760_v16  ;;  %v1104_v29 = vstv %s2948_s11  ;;  %s3014_s11 = sld [smem:[#allocation8 + $0x1a]] }
 0x2a5   : > { %803 = vrot.lane.b32.xlu1 %v800_v6, %s2466_s30  ;;  %859 = vrot.lane.b32.xlu0 %v856_v11, %s2467_s6  ;;  %v1073_v6 = vstv %s2929_s28  ;;  %v1106_v5 = vmul.f32 %v1104_v29, %v2760_v16  ;;  %s2475_s28 = smov 14   ;;  %v1105_v47 = vmul.f32 %v1104_v29, %v2758_v15 }
 0x2a6   : > { %801 = vrot.lane.b32.xlu2 %v799_v12, %s2466_s30  ;;  %v995_v51 = vadd.f32 %v993_v48, %v990_v45  ;;  %s2471_s30 = smov 16   ;;  %v1018_v12 = vmul.f32 %v1017_v54, %v2772_v23  ;;  %v1074_v13 = vmul.f32 %v1073_v6, %v2772_v23  ;;  %v1075_v46 = vmul.f32 %v1073_v6, %v2774_v24 }
 0x2a7   : > { %v1129_v53 = vstv %s2975_s14  ;;  %v1197_v54 = vstv %s2978_s26  ;;  %s3025_s14 = sld [smem:[#allocation8 + $0x1c]]  ;;  %s2478_s26 = smov 2  }
 0x2a8   : > { %v1023_v21 = vadd.f32 %v1021_v18, %v1018_v12  ;;  %v1131_v59 = vmul.f32 %v1129_v53, %v2774_v24  ;;  %v1199_v60 = vmul.f32 %v1197_v54, %v2774_v24  ;;  %v1130_v61 = vmul.f32 %v1129_v53, %v2772_v23  ;;  %v557_v18 = vld [vmem:[#allocation6 + $0x1] ss:$8 sm:$0x3] }
 0x2a9   : > { %v1048_v28 = vstv %s2089_s29  ;;  %s2477_s29 = smov 1  }
 0x2aa   : > { %v1050_v2 = vmul.f32 %v1048_v28, %v2760_v16  ;;  %v1049_v7 = vmul.f32 %v1048_v28, %v2758_v15 }
 0x2ad   : > { %857 = vrot.lane.b32.xlu1 %v855_v25, %s2467_s6  ;;  %913 = vrot.lane.b32.xlu0 %v911_v26, %s2468_s24  ;;  %s2934_s6 = sld [smem:[#allocation8 + $0x45]]  ;;  %v996_v25 = vadd.f32 %v994_v20, %v991_v17  ;;  %v1045_v26 = vstv %s2942_s23 }
 0x2ae   : > { %831 = vrot.lane.b32.xlu2 %v828_v27, %s2465_s12  ;;  %s2470_s12 = smov 18   ;;  %v1101_v27 = vstv %s2945_s15  ;;  %v1047_v30 = vmul.f32 %v1045_v26, %v2774_v24  ;;  %v1046_v40 = vmul.f32 %v1045_v26, %v2772_v23  ;;  %s2980_s23 = sld [smem:[#allocation8 + $0x47]] }
 0x2af   : > { %v1103_v34 = vmul.f32 %v1101_v27, %v2774_v24  ;;  %s2983_s15 = sld [smem:[#allocation8 + $0x4a]]  ;;  %v1102_v43 = vmul.f32 %v1101_v27, %v2772_v23 }
 0x2b0   : > { %v1052_v8 = vadd.f32 %v1050_v2, %v1047_v30  ;;  %v559_v30 = vperm.slane %v557_v18, 0 }
 0x2b3   : > { %v1076_v11 = vstv %s2934_s6  ;;  %s2476_s6 = smov 3  }
 0x2b4   : > { %v1077_v19 = vmul.f32 %v1076_v11, %v2758_v15  ;;  %v1078_v49 = vmul.f32 %v1076_v11, %v2760_v16  ;;  %v1132_v55 = vstv %s2980_s23  ;;  %v529_v11 = vld [vmem:[#allocation6] ss:$8 sm:$0x3]  ;;  %s3047_s23 = sld [smem:[#allocation8 + $0x1e]] }
 0x2b5   : > { %887 = vrot.lane.b32.xlu1 %v884_v9, %s2469_s9  ;;  %943 = vrot.lane.b32.xlu0 %v940_v10, %s2470_s12  ;;  %v1108_v9 = vadd.f32 %v1106_v5, %v1103_v34  ;;  %v1051_v10 = vadd.f32 %v1049_v7, %v1046_v40  ;;  %v1200_v56 = vstv %s2983_s15  ;;  %v1134_v12 = vmul.f32 %v1132_v55, %v2760_v16  ;;  %s3068_s15 = sld [smem:[#allocation8 + $0x1d]] }
 0x2b6   : > { %885 = vrot.lane.b32.xlu2 %v883_v41, %s2469_s9  ;;  %v1079_v22 = vadd.f32 %v1077_v19, %v1074_v13  ;;  %s2474_s9 = smov 13   ;;  %v1157_v41 = vstv %s2960_s8  ;;  %v1202_v13 = vmul.f32 %v1200_v56, %v2760_v16  ;;  %v1133_v17 = vmul.f32 %v1132_v55, %v2758_v15  ;;  %s2480_s8 = smov 125  }
 0x2b7   : > { %v1158_v44 = vmul.f32 %v1157_v41, %v2772_v23  ;;  %v1136_v19 = vadd.f32 %v1134_v12, %v1131_v59  ;;  %v1201_v27 = vmul.f32 %v1200_v56, %v2758_v15  ;;  %v532_v29 = vperm.slane %v529_v11, 1 }
 0x2b8   : > { %v1204_v20 = vadd.f32 %v1202_v13, %v1199_v60  ;;  %v1135_v26 = vadd.f32 %v1133_v17, %v1130_v61  ;;  %v560_v34 = vperm.slane %v557_v18, 1  ;;  %v1281_v60 = vstv %s3025_s14  ;;  %s2482_s14 = smov 115  }
 0x2b9   : > { %v1283_v13 = vmul.f32 %v1281_v60, %v2774_v24 }
 0x2bd   : > { %941 = vrot.lane.b32.xlu1 %v939_v50, %s2470_s12  ;;  %997 = vrot.lane.b32.xlu0 %v995_v51, %s2471_s30  ;;  %s2965_s12 = sld [smem:[#allocation8 + $0x48]]  ;;  %v1107_v50 = vadd.f32 %v1105_v47, %v1102_v43 }
 0x2be   : > { %915 = vrot.lane.b32.xlu2 %v912_v52, %s2468_s24  ;;  %s2473_s24 = smov 15   ;;  %v1080_v52 = vadd.f32 %v1078_v49, %v1075_v46  ;;  %v1159_v46 = vmul.f32 %v1157_v41, %v2774_v24 }
 0x2c3   : > { %v1160_v42 = vstv %s2965_s12  ;;  %s3054_s12 = sld [smem:[#allocation8 + $0x4f]] }
 0x2c4   : > { %v1161_v48 = vmul.f32 %v1160_v42, %v2758_v15  ;;  %v1162_v53 = vmul.f32 %v1160_v42, %v2760_v16 }
 0x2c5   : > { %971 = vrot.lane.b32.xlu1 %v968_v63, %s2472_s27  ;;  %1027 = vrot.lane.b32.xlu0 %v1024_v3, %s2473_s24 }
 0x2c6   : > { %969 = vrot.lane.b32.xlu2 %v967_v4, %s2472_s27  ;;  %v1163_v51 = vadd.f32 %v1161_v48, %v1158_v44  ;;  %s2995_s27 = sld [smem:[#allocation8 + $0x1b]]  ;;  %v1164_v41 = vadd.f32 %v1162_v53, %v1159_v46 }
 0x2c8   : > { %v2952_v14 = vpop.permute.xlu2 %522 }
 0x2cd   : > { %1025 = vrot.lane.b32.xlu1 %v1023_v21, %s2473_s24  ;;  %1081 = vrot.lane.b32.xlu0 %v1079_v22, %s2474_s9  ;;  %s2999_s24 = sld [smem:[#allocation8 + $0x4c]]  ;;  %v1253_v21 = vstv %s2995_s27  ;;  %v531_v22 = vperm.slane %v529_v11, 0  ;;  %s2483_s27 = smov 113  }
 0x2ce   : > { %999 = vrot.lane.b32.xlu2 %v996_v25, %s2471_s30  ;;  %v585_v25 = vld [vmem:[#allocation6 + $0x2] ss:$8 sm:$0x3]  ;;  %v1254_v40 = vmul.f32 %v1253_v21, %v2772_v23 }
 0x2cf   : > { %v587_v2 = vperm.slane %v585_v25, 0  ;;  %v588_v5 = vperm.slane %v585_v25, 1 }
 0x2d0   : > { %v2969_v35 = vpop.permute.xlu2 %549 }
 0x2d3   : > { %v1256_v28 = vstv %s2999_s24  ;;  %s3107_s24 = sld [smem:[#allocation8 + $0x52]] }
 0x2d5   : > { %1055 = vrot.lane.b32.xlu1 %v1052_v8, %s2475_s28  ;;  %1111 = vrot.lane.b32.xlu0 %v1108_v9, %s2476_s6 }
 0x2d6   : > { %1053 = vrot.lane.b32.xlu2 %v1051_v10, %s2475_s28  ;;  %s2479_s28 = smov 127  }
 0x2d8   : > { %v580_v45 = vpop.permute.xlu2 %579 }
 0x2dd   : > { %1109 = vrot.lane.b32.xlu1 %v1107_v50, %s2476_s6  ;;  %1165 = vrot.lane.b32.xlu0 %v1163_v51, %s2477_s29  ;;  %s3032_s6 = sld [smem:[#allocation8 + $0x4d]]  ;;  %v613_v51 = vld [vmem:[#allocation6 + $0x3] ss:$8 sm:$0x3] }
 0x2de   : > { %1083 = vrot.lane.b32.xlu2 %v1080_v52, %s2474_s9  ;;  %s3018_s9 = sld [smem:[#allocation8 + $0x4b]]  ;;  %v615_v59 = vperm.slane %v613_v51, 0  ;;  %v616_v42 = vperm.slane %v613_v51, 1 }
 0x2df   : > { %v525_v57 = vpop.permute.xlu1 %524  ;;  %v578_v58 = vpop.permute.xlu0 %577 }
 0x2e0   : > { %v527_v62 = vsel %vm526_vm13, %v2952_v14, %v525_v57  ;;  %v528_v63 = vsel %vm526_vm13, %v525_v57, %v2952_v14  ;;  %v582_v3 = vsel %vm581_vm14, %v578_v58, %v580_v45  ;;  %v583_v4 = vsel %vm581_vm14, %v580_v45, %v578_v58  ;;  %v3012_v6 = vpop.permute.xlu2 %633 }
 0x2e1   : > { %v1198_v14 = vmul.f32 %v1197_v54, %v2772_v23  ;;  %v1257_v45 = vmul.f32 %v1256_v28, %v2758_v15  ;;  %v535_v47 = vmul.f32 %v531_v22, %v528_v63  ;;  %v536_v48 = vmul.f32 %v532_v29, %v527_v62 }
 0x2e2   : > { %v1225_v54 = vstv %s3014_s11  ;;  %v592_v56 = vmul.f32 %v588_v5, %v582_v3  ;;  %s3076_s11 = sld [smem:[#allocation8 + $0x1f]]  ;;  %vm1001_vm13 = vcmp.lt.s32.totalorder %v2698_v31, 16  ;;  %vm973_vm14 = vcmp.lt.s32.totalorder %v2698_v31, 17 }
 0x2e3   : > { %v1203_v9 = vadd.f32 %v1201_v27, %v1198_v14  ;;  %v1259_v52 = vadd.f32 %v1257_v45, %v1254_v40  ;;  %v1227_v63 = vmul.f32 %v1225_v54, %v2774_v24  ;;  %v1284_v3 = vstv %s3032_s6  ;;  %s3121_s6 = sld [smem:[#allocation8 + $0x20]] }
 0x2e4   : > { %v1228_v55 = vstv %s3018_s9  ;;  %v1226_v17 = vmul.f32 %v1225_v54, %v2772_v23  ;;  %v1286_v27 = vmul.f32 %v1284_v3, %v2760_v16  ;;  %s2481_s9 = smov 126   ;;  %v1340_v45 = vstv %s3054_s12  ;;  %s3160_s12 = sld [smem:[#allocation8 + $0x55]] }
 0x2e5   : > { %1139 = vrot.lane.b32.xlu1 %v1136_v19, %s2478_s26  ;;  %1207 = vrot.lane.b32.xlu0 %v1204_v20, %s2479_s28  ;;  %v1230_v12 = vmul.f32 %v1228_v55, %v2760_v16  ;;  %v1285_v51 = vmul.f32 %v1284_v3, %v2758_v15 }
 0x2e6   : > { %1137 = vrot.lane.b32.xlu2 %v1135_v26, %s2478_s26  ;;  %v1288_v5 = vadd.f32 %v1286_v27, %v1283_v13  ;;  %s3084_s26 = sld [smem:[#allocation8 + $0x50]] }
 0x2e7   : > { %v552_v7 = vpop.permute.xlu1 %551  ;;  %v608_v8 = vpop.permute.xlu0 %607  ;;  %v1232_v29 = vadd.f32 %v1230_v12, %v1227_v63 }
 0x2e8   : > { %v554_v10 = vsel %vm553_vm15, %v2969_v35, %v552_v7  ;;  %v555_v43 = vsel %vm553_vm15, %v552_v7, %v2969_v35  ;;  %v664_v44 = vpop.permute.xlu2 %663  ;;  %v591_v35 = vmul.f32 %v587_v2, %v583_v4  ;;  %v1337_v7 = vstv %s3047_s23  ;;  %s2486_s23 = smov 110  }
 0x2e9   : > { %v563_v49 = vmul.f32 %v559_v30, %v555_v43  ;;  %v564_v50 = vmul.f32 %v560_v34, %v554_v10  ;;  %v1229_v30 = vmul.f32 %v1228_v55, %v2758_v15  ;;  %v641_v34 = vld [vmem:[#allocation6 + $0x4] ss:$8 sm:$0x3]  ;;  %v1282_v10 = vmul.f32 %v1281_v60, %v2772_v23 }
 0x2ea   : > { %v643_v43 = vperm.slane %v641_v34, 0  ;;  %v1338_v46 = vmul.f32 %v1337_v7, %v2772_v23  ;;  %v1341_v55 = vmul.f32 %v1340_v45, %v2758_v15  ;;  %v1258_v60 = vmul.f32 %v1256_v28, %v2760_v16 }
 0x2eb   : > { %v565_v57 = vadd.f32 %v563_v49, %v535_v47  ;;  %v566_v58 = vadd.f32 %v564_v50, %v536_v48  ;;  %vm1029_vm15 = vcmp.lt.s32.totalorder %v2698_v31, 15 }
 0x2ed   : > { %v593_v61 = vadd.f32 %v591_v35, %v565_v57  ;;  %v594_v62 = vadd.f32 %v592_v56, %v566_v58  ;;  %1205 = vrot.lane.b32.xlu1 %v1203_v9, %s2479_s28  ;;  %1261 = vrot.lane.b32.xlu0 %v1259_v52, %s2480_s8  ;;  %v1231_v9 = vadd.f32 %v1229_v30, %v1226_v17  ;;  %s3100_s28 = sld [smem:[#allocation8 + $0x21]] }
 0x2ee   : > { %1167 = vrot.lane.b32.xlu2 %v1164_v41, %s2477_s29  ;;  %s3071_s29 = sld [smem:[#allocation8 + $0x4e]]  ;;  %v1255_v35 = vmul.f32 %v1253_v21, %v2774_v24  ;;  %v1287_v58 = vadd.f32 %v1285_v51, %v1282_v10  ;;  %v697_v41 = vld [vmem:[#allocation6 + $0x6] ss:$8 sm:$0x3] }
 0x2ef   : > { %v606_v4 = vpop.permute.xlu1 %605  ;;  %v662_v11 = vpop.permute.xlu0 %661  ;;  %v699_v21 = vperm.slane %v697_v41, 0  ;;  %v700_v28 = vperm.slane %v697_v41, 1 }
 0x2f0   : > { %v610_v18 = vsel %vm609_vm0, %v606_v4, %v608_v8  ;;  %v611_v19 = vsel %vm609_vm0, %v608_v8, %v606_v4  ;;  %v666_v20 = vsel %vm665_vm1, %v662_v11, %v664_v44  ;;  %v667_v14 = vsel %vm665_vm1, %v664_v44, %v662_v11  ;;  %v3066_v22 = vpop.permute.xlu2 %717  ;;  %v669_v8 = vld [vmem:[#allocation6 + $0x5] ss:$8 sm:$0x3] }
 0x2f1   : > { %v619_v25 = vmul.f32 %v615_v59, %v611_v19  ;;  %v620_v26 = vmul.f32 %v616_v42, %v610_v18  ;;  %v644_v44 = vperm.slane %v641_v34, 1  ;;  %v671_v47 = vperm.slane %v669_v8, 0 }
 0x2f2   : > { %v672_v48 = vperm.slane %v669_v8, 1  ;;  %v1343_v59 = vadd.f32 %v1341_v55, %v1338_v46  ;;  %v1260_v4 = vadd.f32 %v1258_v60, %v1255_v35  ;;  %v1365_v11 = vstv %s3076_s11  ;;  %s2485_s11 = smov 112  }
 0x2f3   : > { %v621_v40 = vadd.f32 %v619_v25, %v593_v61  ;;  %v622_v2 = vadd.f32 %v620_v26, %v594_v62  ;;  %v1309_v61 = vstv %s3068_s15  ;;  %v675_v42 = vmul.f32 %v671_v47, %v667_v14  ;;  %s3129_s15 = sld [smem:[#allocation8 + $0x22]] }
 0x2f4   : > { %v1312_v62 = vstv %s3071_s29  ;;  %v1311_v17 = vmul.f32 %v1309_v61, %v2774_v24  ;;  %v1368_v18 = vstv %s3084_s26  ;;  %v1367_v25 = vmul.f32 %v1365_v11, %v2774_v24  ;;  %s2484_s29 = smov 114   ;;  %s3174_s26 = sld [smem:[#allocation8 + $0x23]] }
 0x2f5   : > { %1235 = vrot.lane.b32.xlu1 %v1232_v29, %s2481_s9  ;;  %1291 = vrot.lane.b32.xlu0 %v1288_v5, %s2482_s14  ;;  %v1314_v14 = vmul.f32 %v1312_v62, %v2760_v16  ;;  %v1310_v26 = vmul.f32 %v1309_v61, %v2772_v23  ;;  %v1370_v8 = vmul.f32 %v1368_v18, %v2760_v16  ;;  %vm1085_vm0 = vcmp.lt.s32.totalorder %v2698_v31, 13 }
 0x2f6   : > { %1233 = vrot.lane.b32.xlu2 %v1231_v9, %s2481_s9  ;;  %v1313_v10 = vmul.f32 %v1312_v62, %v2758_v15  ;;  %v1366_v51 = vmul.f32 %v1365_v11, %v2772_v23  ;;  %s3137_s9 = sld [smem:[#allocation8 + $0x53]]  ;;  %v1369_v41 = vmul.f32 %v1368_v18, %v2758_v15  ;;  %v1342_v11 = vmul.f32 %v1340_v45, %v2760_v16 }
 0x2f7   : > { %v636_v49 = vpop.permute.xlu1 %635  ;;  %v692_v50 = vpop.permute.xlu0 %691  ;;  %v1316_v9 = vadd.f32 %v1314_v14, %v1311_v17  ;;  %v1372_v47 = vadd.f32 %v1370_v8, %v1367_v25  ;;  %vm1057_vm1 = vcmp.lt.s32.totalorder %v2698_v31, 14 }
 0x2f8   : > { %v638_v52 = vsel %vm637_vm2, %v3012_v6, %v636_v49  ;;  %v639_v53 = vsel %vm637_vm2, %v636_v49, %v3012_v6  ;;  %v748_v54 = vpop.permute.xlu2 %747  ;;  %v676_v6 = vmul.f32 %v672_v48, %v666_v20  ;;  %v1421_v48 = vstv %s3100_s28  ;;  %v753_v49 = vld [vmem:[#allocation6 + $0x10] ss:$8 sm:$0x3]  ;;  %s2489_s28 = smov 98  }
 0x2f9   : > { %v647_v56 = vmul.f32 %v643_v43, %v639_v53  ;;  %v648_v57 = vmul.f32 %v644_v44, %v638_v52  ;;  %v725_v43 = vld [vmem:[#allocation6 + $0x7] ss:$8 sm:$0x3]  ;;  %v1422_v55 = vmul.f32 %v1421_v48, %v2772_v23  ;;  %v755_v35 = vperm.slane %v753_v49, 0 }
 0x2fa   : > { %v727_v52 = vperm.slane %v725_v43, 0  ;;  %v728_v53 = vperm.slane %v725_v43, 1  ;;  %vm1113_vm2 = vcmp.lt.s32.totalorder %v2698_v31, 3 }
 0x2fb   : > { %v649_v63 = vadd.f32 %v647_v56, %v621_v40  ;;  %v650_v3 = vadd.f32 %v648_v57, %v622_v2  ;;  %v756_v56 = vperm.slane %v753_v49, 1 }
 0x2fd   : > { %1289 = vrot.lane.b32.xlu1 %v1287_v58, %s2482_s14  ;;  %1345 = vrot.lane.b32.xlu0 %v1343_v59, %s2483_s27  ;;  %v677_v12 = vadd.f32 %v675_v42, %v649_v63  ;;  %v678_v13 = vadd.f32 %v676_v6, %v650_v3  ;;  %v1339_v42 = vmul.f32 %v1337_v7, %v2774_v24  ;;  %s3153_s14 = sld [smem:[#allocation8 + $0x24]] }
 0x2fe   : > { %1263 = vrot.lane.b32.xlu2 %v1260_v4, %s2480_s8  ;;  %s3124_s8 = sld [smem:[#allocation8 + $0x51]]  ;;  %v1371_v3 = vadd.f32 %v1369_v41, %v1366_v51  ;;  %v781_v4 = vld [vmem:[#allocation6 + $0x11] ss:$8 sm:$0x3] }
 0x2ff   : > { %v690_v19 = vpop.permute.xlu1 %689  ;;  %v746_v20 = vpop.permute.xlu0 %745  ;;  %v783_v7 = vperm.slane %v781_v4, 0  ;;  %v784_v45 = vperm.slane %v781_v4, 1 }
 0x300   : > { %v694_v27 = vsel %vm693_vm3, %v690_v19, %v692_v50  ;;  %v695_v29 = vsel %vm693_vm3, %v692_v50, %v690_v19  ;;  %v750_v30 = vsel %vm749_vm4, %v746_v20, %v748_v54  ;;  %v751_v34 = vsel %vm749_vm4, %v748_v54, %v746_v20  ;;  %v3119_v40 = vpop.permute.xlu2 %801 }
 0x301   : > { %v703_v2 = vmul.f32 %v699_v21, %v695_v29  ;;  %v704_v5 = vmul.f32 %v700_v28, %v694_v27  ;;  %v1315_v50 = vadd.f32 %v1313_v10, %v1310_v26  ;;  %v1424_v54 = vstv %s3107_s24  ;;  %s3213_s24 = sld [smem:[#allocation8 + $0x58]] }
 0x302   : > { %v1425_v62 = vmul.f32 %v1424_v54, %v2758_v15  ;;  %v1393_v28 = vstv %s3121_s6  ;;  %v1344_v19 = vadd.f32 %v1342_v11, %v1339_v42  ;;  %v1449_v20 = vstv %s3129_s15  ;;  %s3182_s6 = sld [smem:[#allocation8 + $0x25]]  ;;  %s2488_s15 = smov 109  }
 0x303   : > { %v705_v44 = vadd.f32 %v703_v2, %v677_v12  ;;  %v706_v46 = vadd.f32 %v704_v5, %v678_v13  ;;  %v759_v13 = vmul.f32 %v755_v35, %v751_v34  ;;  %v1395_v26 = vmul.f32 %v1393_v28, %v2774_v24 }
 0x304   : > { %v1427_v21 = vadd.f32 %v1425_v62, %v1422_v55  ;;  %v1396_v12 = vstv %s3124_s8  ;;  %v1452_v27 = vstv %s3137_s9  ;;  %v1451_v2 = vmul.f32 %v1449_v20, %v2774_v24  ;;  %s2487_s8 = smov 111   ;;  %s3227_s9 = sld [smem:[#allocation8 + $0x26]] }
 0x305   : > { %1319 = vrot.lane.b32.xlu1 %v1316_v9, %s2484_s29  ;;  %1375 = vrot.lane.b32.xlu0 %v1372_v47, %s2485_s11  ;;  %v1398_v34 = vmul.f32 %v1396_v12, %v2760_v16  ;;  %v1394_v5 = vmul.f32 %v1393_v28, %v2772_v23  ;;  %v1454_v49 = vmul.f32 %v1452_v27, %v2760_v16  ;;  %vm1169_vm3 = vcmp.lt.s32.totalorder %v2698_v31, 1 }
 0x306   : > { %1317 = vrot.lane.b32.xlu2 %v1315_v50, %s2484_s29  ;;  %v1397_v51 = vmul.f32 %v1396_v12, %v2758_v15  ;;  %v1450_v41 = vmul.f32 %v1449_v20, %v2772_v23  ;;  %s3190_s29 = sld [smem:[#allocation8 + $0x56]]  ;;  %v1453_v4 = vmul.f32 %v1452_v27, %v2758_v15  ;;  %v1426_v20 = vmul.f32 %v1424_v54, %v2760_v16 }
 0x307   : > { %v720_v57 = vpop.permute.xlu1 %719  ;;  %v776_v58 = vpop.permute.xlu0 %775  ;;  %v1400_v50 = vadd.f32 %v1398_v34, %v1395_v26  ;;  %v1456_v35 = vadd.f32 %v1454_v49, %v1451_v2  ;;  %vm1141_vm4 = vcmp.lt.s32.totalorder %v2698_v31, 2 }
 0x308   : > { %v722_v59 = vsel %vm721_vm5, %v3066_v22, %v720_v57  ;;  %v723_v60 = vsel %vm721_vm5, %v720_v57, %v3066_v22  ;;  %v832_v61 = vpop.permute.xlu2 %831  ;;  %v760_v22 = vmul.f32 %v756_v56, %v750_v30  ;;  %v1505_v56 = vstv %s3153_s14  ;;  %v837_v57 = vld [vmem:[#allocation6 + $0x13] ss:$8 sm:$0x3]  ;;  %s2492_s14 = smov 95  }
 0x309   : > { %v731_v6 = vmul.f32 %v727_v52, %v723_v60  ;;  %v732_v63 = vmul.f32 %v728_v53, %v722_v59  ;;  %v809_v52 = vld [vmem:[#allocation6 + $0x12] ss:$8 sm:$0x3]  ;;  %v1506_v62 = vmul.f32 %v1505_v56, %v2772_v23  ;;  %v839_v42 = vperm.slane %v837_v57, 0 }
 0x30a   : > { %v811_v59 = vperm.slane %v809_v52, 0  ;;  %v812_v60 = vperm.slane %v809_v52, 1  ;;  %vm1209_vm5 = vcmp.lt.s32.totalorder %v2698_v31, 127 }
 0x30b   : > { %v733_v17 = vadd.f32 %v731_v6, %v705_v44  ;;  %v734_v18 = vadd.f32 %v732_v63, %v706_v46  ;;  %v840_v6 = vperm.slane %v837_v57, 1 }
 0x30d   : > { %1373 = vrot.lane.b32.xlu1 %v1371_v3, %s2485_s11  ;;  %1429 = vrot.lane.b32.xlu0 %v1427_v21, %s2486_s23  ;;  %v761_v14 = vadd.f32 %v759_v13, %v733_v17  ;;  %v762_v25 = vadd.f32 %v760_v22, %v734_v18  ;;  %v1423_v13 = vmul.f32 %v1421_v48, %v2774_v24  ;;  %s3206_s11 = sld [smem:[#allocation8 + $0x27]] }
 0x30e   : > { %1347 = vrot.lane.b32.xlu2 %v1344_v19, %s2483_s27  ;;  %s3177_s27 = sld [smem:[#allocation8 + $0x54]]  ;;  %v1455_v18 = vadd.f32 %v1453_v4, %v1450_v41  ;;  %v865_v19 = vld [vmem:[#allocation6 + $0x14] ss:$8 sm:$0x3] }
 0x30f   : > { %v774_v29 = vpop.permute.xlu1 %773  ;;  %v830_v30 = vpop.permute.xlu0 %829  ;;  %v867_v48 = vperm.slane %v865_v19, 0  ;;  %v868_v54 = vperm.slane %v865_v19, 1 }
 0x310   : > { %v778_v8 = vsel %vm777_vm6, %v774_v29, %v776_v58  ;;  %v779_v9 = vsel %vm777_vm6, %v776_v58, %v774_v29  ;;  %v834_v10 = vsel %vm833_vm7, %v830_v30, %v832_v61  ;;  %v835_v43 = vsel %vm833_vm7, %v832_v61, %v830_v30  ;;  %v3172_v44 = vpop.permute.xlu2 %885 }
 0x311   : > { %v787_v46 = vmul.f32 %v783_v7, %v779_v9  ;;  %v788_v47 = vmul.f32 %v784_v45, %v778_v8  ;;  %v1399_v58 = vadd.f32 %v1397_v51, %v1394_v5  ;;  %v1508_v61 = vstv %s3160_s12  ;;  %s3266_s12 = sld [smem:[#allocation8 + $0x5b]] }
 0x312   : > { %v1509_v12 = vmul.f32 %v1508_v61, %v2758_v15  ;;  %v1477_v45 = vstv %s3174_s26  ;;  %v1428_v29 = vadd.f32 %v1426_v20, %v1423_v13  ;;  %v1533_v30 = vstv %s3182_s6  ;;  %s3234_s26 = sld [smem:[#allocation8 + $0x28]]  ;;  %s2491_s6 = smov 97  }
 0x313   : > { %v789_v53 = vadd.f32 %v787_v46, %v761_v14  ;;  %v790_v55 = vadd.f32 %v788_v47, %v762_v25  ;;  %v843_v25 = vmul.f32 %v839_v42, %v835_v43  ;;  %v1479_v5 = vmul.f32 %v1477_v45, %v2774_v24 }
 0x314   : > { %v1511_v7 = vadd.f32 %v1509_v12, %v1506_v62  ;;  %v1480_v14 = vstv %s3177_s27  ;;  %v1536_v8 = vstv %s3190_s29  ;;  %v1535_v46 = vmul.f32 %v1533_v30, %v2774_v24  ;;  %s2490_s27 = smov 99   ;;  %s3280_s29 = sld [smem:[#allocation8 + $0x29]] }
 0x315   : > { %1403 = vrot.lane.b32.xlu1 %v1400_v50, %s2487_s8  ;;  %1459 = vrot.lane.b32.xlu0 %v1456_v35, %s2488_s15  ;;  %v1482_v43 = vmul.f32 %v1480_v14, %v2760_v16  ;;  %v1478_v47 = vmul.f32 %v1477_v45, %v2772_v23  ;;  %v1538_v57 = vmul.f32 %v1536_v8, %v2760_v16  ;;  %vm1265_vm6 = vcmp.lt.s32.totalorder %v2698_v31, 125 }
 0x316   : > { %1401 = vrot.lane.b32.xlu2 %v1399_v58, %s2487_s8  ;;  %v1481_v41 = vmul.f32 %v1480_v14, %v2758_v15  ;;  %s3243_s8 = sld [smem:[#allocation8 + $0x59]]  ;;  %v1537_v19 = vmul.f32 %v1536_v8, %v2758_v15  ;;  %vm1237_vm7 = vcmp.lt.s32.totalorder %v2698_v31, 126 }
 0x317   : > { %v804_v63 = vpop.permute.xlu1 %803  ;;  %v860_v3 = vpop.permute.xlu0 %859  ;;  %v1484_v58 = vadd.f32 %v1482_v43, %v1479_v5  ;;  %v1540_v42 = vadd.f32 %v1538_v57, %v1535_v46 }
 0x318   : > { %v806_v21 = vsel %vm805_vm8, %v3119_v40, %v804_v63  ;;  %v807_v11 = vsel %vm805_vm8, %v804_v63, %v3119_v40  ;;  %v916_v28 = vpop.permute.xlu2 %915  ;;  %v844_v40 = vmul.f32 %v840_v6, %v834_v10  ;;  %v1589_v6 = vstv %s3206_s11  ;;  %v921_v63 = vld [vmem:[#allocation6 + $0x16] ss:$8 sm:$0x3]  ;;  %s2495_s11 = smov 83  }
 0x319   : > { %v815_v22 = vmul.f32 %v811_v59, %v807_v11  ;;  %v816_v17 = vmul.f32 %v812_v60, %v806_v21  ;;  %v893_v59 = vld [vmem:[#allocation6 + $0x15] ss:$8 sm:$0x3]  ;;  %v1592_v11 = vstv %s3213_s24  ;;  %v1590_v12 = vmul.f32 %v1589_v6, %v2772_v23  ;;  %s3319_s24 = sld [smem:[#allocation8 + $0x5e]] }
 0x31a   : > { %v895_v4 = vperm.slane %v893_v59, 0  ;;  %v896_v21 = vperm.slane %v893_v59, 1  ;;  %v923_v13 = vperm.slane %v921_v63, 0  ;;  %v1593_v14 = vmul.f32 %v1592_v11, %v2758_v15 }
 0x31b   : > { %v817_v26 = vadd.f32 %v815_v22, %v789_v53  ;;  %v818_v27 = vadd.f32 %v816_v17, %v790_v55  ;;  %v924_v22 = vperm.slane %v921_v63, 1  ;;  %vm1293_vm8 = vcmp.lt.s32.totalorder %v2698_v31, 115 }
 0x31d   : > { %1457 = vrot.lane.b32.xlu1 %v1455_v18, %s2488_s15  ;;  %1513 = vrot.lane.b32.xlu0 %v1511_v7, %s2489_s28  ;;  %v845_v34 = vadd.f32 %v843_v25, %v817_v26  ;;  %v846_v2 = vadd.f32 %v844_v40, %v818_v27  ;;  %v1507_v25 = vmul.f32 %v1505_v56, %v2774_v24  ;;  %v949_v27 = vld [vmem:[#allocation6 + $0x17] ss:$8 sm:$0x3]  ;;  %s3259_s15 = sld [smem:[#allocation8 + $0x2a]] }
 0x31e   : > { %1431 = vrot.lane.b32.xlu2 %v1428_v29, %s2486_s23  ;;  %s3230_s23 = sld [smem:[#allocation8 + $0x57]]  ;;  %v1561_v29 = vstv %s3227_s9  ;;  %v951_v56 = vperm.slane %v949_v27, 0  ;;  %v952_v43 = vperm.slane %v949_v27, 1 }
 0x31f   : > { %v858_v9 = vpop.permute.xlu1 %857  ;;  %v914_v10 = vpop.permute.xlu0 %913  ;;  %s3288_s9 = sld [smem:[#allocation8 + $0x2b]] }
 0x320   : > { %v862_v49 = vsel %vm861_vm9, %v858_v9, %v860_v3  ;;  %v863_v50 = vsel %vm861_vm9, %v860_v3, %v858_v9  ;;  %v918_v51 = vsel %vm917_vm10, %v914_v10, %v916_v28  ;;  %v919_v52 = vsel %vm917_vm10, %v916_v28, %v914_v10  ;;  %v3225_v53 = vpop.permute.xlu2 %969 }
 0x321   : > { %v871_v55 = vmul.f32 %v867_v48, %v863_v50  ;;  %v872_v35 = vmul.f32 %v868_v54, %v862_v49  ;;  %v1483_v3 = vadd.f32 %v1481_v41, %v1478_v47  ;;  %v1534_v28 = vmul.f32 %v1533_v30, %v2772_v23 }
 0x322   : > { %v1595_v30 = vadd.f32 %v1593_v14, %v1590_v12  ;;  %v1510_v54 = vmul.f32 %v1508_v61, %v2760_v16  ;;  %v1617_v10 = vstv %s3234_s26  ;;  %v1563_v47 = vmul.f32 %v1561_v29, %v2774_v24  ;;  %s2494_s26 = smov 94  }
 0x323   : > { %v873_v60 = vadd.f32 %v871_v55, %v845_v34  ;;  %v874_v62 = vadd.f32 %v872_v35, %v846_v2  ;;  %v1539_v48 = vadd.f32 %v1537_v19, %v1534_v28  ;;  %v927_v2 = vmul.f32 %v923_v13, %v919_v52 }
 0x324   : > { %v1564_v34 = vstv %s3230_s23  ;;  %v1512_v9 = vadd.f32 %v1510_v54, %v1507_v25  ;;  %v1620_v49 = vstv %s3243_s8  ;;  %v1619_v55 = vmul.f32 %v1617_v10, %v2774_v24  ;;  %s2493_s23 = smov 96   ;;  %s3334_s8 = sld [smem:[#allocation8 + $0x2c]] }
 0x325   : > { %1487 = vrot.lane.b32.xlu1 %v1484_v58, %s2490_s27  ;;  %1543 = vrot.lane.b32.xlu0 %v1540_v42, %s2491_s6  ;;  %v1566_v52 = vmul.f32 %v1564_v34, %v2760_v16  ;;  %v1562_v35 = vmul.f32 %v1561_v29, %v2772_v23  ;;  %v1622_v63 = vmul.f32 %v1620_v49, %v2760_v16  ;;  %vm1321_vm9 = vcmp.lt.s32.totalorder %v2698_v31, 114 }
 0x326   : > { %1485 = vrot.lane.b32.xlu2 %v1483_v3, %s2490_s27  ;;  %v1618_v19 = vmul.f32 %v1617_v10, %v2772_v23  ;;  %s3296_s27 = sld [smem:[#allocation8 + $0x5c]]  ;;  %v1621_v29 = vmul.f32 %v1620_v49, %v2758_v15  ;;  %v1594_v10 = vmul.f32 %v1592_v11, %v2760_v16  ;;  %vm1349_vm10 = vcmp.lt.s32.totalorder %v2698_v31, 113 }
 0x327   : > { %v888_v17 = vpop.permute.xlu1 %887  ;;  %v944_v18 = vpop.permute.xlu0 %943  ;;  %v1568_v3 = vadd.f32 %v1566_v52, %v1563_v47  ;;  %v1624_v13 = vadd.f32 %v1622_v63, %v1619_v55 }
 0x328   : > { %v890_v7 = vsel %vm889_vm11, %v3172_v44, %v888_v17  ;;  %v891_v20 = vsel %vm889_vm11, %v888_v17, %v3172_v44  ;;  %v1000_v45 = vpop.permute.xlu2 %999  ;;  %v928_v44 = vmul.f32 %v924_v22, %v918_v51  ;;  %v1673_v22 = vstv %s3259_s15  ;;  %v1005_v17 = vld [vmem:[#allocation6 + $0x21] ss:$8 sm:$0x3]  ;;  %s3368_s15 = sld [smem:[#allocation8 + $0x61]] }
 0x329   : > { %v899_v40 = vmul.f32 %v895_v4, %v891_v20  ;;  %v900_v26 = vmul.f32 %v896_v21, %v890_v7  ;;  %v1565_v4 = vmul.f32 %v1564_v34, %v2758_v15  ;;  %v977_v21 = vld [vmem:[#allocation6 + $0x20] ss:$8 sm:$0x3]  ;;  %v1674_v14 = vmul.f32 %v1673_v22, %v2772_v23 }
 0x32a   : > { %v979_v7 = vperm.slane %v977_v21, 0  ;;  %v980_v20 = vperm.slane %v977_v21, 1  ;;  %v1007_v25 = vperm.slane %v1005_v17, 0  ;;  %vm1377_vm11 = vcmp.lt.s32.totalorder %v2698_v31, 112 }
 0x32b   : > { %v901_v5 = vadd.f32 %v899_v40, %v873_v60  ;;  %v902_v8 = vadd.f32 %v900_v26, %v874_v62  ;;  %v1008_v40 = vperm.slane %v1005_v17, 1 }
 0x32d   : > { %1541 = vrot.lane.b32.xlu1 %v1539_v48, %s2491_s6  ;;  %1597 = vrot.lane.b32.xlu0 %v1595_v30, %s2492_s14  ;;  %v929_v61 = vadd.f32 %v927_v2, %v901_v5  ;;  %v930_v46 = vadd.f32 %v928_v44, %v902_v8  ;;  %v1591_v2 = vmul.f32 %v1589_v6, %v2774_v24  ;;  %s3312_s6 = sld [smem:[#allocation8 + $0x2d]] }
 0x32e   : > { %1515 = vrot.lane.b32.xlu2 %v1512_v9, %s2489_s28  ;;  %s3283_s28 = sld [smem:[#allocation8 + $0x5a]]  ;;  %v1623_v8 = vadd.f32 %v1621_v29, %v1618_v19  ;;  %v1033_v9 = vld [vmem:[#allocation6 + $0x22] ss:$8 sm:$0x3] }
 0x32f   : > { %v942_v50 = vpop.permute.xlu1 %941  ;;  %v998_v51 = vpop.permute.xlu0 %997  ;;  %v1035_v6 = vperm.slane %v1033_v9, 0  ;;  %v1036_v11 = vperm.slane %v1033_v9, 1 }
 0x330   : > { %v946_v57 = vsel %vm945_vm12, %v942_v50, %v944_v18  ;;  %v947_v58 = vsel %vm945_vm12, %v944_v18, %v942_v50  ;;  %v1002_v41 = vsel %vm1001_vm13, %v998_v51, %v1000_v45  ;;  %v1003_v59 = vsel %vm1001_vm13, %v1000_v45, %v998_v51  ;;  %v3278_v60 = vpop.permute.xlu2 %1053 }
 0x331   : > { %v955_v62 = vmul.f32 %v951_v56, %v947_v58  ;;  %v956_v42 = vmul.f32 %v952_v43, %v946_v57  ;;  %v1567_v18 = vadd.f32 %v1565_v4, %v1562_v35  ;;  %v1676_v45 = vstv %s3266_s12  ;;  %s2498_s12 = smov 80  }
 0x332   : > { %v1677_v34 = vmul.f32 %v1676_v45, %v2758_v15  ;;  %v1645_v43 = vstv %s3280_s29  ;;  %v1596_v50 = vadd.f32 %v1594_v10, %v1591_v2  ;;  %v1701_v51 = vstv %s3288_s9  ;;  %s2496_s29 = smov 93   ;;  %s3343_s9 = sld [smem:[#allocation8 + $0x5d]] }
 0x333   : > { %v957_v28 = vadd.f32 %v955_v62, %v929_v61  ;;  %v958_v12 = vadd.f32 %v956_v42, %v930_v46  ;;  %v1011_v46 = vmul.f32 %v1007_v25, %v1003_v59  ;;  %v1647_v35 = vmul.f32 %v1645_v43, %v2774_v24 }
 0x334   : > { %v1679_v56 = vadd.f32 %v1677_v34, %v1674_v14  ;;  %v1648_v61 = vstv %s3283_s28  ;;  %v1704_v57 = vstv %s3296_s27  ;;  %v1703_v62 = vmul.f32 %v1701_v51, %v2774_v24  ;;  %s2497_s28 = smov 82   ;;  %s3376_s27 = sld [smem:[#allocation8 + $0x18]] }
 0x335   : > { %1571 = vrot.lane.b32.xlu1 %v1568_v3, %s2493_s23  ;;  %1627 = vrot.lane.b32.xlu0 %v1624_v13, %s2494_s26  ;;  %v1650_v59 = vmul.f32 %v1648_v61, %v2760_v16  ;;  %v1646_v42 = vmul.f32 %v1645_v43, %v2772_v23  ;;  %v1706_v17 = vmul.f32 %v1704_v57, %v2760_v16  ;;  %vm1405_vm12 = vcmp.lt.s32.totalorder %v2698_v31, 111 }
 0x336   : > { %1569 = vrot.lane.b32.xlu2 %v1567_v18, %s2493_s23  ;;  %v1649_v19 = vmul.f32 %v1648_v61, %v2758_v15  ;;  %s3349_s23 = sld [smem:[#allocation8 + $0x5f]]  ;;  %v1705_v9 = vmul.f32 %v1704_v57, %v2758_v15  ;;  %vm1433_vm13 = vcmp.lt.s32.totalorder %v2698_v31, 110 }
 0x337   : > { %v972_v26 = vpop.permute.xlu1 %971  ;;  %v1028_v27 = vpop.permute.xlu0 %1027  ;;  %v1652_v18 = vadd.f32 %v1650_v59, %v1647_v35  ;;  %v1708_v25 = vadd.f32 %v1706_v17, %v1703_v62 }
 0x338   : > { %v974_v48 = vsel %vm973_vm14, %v3225_v53, %v972_v26  ;;  %v975_v30 = vsel %vm973_vm14, %v972_v26, %v3225_v53  ;;  %v1084_v54 = vpop.permute.xlu2 %1083  ;;  %v1012_v53 = vmul.f32 %v1008_v40, %v1002_v41  ;;  %v1757_v40 = vstv %s3312_s6  ;;  %v1089_v26 = vld [vmem:[#allocation6 + $0x24] ss:$8 sm:$0x3]  ;;  %s2501_s6 = smov 77  }
 0x339   : > { %v983_v44 = vmul.f32 %v979_v7, %v975_v30  ;;  %v984_v5 = vmul.f32 %v980_v20, %v974_v48  ;;  %v1061_v7 = vld [vmem:[#allocation6 + $0x23] ss:$8 sm:$0x3]  ;;  %v1760_v30 = vstv %s3319_s24  ;;  %v1758_v34 = vmul.f32 %v1757_v40, %v2772_v23  ;;  %s2502_s24 = smov 78  }
 0x33a   : > { %v1063_v29 = vperm.slane %v1061_v7, 0  ;;  %v1064_v48 = vperm.slane %v1061_v7, 1  ;;  %v1091_v2 = vperm.slane %v1089_v26, 0  ;;  %v1761_v61 = vmul.f32 %v1760_v30, %v2758_v15 }
 0x33b   : > { %v985_v47 = vadd.f32 %v983_v44, %v957_v28  ;;  %v986_v49 = vadd.f32 %v984_v5, %v958_v12  ;;  %v1092_v44 = vperm.slane %v1089_v26, 1  ;;  %v1732_v62 = vstv %s3343_s9  ;;  %s2156_s9 = sshll.u32 %s2555_s22, 6 }
 0x33c   : > { %vm1461_vm14 = vcmp.lt.s32.totalorder %v2698_v31, 109 }
 0x33d   : > { %1625 = vrot.lane.b32.xlu1 %v1623_v8, %s2494_s26  ;;  %1681 = vrot.lane.b32.xlu0 %v1679_v56, %s2495_s11  ;;  %v1013_v52 = vadd.f32 %v1011_v46, %v985_v47  ;;  %v1014_v55 = vadd.f32 %v1012_v53, %v986_v49  ;;  %v1675_v46 = vmul.f32 %v1673_v22, %v2774_v24  ;;  %v1117_v49 = vld [vmem:[#allocation6 + $0x25] ss:$8 sm:$0x3]  ;;  %s3364_s26 = sld [smem:[#allocation8 + $0x30]] }
 0x33e   : > { %1599 = vrot.lane.b32.xlu2 %v1596_v50, %s2492_s14  ;;  %s3338_s14 = sld [smem:[#allocation8 + $0x2e]]  ;;  %v1119_v22 = vperm.slane %v1117_v49, 0 }
 0x33f   : > { %v1026_v58 = vpop.permute.xlu1 %1025  ;;  %v1082_v41 = vpop.permute.xlu0 %1081 }
 0x340   : > { %v1030_v63 = vsel %vm1029_vm15, %v1026_v58, %v1028_v27  ;;  %v1031_v3 = vsel %vm1029_vm15, %v1028_v27, %v1026_v58  ;;  %v1086_v4 = vsel %vm1085_vm0, %v1082_v41, %v1084_v54  ;;  %v1087_v21 = vsel %vm1085_vm0, %v1084_v54, %v1082_v41  ;;  %v3331_v28 = vpop.permute.xlu2 %1137 }
 0x341   : > { %v1039_v12 = vmul.f32 %v1035_v6, %v1031_v3  ;;  %v1040_v13 = vmul.f32 %v1036_v11, %v1030_v63  ;;  %v1651_v27 = vadd.f32 %v1649_v19, %v1646_v42  ;;  %v1702_v54 = vmul.f32 %v1701_v51, %v2772_v23 }
 0x342   : > { %v1763_v6 = vadd.f32 %v1761_v61, %v1758_v34  ;;  %v1678_v51 = vmul.f32 %v1676_v45, %v2760_v16  ;;  %v1729_v11 = vstv %s3334_s8  ;;  %v1120_v45 = vperm.slane %v1117_v49, 1  ;;  %s3381_s8 = sld [smem:[#allocation8 + $0x49]] }
 0x343   : > { %v1041_v20 = vadd.f32 %v1039_v12, %v1013_v52  ;;  %v1042_v14 = vadd.f32 %v1040_v13, %v1014_v55  ;;  %v1707_v50 = vadd.f32 %v1705_v9, %v1702_v54  ;;  %v1096_v52 = vmul.f32 %v1092_v44, %v1086_v4 }
 0x344   : > { %v1680_v57 = vadd.f32 %v1678_v51, %v1675_v46  ;;  %v1785_v58 = vstv %s3338_s14  ;;  %v1788_v42 = vstv %s3349_s23  ;;  %v1731_v4 = vmul.f32 %v1729_v11, %v2774_v24  ;;  %s3397_s14 = sld [smem:[#allocation8 + $0x60]] }
 0x345   : > { %1655 = vrot.lane.b32.xlu1 %v1652_v18, %s2496_s29  ;;  %1711 = vrot.lane.b32.xlu0 %v1708_v25, %s2497_s28  ;;  %v1730_v12 = vmul.f32 %v1729_v11, %v2772_v23  ;;  %v1734_v25 = vmul.f32 %v1732_v62, %v2760_v16  ;;  %v1790_v26 = vmul.f32 %v1788_v42, %v2760_v16  ;;  %vm1489_vm15 = vcmp.lt.s32.totalorder %v2698_v31, 99 }
 0x346   : > { %1653 = vrot.lane.b32.xlu2 %v1651_v27, %s2496_s29  ;;  %v1733_v27 = vmul.f32 %v1732_v62, %v2758_v15  ;;  %v1786_v9 = vmul.f32 %v1785_v58, %v2772_v23  ;;  %s2499_s29 = smov 81   ;;  %v1789_v46 = vmul.f32 %v1788_v42, %v2758_v15  ;;  %vm1517_vm0 = vcmp.lt.s32.totalorder %v2698_v31, 98 }
 0x347   : > { %v1056_v5 = vpop.permute.xlu1 %1055  ;;  %v1112_v8 = vpop.permute.xlu0 %1111 }
 0x348   : > { %v1058_v56 = vsel %vm1057_vm1, %v3278_v60, %v1056_v5  ;;  %v1059_v10 = vsel %vm1057_vm1, %v1056_v5, %v3278_v60  ;;  %v1168_v43 = vpop.permute.xlu2 %1167  ;;  %v1095_v60 = vmul.f32 %v1091_v2, %v1087_v21  ;;  %v1787_v21 = vmul.f32 %v1785_v58, %v2774_v24  ;;  %v1173_v5 = vld [vmem:[#allocation6 + $0x27] ss:$8 sm:$0x3] }
 0x349   : > { %v1067_v53 = vmul.f32 %v1063_v29, %v1059_v10  ;;  %v1068_v47 = vmul.f32 %v1064_v48, %v1058_v56  ;;  %v1145_v29 = vld [vmem:[#allocation6 + $0x26] ss:$8 sm:$0x3]  ;;  %v1841_v48 = vstv %s3364_s26  ;;  %v1736_v2 = vadd.f32 %v1734_v25, %v1731_v4 }
 0x34a   : > { %v1792_v44 = vadd.f32 %v1790_v26, %v1787_v21  ;;  %v1844_v56 = vstv %s3368_s15  ;;  %v1147_v10 = vperm.slane %v1145_v29, 0  ;;  %v1842_v61 = vmul.f32 %v1841_v48, %v2772_v23  ;;  %s1935_s15 = scalar_lea.hbm %s3641_s5, %s2156_s9 }
 0x34b   : > { %v1069_v55 = vadd.f32 %v1067_v53, %v1041_v20  ;;  %v1070_v35 = vadd.f32 %v1068_v47, %v1042_v14  ;;  %v1759_v53 = vmul.f32 %v1757_v40, %v2774_v24  ;;  %v1185_v47 = vstv %s3376_s27  ;;  %s1938_s27 = sshll.u32 %s1935_s15, 4  ;;  %s1939_s27 = int_to_ptr.hbm [resolvable:$true] %s1938_s27 }
 0x34c   : > { %v1175_v49 = vperm.slane %v1173_v5, 0  ;;  %v1845_v11 = vmul.f32 %v1844_v56, %v2758_v15  ;;  %v1187_v42 = vmul.f32 %v1185_v47, %v2774_v24  ;;  %vm1545_vm1 = vcmp.lt.s32.totalorder %v2698_v31, 97 }
 0x34d   : > { %1709 = vrot.lane.b32.xlu1 %v1707_v50, %s2497_s28  ;;  %1765 = vrot.lane.b32.xlu0 %v1763_v6, %s2498_s12  ;;  %v1097_v41 = vadd.f32 %v1095_v60, %v1069_v55  ;;  %v1098_v59 = vadd.f32 %v1096_v52, %v1070_v35  ;;  %s2500_s28 = smov 79   ;;  %v1176_v50 = vperm.slane %v1173_v5, 1  ;;  %v1188_v60 = vstv %s3381_s8  ;;  %s2387_s8 = sshra.s32 %s1939_s27, 4  ;;  %s2388_s8 = int_to_ptr.hbm [resolvable:$true] %s2387_s8 }
 0x34e   : > { %1683 = vrot.lane.b32.xlu2 %v1680_v57, %s2495_s11  ;;  %s3393_s11 = sld [smem:[#allocation8 + $0x2f]]  ;;  %v1791_v57 = vadd.f32 %v1789_v46, %v1786_v9  ;;  %p2394_p11 = scmp.lt.s32.totalorder %s2388_s8, %s3641_s5 }
 0x34f   : > { %v1110_v63 = vpop.permute.xlu1 %1109  ;;  %v1166_v3 = vpop.permute.xlu0 %1165 }
 0x350   : > { %v1114_v13 = vsel %vm1113_vm2, %v1110_v63, %v1112_v8  ;;  %v1115_v17 = vsel %vm1113_vm2, %v1112_v8, %v1110_v63  ;;  %v1170_v18 = vsel %vm1169_vm3, %v1166_v3, %v1168_v43  ;;  %v1171_v19 = vsel %vm1169_vm3, %v1168_v43, %v1166_v3  ;;  %v3387_v7 = vpop.permute.xlu2 %1233 }
 0x351   : > { %v1123_v20 = vmul.f32 %v1119_v22, %v1115_v17  ;;  %v1124_v14 = vmul.f32 %v1120_v45, %v1114_v13  ;;  %v1735_v8 = vadd.f32 %v1733_v27, %v1730_v12  ;;  %v1148_v43 = vperm.slane %v1145_v29, 1 }
 0x352   : > { %v1762_v22 = vmul.f32 %v1760_v30, %v2760_v16  ;;  %v1847_v45 = vadd.f32 %v1845_v11, %v1842_v61  ;;  %v1189_v63 = vmul.f32 %v1188_v60, %v2758_v15  ;;  %v1179_v3 = vmul.f32 %v1175_v49, %v1171_v19 }
 0x353   : > { %v1125_v54 = vadd.f32 %v1123_v20, %v1097_v41  ;;  %v1126_v34 = vadd.f32 %v1124_v14, %v1098_v59  ;;  %v1186_v41 = vmul.f32 %v1185_v47, %v2772_v23  ;;  %v1213_v59 = vld [vmem:[#allocation6 + $0x31] ss:$8 sm:$0x3]  ;;  %v1180_v4 = vmul.f32 %v1176_v50, %v1170_v18  ;;  %v1241_v47 = vld [vmem:[#allocation6 + $0x32] ss:$8 sm:$0x3] }
 0x354   : > { %v1764_v62 = vadd.f32 %v1762_v22, %v1759_v53  ;;  %v1215_v30 = vperm.slane %v1213_v59, 0  ;;  %v1813_v13 = vstv %s3393_s11  ;;  %v1816_v17 = vstv %s3397_s14  ;;  %s2389_s11 = scalar_lea.hbm %s2388_s8, 64 }
 0x355   : > { %1739 = vrot.lane.b32.xlu1 %v1736_v2, %s2499_s29  ;;  %1795 = vrot.lane.b32.xlu0 %v1792_v44, %s2500_s28  ;;  %v1216_v25 = vperm.slane %v1213_v59, 1  ;;  %v1191_v18 = vadd.f32 %v1189_v63, %v1186_v41  ;;  %v1815_v29 = vmul.f32 %v1813_v13, %v2774_v24  ;;  %v1817_v53 = vmul.f32 %v1816_v17, %v2758_v15  ;;  %p2390_p1 = scmp.ne.s32.totalorder %s2388_s8, %s2389_s11 }
 0x356   : > { %1737 = vrot.lane.b32.xlu2 %v1735_v8, %s2499_s29  ;;  %v1846_v59 = vmul.f32 %v1844_v56, %v2760_v16  ;;  %vm1573_vm2 = vcmp.lt.s32.totalorder %v2698_v31, 96  ;;  %vm1601_vm3 = vcmp.lt.s32.totalorder %v2698_v31, 95 }
 0x357   : > { %v1140_v6 = vpop.permute.xlu1 %1139  ;;  %v1208_v51 = vpop.permute.xlu0 %1207  ;;  %p2391_p4 = pnand %p2390_p1, %p2606_p5 }
 0x358   : > { %v1142_v52 = vsel %vm1141_vm4, %v3331_v28, %v1140_v6  ;;  %v1143_v55 = vsel %vm1141_vm4, %v1140_v6, %v3331_v28  ;;  %v1264_v35 = vpop.permute.xlu2 %1263  ;;  %v1190_v28 = vmul.f32 %v1188_v60, %v2760_v16  ;;  %v1244_v60 = vperm.slane %v1241_v47, 1 }
 0x359   : > { %v1151_v40 = vmul.f32 %v1147_v10, %v1143_v55  ;;  %v1152_v58 = vmul.f32 %v1148_v43, %v1142_v52  ;;  %vm1629_vm4 = vcmp.lt.s32.totalorder %v2698_v31, 94  ;;  %p2392_p8 = pneg %p2391_p4 }
 0x35a   : > { %v1192_v19 = vadd.f32 %v1190_v28, %v1187_v42 }
 0x35b   : > { %v1153_v21 = vadd.f32 %v1151_v40, %v1125_v54  ;;  %v1154_v12 = vadd.f32 %v1152_v58, %v1126_v34  ;;  %v1818_v54 = vmul.f32 %v1816_v17, %v2760_v16  ;;  %v1814_v34 = vmul.f32 %v1813_v13, %v2772_v23  ;;  %v1269_v23 = vld [vmem:[#allocation6 + $0x33] ss:$8 sm:$0x3] }
 0x35c   : > { %v1271_v52 = vperm.slane %v1269_v23, 0  ;;  %v1272_v55 = vperm.slane %v1269_v23, 1  ;;  %v1843_v58 = vmul.f32 %v1841_v48, %v2774_v24 }
 0x35d   : > { %v1181_v20 = vadd.f32 %v1179_v3, %v1153_v21  ;;  %v1182_v14 = vadd.f32 %v1180_v4, %v1154_v12  ;;  %1793 = vrot.lane.b32.xlu1 %v1791_v57, %s2500_s28  ;;  %1849 = vrot.lane.b32.xlu0 %v1847_v45, %s2501_s6  ;;  %v1820_v6 = vadd.f32 %v1818_v54, %v1815_v29  ;;  %s2393_s28 = scalar_lea.hbm %s3641_s5, 128 }
 0x35e   : > { %1767 = vrot.lane.b32.xlu2 %v1764_v62, %s2498_s12  ;;  %v1819_v11 = vadd.f32 %v1817_v53, %v1814_v34  ;;  %v1297_v62 = vld [vmem:[#allocation6 + $0x34] ss:$8 sm:$0x3]  ;;  %v1848_v4 = vadd.f32 %v1846_v59, %v1843_v58  ;;  %s275_s12 = scalar_lea.vmem [#allocation9], %s2043_s10  ;;  %s1924_s10 = scalar_lea.sflag [#allocation4], %s2636_s7 }
 0x35f   : > { %v1206_v26 = vpop.permute.xlu1 %1205  ;;  %v1262_v27 = vpop.permute.xlu0 %1261  ;;  %v1193_v10 = vadd.f32 %v1191_v18, %v1181_v20  ;;  %v1194_v43 = vadd.f32 %v1192_v19, %v1182_v14  ;;  %v1299_v21 = vperm.slane %v1297_v62, 0  ;;  %v1325_v14 = vld [vmem:[#allocation6 + $0x35] ss:$8 sm:$0x3]  ;;  %s1936_s22 = sshll.u32 %s275_s12, 4  ;;  %p2395_p9 = scmp.lt.s32.totalorder %s2393_s28, %s2389_s11  ;;  %s1937_s22 = int_to_ptr.vmem [resolvable:$true] %s1936_s22 }
 0x360   : > { %v1210_v2 = vsel %vm1209_vm5, %v1206_v26, %v1208_v51  ;;  %v1211_v44 = vsel %vm1209_vm5, %v1208_v51, %v1206_v26  ;;  %v1266_v5 = vsel %vm1265_vm6, %v1262_v27, %v1264_v35  ;;  %v1267_v8 = vsel %vm1265_vm6, %v1264_v35, %v1262_v27  ;;  %v1318_v9 = vpop.permute.xlu2 %1317 }
 0x361   : > { %v1219_v61 = vmul.f32 %v1215_v30, %v1210_v2  ;;  %v1220_v46 = vmul.f32 %v1216_v25, %v1211_v44  ;;  %v1243_v51 = vperm.slane %v1241_v47, 0  ;;  %v1275_v42 = vmul.f32 %v1271_v52, %v1266_v5  ;;  %p2396_p2 = por %p2395_p9, %p2394_p11 }
 0x362   : > { %v1276_v63 = vmul.f32 %v1272_v55, %v1267_v8  ;;  %v1327_v19 = vperm.slane %v1325_v14, 0  ;;  %v1328_v26 = vperm.slane %v1325_v14, 1  ;;  %vm1657_vm5 = vcmp.lt.s32.totalorder %v2698_v31, 93 }
 0x363   : > { %v1221_v49 = vadd.f32 %v1219_v61, %v1193_v10  ;;  %v1222_v50 = vadd.f32 %v1220_v46, %v1194_v43  ;;  %vm1685_vm6 = vcmp.lt.s32.totalorder %v2698_v31, 83  ;;  %p2397_p10 = pnand %p2396_p2, %p2392_p8 }
 0x365   : > { %1823 = vrot.lane.b32.xlu1 %v1820_v6, %s2502_s24 }
 0x366   : > { %1821 = vrot.lane.b32.xlu2 %v1819_v11, %s2502_s24 }
 0x367   : > { %v1236_v35 = vpop.permute.xlu1 %1235  ;;  %v1292_v57 = vpop.permute.xlu0 %1291 }
 0x368   : > { %v1238_v15 = vsel %vm1237_vm7, %v3387_v7, %v1236_v35  ;;  %v1239_v22 = vsel %vm1237_vm7, %v1236_v35, %v3387_v7  ;;  %v3440_v40 = vpop.permute.xlu2 %1347  ;;  %v1300_v7 = vperm.slane %v1297_v62, 1  ;;  %v1353_v35 = vld [vmem:[#allocation6 + $0x36] ss:$8 sm:$0x3]  ;;  %vm1713_vm7 = vcmp.lt.s32.totalorder %v2698_v31, 82 }
 0x369   : > { %v1247_v45 = vmul.f32 %v1243_v51, %v1238_v15  ;;  %v1248_v41 = vmul.f32 %v1244_v60, %v1239_v22  ;;  %v1355_v58 = vperm.slane %v1353_v35, 0 }
 0x36b   : > { %v1249_v28 = vadd.f32 %v1247_v45, %v1221_v49  ;;  %v1250_v3 = vadd.f32 %v1248_v41, %v1222_v50  ;;  %v1409_v45 = vld [vmem:[#allocation6 + $0x40] ss:$8 sm:$0x3]  ;;  %v1356_v41 = vperm.slane %v1353_v35, 1 }
 0x36d   : > { %v1277_v12 = vadd.f32 %v1275_v42, %v1249_v28  ;;  %v1278_v30 = vadd.f32 %v1276_v63, %v1250_v3 }
 0x36e   : > { %1851 = vrot.lane.b32.xlu2 %v1848_v4, %s2501_s6  ;;  %v1411_v4 = vperm.slane %v1409_v45, 0 }
 0x36f   : > { %v1290_v24 = vpop.permute.xlu1 %1289  ;;  %v1346_v48 = vpop.permute.xlu0 %1345 }
 0x370   : > { %v1294_v13 = vsel %vm1293_vm8, %v1290_v24, %v1292_v57  ;;  %v1295_v17 = vsel %vm1293_vm8, %v1292_v57, %v1290_v24  ;;  %v1402_v20 = vpop.permute.xlu2 %1401  ;;  %v1381_v57 = vld [vmem:[#allocation6 + $0x37] ss:$8 sm:$0x3]  ;;  %v1350_v42 = vsel %vm1349_vm10, %v1346_v48, %v3440_v40  ;;  %v1351_v63 = vsel %vm1349_vm10, %v3440_v40, %v1346_v48 }
 0x371   : > { %v1303_v16 = vmul.f32 %v1299_v21, %v1294_v13  ;;  %v1304_v56 = vmul.f32 %v1300_v7, %v1295_v17  ;;  %v1383_v59 = vperm.slane %v1381_v57, 0  ;;  %v1384_v62 = vperm.slane %v1381_v57, 1 }
 0x372   : > { %v1412_v21 = vperm.slane %v1409_v45, 1  ;;  %v1360_v24 = vmul.f32 %v1356_v41, %v1351_v63  ;;  %vm1741_vm8 = vcmp.lt.s32.totalorder %v2698_v31, 81  ;;  %vm1797_vm10 = vcmp.lt.s32.totalorder %v2698_v31, 79 }
 0x373   : > { %v1305_v25 = vadd.f32 %v1303_v16, %v1277_v12  ;;  %v1306_v18 = vadd.f32 %v1304_v56, %v1278_v30  ;;  %v1359_v30 = vmul.f32 %v1355_v58, %v1350_v42  ;;  %v1437_v16 = vld [vmem:[#allocation6 + $0x41] ss:$8 sm:$0x3]  ;;  %v1465_v56 = vld [vmem:[#allocation6 + $0x42] ss:$8 sm:$0x3] }
 0x377   : > { %v1320_v27 = vpop.permute.xlu1 %1319  ;;  %v1376_v29 = vpop.permute.xlu0 %1375 }
 0x378   : > { %v1322_v54 = vsel %vm1321_vm9, %v1318_v9, %v1320_v27  ;;  %v1323_v34 = vsel %vm1321_vm9, %v1320_v27, %v1318_v9  ;;  %v3451_v2 = vpop.permute.xlu2 %1431  ;;  %v1440_v27 = vperm.slane %v1437_v16, 1  ;;  %vm1769_vm9 = vcmp.lt.s32.totalorder %v2698_v31, 80 }
 0x379   : > { %v1331_v44 = vmul.f32 %v1327_v19, %v1322_v54  ;;  %v1332_v5 = vmul.f32 %v1328_v26, %v1323_v34  ;;  %v1493_v54 = vld [vmem:[#allocation6 + $0x43] ss:$8 sm:$0x3] }
 0x37a   : > { %v1495_v58 = vperm.slane %v1493_v54, 0  ;;  %v1496_v45 = vperm.slane %v1493_v54, 1 }
 0x37b   : > { %v1333_v8 = vadd.f32 %v1331_v44, %v1305_v25  ;;  %v1334_v10 = vadd.f32 %v1332_v5, %v1306_v18  ;;  %v1468_v5 = vperm.slane %v1465_v56, 1 }
 0x37d   : > { %v1361_v25 = vadd.f32 %v1359_v30, %v1333_v8  ;;  %v1362_v40 = vadd.f32 %v1360_v24, %v1334_v10 }
 0x37f   : > { %v1374_v43 = vpop.permute.xlu1 %1373  ;;  %v1430_v61 = vpop.permute.xlu0 %1429 }
 0x380   : > { %v3453_v46 = vpop.permute.xlu2 %1485  ;;  %v1378_v28 = vsel %vm1377_vm11, %v1374_v43, %v1376_v29  ;;  %v1379_v3 = vsel %vm1377_vm11, %v1376_v29, %v1374_v43  ;;  %v1467_v29 = vperm.slane %v1465_v56, 0  ;;  %v1434_v8 = vsel %vm1433_vm13, %v1430_v61, %v3451_v2 }
 0x381   : > { %v1387_v13 = vmul.f32 %v1383_v59, %v1378_v28  ;;  %v1388_v17 = vmul.f32 %v1384_v62, %v1379_v3  ;;  %v1435_v10 = vsel %vm1433_vm13, %v3451_v2, %v1430_v61  ;;  %v1521_v3 = vld [vmem:[#allocation6 + $0x44] ss:$8 sm:$0x3]  ;;  %v1549_v2 = vld [vmem:[#allocation6 + $0x45] ss:$8 sm:$0x3] }
 0x382   : > { %v1444_v42 = vmul.f32 %v1440_v27, %v1435_v10  ;;  %v1524_v30 = vperm.slane %v1521_v3, 1  ;;  %v1633_v10 = vld [vmem:[#allocation6 + $0x50] ss:$8 sm:$0x3]  ;;  %vm1853_vm11 = vcmp.lt.s32.totalorder %v2698_v31, 77 }
 0x383   : > { %v1389_v34 = vadd.f32 %v1387_v13, %v1361_v25  ;;  %v1390_v44 = vadd.f32 %v1388_v17, %v1362_v40  ;;  %v1552_v17 = vperm.slane %v1549_v2, 1 }
 0x387   : > { %v1404_v53 = vpop.permute.xlu1 %1403  ;;  %v1460_v47 = vpop.permute.xlu0 %1459 }
 0x388   : > { %v3455_v49 = vpop.permute.xlu2 %1515  ;;  %v1406_v7 = vsel %vm1405_vm12, %v1402_v20, %v1404_v53  ;;  %v1407_v12 = vsel %vm1405_vm12, %v1404_v53, %v1402_v20  ;;  %v1439_v20 = vperm.slane %v1437_v16, 0  ;;  %vm1825_vm12 = vcmp.lt.s32.totalorder %v2698_v31, 78 }
 0x389   : > { %v1415_v48 = vmul.f32 %v1411_v4, %v1406_v7  ;;  %v1416_v18 = vmul.f32 %v1412_v21, %v1407_v12  ;;  %v1523_v12 = vperm.slane %v1521_v3, 0 }
 0x38a   : > { %v1443_v62 = vmul.f32 %v1439_v20, %v1434_v8  ;;  %v1605_v8 = vld [vmem:[#allocation6 + $0x47] ss:$8 sm:$0x3] }
 0x38b   : > { %v1417_v35 = vadd.f32 %v1415_v48, %v1389_v34  ;;  %v1418_v57 = vadd.f32 %v1416_v18, %v1390_v44 }
 0x38d   : > { %v1445_v61 = vadd.f32 %v1443_v62, %v1417_v35 }
 0x38f   : > { %v1458_v50 = vpop.permute.xlu1 %1457  ;;  %v3457_v6 = vpop.permute.xlu0 %1513 }
 0x390   : > { %v3459_v23 = vpop.permute.xlu2 %1569  ;;  %v1462_v43 = vsel %vm1461_vm14, %v1458_v50, %v1460_v47  ;;  %v1463_v53 = vsel %vm1461_vm14, %v1460_v47, %v1458_v50  ;;  %v1446_v47 = vadd.f32 %v1444_v42, %v1418_v57  ;;  %v1518_v56 = vsel %vm1517_vm0, %v3457_v6, %v3455_v49 }
 0x391   : > { %v1471_v63 = vmul.f32 %v1467_v29, %v1462_v43  ;;  %v1472_v28 = vmul.f32 %v1468_v5, %v1463_v53  ;;  %v1519_v25 = vsel %vm1517_vm0, %v3455_v49, %v3457_v6  ;;  %v1527_v6 = vmul.f32 %v1523_v12, %v1518_v56 }
 0x392   : > { %v1528_v34 = vmul.f32 %v1524_v30, %v1519_v25  ;;  %v1607_v57 = vperm.slane %v1605_v8, 0 }
 0x393   : > { %v1473_v24 = vadd.f32 %v1471_v63, %v1445_v61  ;;  %v1474_v13 = vadd.f32 %v1472_v28, %v1446_v47 }
 0x397   : > { %v1488_v9 = vpop.permute.xlu1 %1487  ;;  %v3461_v11 = vpop.permute.xlu0 %1543 }
 0x398   : > { %v3463_v51 = vpop.permute.xlu2 %1599  ;;  %v1490_v41 = vsel %vm1489_vm15, %v3453_v46, %v1488_v9  ;;  %v1491_v59 = vsel %vm1489_vm15, %v1488_v9, %v3453_v46  ;;  %v1551_v46 = vperm.slane %v1549_v2, 0  ;;  %v1577_v9 = vld [vmem:[#allocation6 + $0x46] ss:$8 sm:$0x3] }
 0x399   : > { %v1499_v50 = vmul.f32 %v1495_v58, %v1490_v41  ;;  %v1500_v4 = vmul.f32 %v1496_v45, %v1491_v59  ;;  %v1579_v27 = vperm.slane %v1577_v9, 0  ;;  %v1580_v29 = vperm.slane %v1577_v9, 1  ;;  %v1661_v41 = vld [vmem:[#allocation6 + $0x51] ss:$8 sm:$0x3] }
 0x39a   : > { %v1608_v58 = vperm.slane %v1605_v8, 1  ;;  %v1635_v45 = vperm.slane %v1633_v10, 0  ;;  %v1636_v59 = vperm.slane %v1633_v10, 1  ;;  %v1663_v47 = vperm.slane %v1661_v41, 0 }
 0x39b   : > { %v1501_v18 = vadd.f32 %v1499_v50, %v1473_v24  ;;  %v1502_v20 = vadd.f32 %v1500_v4, %v1474_v13  ;;  %v1664_v50 = vperm.slane %v1661_v41, 1  ;;  %v1689_v24 = vld [vmem:[#allocation6 + $0x52] ss:$8 sm:$0x3] }
 0x39c   : > { %v1717_v13 = vld [vmem:[#allocation6 + $0x53] ss:$8 sm:$0x3] }
 0x39f   : > { %v3465_v60 = vpop.permute.xlu1 %1541  ;;  %v3467_v52 = vpop.permute.xlu0 %1597 }
 0x3a0   : > { %v3469_v55 = vpop.permute.xlu2 %1653  ;;  %v1546_v40 = vsel %vm1545_vm1, %v3465_v60, %v3461_v11  ;;  %v1547_v48 = vsel %vm1545_vm1, %v3461_v11, %v3465_v60  ;;  %v1529_v11 = vadd.f32 %v1527_v6, %v1501_v18  ;;  %v1530_v60 = vadd.f32 %v1528_v34, %v1502_v20  ;;  %v1745_v20 = vld [vmem:[#allocation6 + $0x54] ss:$8 sm:$0x3] }
 0x3a1   : > { %v1555_v44 = vmul.f32 %v1551_v46, %v1546_v40  ;;  %v1556_v5 = vmul.f32 %v1552_v17, %v1547_v48  ;;  %v1602_v42 = vsel %vm1601_vm3, %v3467_v52, %v3463_v51  ;;  %v1603_v63 = vsel %vm1601_vm3, %v3463_v51, %v3467_v52 }
 0x3a2   : > { %v1611_v51 = vmul.f32 %v1607_v57, %v1602_v42  ;;  %v1612_v52 = vmul.f32 %v1608_v58, %v1603_v63  ;;  %v1691_v40 = vperm.slane %v1689_v24, 0  ;;  %v1692_v48 = vperm.slane %v1689_v24, 1  ;;  %v1773_v57 = vld [vmem:[#allocation6 + $0x55] ss:$8 sm:$0x3] }
 0x3a3   : > { %v1719_v18 = vperm.slane %v1717_v13, 0  ;;  %v1748_v8 = vperm.slane %v1745_v20, 1  ;;  %v1776_v42 = vperm.slane %v1773_v57, 1 }
 0x3a7   : > { %v3473_v15 = vpop.permute.xlu1 %1571  ;;  %v3475_v22 = vpop.permute.xlu0 %1627 }
 0x3a8   : > { %v3482_v14 = vpop.permute.xlu2 %1683  ;;  %v1574_v54 = vsel %vm1573_vm2, %v3459_v23, %v3473_v15  ;;  %v1575_v49 = vsel %vm1573_vm2, %v3473_v15, %v3459_v23  ;;  %v1557_v23 = vadd.f32 %v1555_v44, %v1529_v11  ;;  %v1558_v15 = vadd.f32 %v1556_v5, %v1530_v60 }
 0x3a9   : > { %v1583_v43 = vmul.f32 %v1579_v27, %v1574_v54  ;;  %v1584_v53 = vmul.f32 %v1580_v29, %v1575_v49  ;;  %v1720_v27 = vperm.slane %v1717_v13, 1  ;;  %v1747_v5 = vperm.slane %v1745_v20, 0 }
 0x3ab   : > { %v1585_v2 = vadd.f32 %v1583_v43, %v1557_v23  ;;  %v1586_v61 = vadd.f32 %v1584_v53, %v1558_v15 }
 0x3af   : > { %v3484_v19 = vpop.permute.xlu1 %1625  ;;  %v3486_v26 = vpop.permute.xlu0 %1681 }
 0x3b0   : > { %v3506_v16 = vpop.permute.xlu2 %1737  ;;  %v1630_v28 = vsel %vm1629_vm4, %v3484_v19, %v3475_v22  ;;  %v1631_v3 = vsel %vm1629_vm4, %v3475_v22, %v3484_v19  ;;  %v1613_v22 = vadd.f32 %v1611_v51, %v1585_v2  ;;  %v1614_v19 = vadd.f32 %v1612_v52, %v1586_v61  ;;  %v1829_v2 = vld [vmem:[#allocation6 + $0x57] ss:$8 sm:$0x3]  ;;  %v1857_v52 = vld [vmem:[#allocation6 + $0x60] ss:$8 sm:$0x3] }
 0x3b1   : > { %v1639_v46 = vmul.f32 %v1635_v45, %v1630_v28  ;;  %v1640_v9 = vmul.f32 %v1636_v59, %v1631_v3  ;;  %v1686_v29 = vsel %vm1685_vm6, %v3486_v26, %v3482_v14  ;;  %v1687_v54 = vsel %vm1685_vm6, %v3482_v14, %v3486_v26 }
 0x3b2   : > { %v1695_v43 = vmul.f32 %v1691_v40, %v1686_v29  ;;  %v1696_v53 = vmul.f32 %v1692_v48, %v1687_v54  ;;  %v1775_v59 = vperm.slane %v1773_v57, 0  ;;  %v1860_v40 = vperm.slane %v1857_v52, 1 }
 0x3b7   : > { %v1656_v21 = vpop.permute.xlu1 %1655  ;;  %v3503_v7 = vpop.permute.xlu0 %1711 }
 0x3b8   : > { %v1768_v4 = vpop.permute.xlu2 %1767  ;;  %v1658_v12 = vsel %vm1657_vm5, %v3469_v55, %v1656_v21  ;;  %v1659_v30 = vsel %vm1657_vm5, %v1656_v21, %v3469_v55  ;;  %v1641_v55 = vadd.f32 %v1639_v46, %v1613_v22  ;;  %v1642_v21 = vadd.f32 %v1640_v9, %v1614_v19 }
 0x3b9   : > { %v1667_v17 = vmul.f32 %v1663_v47, %v1658_v12  ;;  %v1668_v56 = vmul.f32 %v1664_v50, %v1659_v30  ;;  %v1831_v46 = vperm.slane %v1829_v2, 0  ;;  %v1832_v9 = vperm.slane %v1829_v2, 1 }
 0x3bb   : > { %v1669_v34 = vadd.f32 %v1667_v17, %v1641_v55  ;;  %v1670_v44 = vadd.f32 %v1668_v56, %v1642_v21 }
 0x3bd   : > { %v1698_v45 = vadd.f32 %v1696_v53, %v1670_v44 }
 0x3bf   : > { %v1710_v35 = vpop.permute.xlu1 %1709  ;;  %v3531_v62 = vpop.permute.xlu0 %1765 }
 0x3c0   : > { %v1714_v49 = vsel %vm1713_vm7, %v1710_v35, %v3503_v7  ;;  %v1715_v6 = vsel %vm1713_vm7, %v3503_v7, %v1710_v35  ;;  %v1822_v58 = vpop.permute.xlu2 %1821  ;;  %v1801_v7 = vld [vmem:[#allocation6 + $0x56] ss:$8 sm:$0x3]  ;;  %v1697_v35 = vadd.f32 %v1695_v43, %v1669_v34  ;;  %v1770_v61 = vsel %vm1769_vm9, %v3531_v62, %v1768_v4 }
 0x3c1   : > { %v1723_v14 = vmul.f32 %v1719_v18, %v1714_v49  ;;  %v1724_v26 = vmul.f32 %v1720_v27, %v1715_v6  ;;  %v1803_v28 = vperm.slane %v1801_v7, 0  ;;  %v1804_v3 = vperm.slane %v1801_v7, 1 }
 0x3c2   : > { %v1771_v47 = vsel %vm1769_vm9, %v1768_v4, %v3531_v62  ;;  %v1779_v24 = vmul.f32 %v1775_v59, %v1770_v61 }
 0x3c3   : > { %v1725_v63 = vadd.f32 %v1723_v14, %v1697_v35  ;;  %v1780_v13 = vmul.f32 %v1776_v42, %v1771_v47 }
 0x3c7   : > { %v1740_v25 = vpop.permute.xlu1 %1739  ;;  %v1796_v10 = vpop.permute.xlu0 %1795 }
 0x3c8   : > { %v1742_v11 = vsel %vm1741_vm8, %v3506_v16, %v1740_v25  ;;  %v1743_v60 = vsel %vm1741_vm8, %v1740_v25, %v3506_v16  ;;  %v1726_v16 = vadd.f32 %v1724_v26, %v1698_v45  ;;  %v1852_v4 = vpop.permute.xlu2 %1851  ;;  %v1859_v25 = vperm.slane %v1857_v52, 0 }
 0x3c9   : > { %v1751_v41 = vmul.f32 %v1747_v5, %v1742_v11  ;;  %v1752_v23 = vmul.f32 %v1748_v8, %v1743_v60 }
 0x3cb   : > { %v1753_v30 = vadd.f32 %v1751_v41, %v1725_v63  ;;  %v1754_v51 = vadd.f32 %v1752_v23, %v1726_v16 }
 0x3cd   : > { %v1781_v17 = vadd.f32 %v1779_v24, %v1753_v30  ;;  %v1782_v56 = vadd.f32 %v1780_v13, %v1754_v51 }
 0x3cf   : > { %v1794_v15 = vpop.permute.xlu1 %1793  ;;  %v1850_v62 = vpop.permute.xlu0 %1849 }
 0x3d0   : > { %v1798_v50 = vsel %vm1797_vm10, %v1794_v15, %v1796_v10  ;;  %v1799_v12 = vsel %vm1797_vm10, %v1796_v10, %v1794_v15  ;;  %v1854_v18 = vsel %vm1853_vm11, %v1850_v62, %v1852_v4  ;;  %v1855_v20 = vsel %vm1853_vm11, %v1852_v4, %v1850_v62 }
 0x3d1   : > { %v1807_v22 = vmul.f32 %v1803_v28, %v1798_v50  ;;  %v1808_v19 = vmul.f32 %v1804_v3, %v1799_v12  ;;  %v1863_v6 = vmul.f32 %v1859_v25, %v1854_v18  ;;  %v1864_v34 = vmul.f32 %v1860_v40, %v1855_v20 }
 0x3d3   : > { %v1809_v27 = vadd.f32 %v1807_v22, %v1781_v17  ;;  %v1810_v29 = vadd.f32 %v1808_v19, %v1782_v56 }
 0x3d7   : > { %v1824_v48 = vpop.permute.xlu1 %1823 }
 0x3d8   : > { %v1826_v55 = vsel %vm1825_vm12, %v1822_v58, %v1824_v48  ;;  %v1827_v21 = vsel %vm1825_vm12, %v1824_v48, %v1822_v58 }
 0x3d9   : > { %v1835_v54 = vmul.f32 %v1831_v46, %v1826_v55  ;;  %v1836_v49 = vmul.f32 %v1832_v9, %v1827_v21 }
 0x3db   : > { %v1837_v44 = vadd.f32 %v1835_v54, %v1809_v27  ;;  %v1838_v5 = vadd.f32 %v1836_v49, %v1810_v29 }
 0x3dd   : > { %v1865_v8 = vadd.f32 %v1863_v6, %v1837_v44  ;;  %v1866_v10 = vadd.f32 %v1864_v34, %v1838_v5 }
 0x3df   : > { %v2148_v11 = vmul.f32 -1.442695, %v1865_v8  ;;  %v2149_v60 = vmul.f32 -1.442695, %v1866_v10 }
 0x3e1   : > { %2290 = vpow2.f32 %v2148_v11 }
 0x3e2   : > { %2292 = vpow2.f32 %v2149_v60 }
 0x3e7   : > { %v2291_v43 = vpop.eup %2290 }
 0x3e8   : > { %v2293_v53 = vpop.eup %2292  ;;  %v1873_v14 = vadd.f32 1.0, %v2291_v43 }
 0x3e9   : > { %v1874_v26 = vadd.f32 1.0, %v2293_v53 }
 0x3ea   : > { %2294 = vrcp.f32 %v1873_v14  ;;  %v1886_v45 = vand.u32 2147483648, %v1873_v14  ;;  %v1884_v15 = vand.u32 2147483647, %v1873_v14  ;;  %vm1880_vm15 = vweird.f32 %v1873_v14 }
 0x3eb   : > { %2296 = vrcp.f32 %v1874_v26  ;;  %v1901_v59 = vand.u32 2147483648, %v1874_v26  ;;  %v1899_v63 = vand.u32 2147483647, %v1874_v26  ;;  %vm1895_vm1 = vweird.f32 %v1874_v26 }
 0x3ec   : > { %v1887_v28 = vor.u32 1.1754944e-38, %v1886_v45  ;;  %vm1885_vm2 = vcmp.eq.f32.partialorder %v1884_v15, 8.507059e+37 }
 0x3ed   : > { %v1902_v61 = vor.u32 1.1754944e-38, %v1901_v59  ;;  %vm1900_vm4 = vcmp.eq.f32.partialorder %v1899_v63, 8.507059e+37 }
 0x3f0   : > { %v2295_v31 = vpop.eup %2294 }
 0x3f1   : > { %v2297_v57 = vpop.eup %2296  ;;  %v1876_v58 = vmul.f32 %v2295_v31, %v1873_v14  ;;  %vm1881_vm13 = vweird.f32 %v2295_v31 }
 0x3f2   : > { %v1891_v7 = vmul.f32 %v2297_v57, %v1874_v26  ;;  %vm1896_vm14 = vweird.f32 %v2297_v57  ;;  %vm1882_vm0 = vmor %vm1880_vm15, %vm1881_vm13 }
 0x3f3   : > { %v1877_v35 = vsub.f32 1.0, %v1876_v58  ;;  %vm1897_vm3 = vmor %vm1895_vm1, %vm1896_vm14 }
 0x3f4   : > { %v1892_v41 = vsub.f32 1.0, %v1891_v7 }
 0x3f5   : > { %v1878_v23 = vmul.f32 %v2295_v31, %v1877_v35 }
 0x3f6   : > { %v1893_v42 = vmul.f32 %v2297_v57, %v1892_v41 }
 0x3f7   : > { %v1879_v16 = vadd.f32 %v2295_v31, %v1878_v23 }
 0x3f8   : > { %v1894_v3 = vadd.f32 %v2297_v57, %v1893_v42 }
 0x3f9   : > { %v1883_v2 = vsel %vm1882_vm0, %v2295_v31, %v1879_v16 }
 0x3fa   : > { %v1888_v47 = vsel %vm1885_vm2, %v1887_v28, %v1883_v2  ;;  %v1898_v50 = vsel %vm1897_vm3, %v2297_v57, %v1894_v3 }
 0x3fb   : > { %v1903_v12 = vsel %vm1900_vm4, %v1902_v61, %v1898_v50  ;;  %v1905_v30 = vperm.slane %v1888_v47, 0 }
 0x3fc   : > { %v1906_v51 = vperm.slane %v1903_v12, 0 }
 0x3fd   : > { %v1907_v52 = vmul.f32 %v1905_v30, %v2709_v32  ;;  %v1909_v46 = vmul.f32 %v1905_v30, %v2721_v38  ;;  %v1911_v13 = vmul.f32 %v1905_v30, %v2715_v36  ;;  %v1913_v32 = vmul.f32 %v1905_v30, %v2727_v0 }
 0x3fe   : > { %v1908_v9 = vmul.f32 %v1906_v51, %v2712_v33  ;;  %v1910_v24 = vmul.f32 %v1906_v51, %v2724_v39  ;;  %v1912_v22 = vmul.f32 %v1906_v51, %v2718_v37  ;;  %v1914_v33 = vmul.f32 %v1906_v51, %v2730_v1 }
 0x3ff   : > { %1915 = vst [vmem:[%s275_s12] sm:$0xff] %v1907_v52 }
 0x400   : > { %1916 = vst [vmem:[%s275_s12 + $0x8] sm:$0xff] %v1908_v9 }
 0x401   : > { %1917 = vst [vmem:[%s275_s12 + $0x10] sm:$0xff] %v1909_v46 }
 0x402   : > { %1918 = vst [vmem:[%s275_s12 + $0x18] sm:$0xff] %v1910_v24 }
 0x403   : > { %1919 = vst [vmem:[%s275_s12 + $0x20] sm:$0xff] %v1911_v13 }
 0x404   : > { %1920 = vst [vmem:[%s275_s12 + $0x28] sm:$0xff] %v1912_v22 }
 0x405   : > { %1921 = vst [vmem:[%s275_s12 + $0x30] sm:$0xff] %v1913_v32 }
 0x406   : > { %1922 = vst [vmem:[%s275_s12 + $0x38] sm:$0xff] %v1914_v33 }
 0x407   : > { %2400 = shalt.err (!%p2397_p10)
}
 0x408   : > { %s2503_s7 = smov 256  }
 0x409   : > { %2167 = dma.vmem_to_hbm [thread:$0]  (%p2606_p5), %s1937_s22, 1024, %s1939_s27, %s1924_s10, %s2503_s7, %s2503_s7, %s2471_s30  }
 0x40a PF: > { %s1953_s9 = sand.u32 1, %s2435_s18   ;;  %p3649_p12 = scmp.ge.s32.totalorder %s2447_s21, 2 }
 0x40b   : > { %s1954_s23 = scalar_lea.sflag [#allocation4], %s1953_s9 }
 0x40c   : > { %p2181_p13 = pnand %p3649_p12, %p2569_p6 }
 0x40e   : > { %p2182_p0 = pneg %p2181_p13 }
 0x410   : > { %2430 = dma.done.wait (%p2182_p0), %s1954_s23, 1024  }
 0x411   : > { %2432 = vsyncadd (%p2182_p0), %s1954_s23, 4294966272  ;;  %p20_p3 = scmp.ge.s32.totalorder %s2593_s13, 4   ;;  %s3650_s18 = smov %s2439_s19 }
 0x412   : > { %s3651_s19 = smov %s2443_s20  ;;  %s3652_s20 = smov %s2602_s16 }
 0x413   : > { %s3653_s21 = smov %s2593_s13  ;;  %22 = sbr.rel (!%p20_p3) target bundleno = 7 (0x7), region = 141 }
 0x418   :  { %1960 = vsyncpa [#allocation3], 1 }
 0x419   :  { %1962 = vsyncpa [#allocation3 + $0x1], 1 }
 0x41a   :  { %1963 = vsyncpa [#allocation7], 1 }
 0x41b   :  { %1964 = vsyncpa [#allocation4], 1 }
 0x41c   :  { %1966 = vsyncpa [#allocation4 + $0x1], 1 }
 0x41d   :  { %1967 = vsyncpa [#allocation5], 1 }
 0x41e   :  { %1969 = vsyncpa [#allocation5 + $0x1], 1 }

</bundles_post_ra>
